<compile_context>
chip_gen: v7x
topology: tpu7x:2x2x1
jax: 0.10.0
libtpu: 0.0.40
codegen_flags: <defaults>
</compile_context>

<pallas_src>
import functools

import jax
import jax.numpy as jnp
from jax.experimental import pallas as pl
from jax.experimental.pallas import tpu as pltpu

LANE = 128                    # TPU lane width
SUBLANE = 8                   # f32 sublanes per vreg
TILE_ROWS = 16384             # rows of 128 lanes per block: 8 MiB f32 / 4 MiB bf16
SMALL_N = 256 * 1024          # below this, plain jnp beats the custom-call launch
VMEM_LIMIT = 32 * 1024 * 1024 # safe scoped-VMEM budget on v5e/v6e/v7x


def _tensorcores_per_chip():
    """2 on v7x-class (2 TensorCores per chip), else 1.  Conservative default."""
    try:
        dev = jax.local_devices()[0]
        if dev.platform != "tpu":
            return 1
        kind = str(getattr(dev, "device_kind", "")).lower()
        if "v7" in kind:
            return 2
    except Exception:  # pragma: no cover - defensive
        pass
    return 1


def _elementwise_loss(x, gan_mode, target):
    """Per-element loss in f32 (used for the fast path and the ragged tail)."""
    x = x.astype(jnp.float32)
    if gan_mode == "lsgan":
        d = x - target
        return d * d
    if gan_mode == "vanilla":
        # BCEWithLogitsLoss, numerically stable form.
        return jnp.maximum(x, 0.0) - x * target + jnp.log1p(jnp.exp(-jnp.abs(x)))
    if gan_mode == "wgangp":
        return -x if target < 0.0 else x
    raise NotImplementedError("not implemented gan mode")


def _gan_loss_kernel(x_ref, o_ref, acc_ref, *, gan_mode, target,
                     rows_per_split, tile_rows):
    """Processes one (1, tile_rows, 128) block of the prediction slab.

    x_ref  : (1, tile_rows, LANE) native-dtype VMEM block.
    o_ref  : (1, SUBLANE, LANE) f32 block -- lane-dense per-split partial sums.
    acc_ref: (SUBLANE, LANE) f32 scratch -- running per-(sublane, lane) sum.
    """
    k = pl.program_id(1)
    k_last = pl.num_programs(1) - 1

    @pl.when(k == 0)
    def _init():
        acc_ref[...] = jnp.zeros_like(acc_ref)

    # Upcast per-tile; the DMA stays in the native dtype (e.g. bf16).
    x = x_ref[0].astype(jnp.float32)            # (tile_rows, LANE)

    if gan_mode == "lsgan":
        d = x - target                          # MSELoss: (x - t)^2
        val = d * d
    elif gan_mode == "vanilla":
        # BCEWithLogitsLoss: max(x,0) - x*t + log(1 + exp(-|x|))
        val = jnp.maximum(x, 0.0) - x * target + jnp.log1p(jnp.exp(-jnp.abs(x)))
    elif gan_mode == "wgangp":
        val = -x if target < 0.0 else x         # sign baked in statically
    else:
        raise NotImplementedError("not implemented gan mode")

    def _fold(v):
        # (tile_rows, LANE) -> (SUBLANE, LANE): each (8,128) group is one full
        # vreg, so this is pure vreg-wide vadds (no cross-sublane XLU work).
        return jnp.sum(v.reshape(tile_rows // SUBLANE, SUBLANE, LANE), axis=0)

    ragged_rows = rows_per_split % tile_rows    # valid rows in last block (0 => exact)

    if ragged_rows == 0:
        acc_ref[...] += _fold(val)
    else:
        @pl.when(k < k_last)
        def _add_full():
            acc_ref[...] += _fold(val)

        @pl.when(k == k_last)
        def _add_masked():
            # Rows past rows_per_split in the boundary block hold unspecified
            # VMEM data (possibly NaN); jnp.where does not propagate values
            # from the unselected arm, so masking here is safe.
            row = jax.lax.broadcasted_iota(jnp.int32, (tile_rows, LANE), 0)
            acc_ref[...] += _fold(jnp.where(row < ragged_rows, val, 0.0))

    @pl.when(k == k_last)
    def _finalize():
        # Lane-dense (8,128) store; the cross-lane reduce happens in the wrapper.
        o_ref[...] = acc_ref[...][None]


def gan_loss(prediction, target_is_real, *, gan_mode,
             target_real_label=1.0, target_fake_label=0.0,
             tile_rows=TILE_ROWS, min_pallas_size=SMALL_N):
    """Pallas implementation of GAN_Loss.forward.

    prediction:     any-shape float array (discriminator output, e.g. NCHW).
    target_is_real: Python bool (static, as in the PyTorch module).
    Returns a scalar f32 loss.
    """
    x = jnp.asarray(prediction)
    if not jnp.issubdtype(x.dtype, jnp.floating):
        x = x.astype(jnp.float32)

    if gan_mode in ("lsgan", "vanilla"):
        target = float(target_real_label if target_is_real else target_fake_label)
    elif gan_mode == "wgangp":
        target = -1.0 if target_is_real else 1.0
    else:
        raise NotImplementedError("not implemented gan mode")

    n = int(x.size)
    x_flat = x.reshape(-1)

    nsplit = _tensorcores_per_chip()            # 2 -> core-parallel split on v7x
    chunk = nsplit * LANE

    # Fast path: tiny discriminator outputs (typical PatchGAN 30x30) are cheaper
    # to reduce with plain XLA than to pay the custom-call launch + grid cost.
    if n < min_pallas_size or n < chunk:
        return jnp.mean(_elementwise_loss(x_flat, gan_mode, target))

    rows_per_split = n // chunk
    n_main = rows_per_split * chunk
    tail = n - n_main                           # < chunk ragged elements

    x3d = x_flat[:n_main].reshape(nsplit, rows_per_split, LANE)

    # Block rows: multiple of 8 sublanes, no larger than needed for the slab.
    def _round_up(a, b):
        return ((a + b - 1) // b) * b

    tr = min(int(tile_rows), _round_up(rows_per_split, SUBLANE))
    tr = max(SUBLANE, (tr // SUBLANE) * SUBLANE)
    num_blocks = pl.cdiv(rows_per_split, tr)

    if nsplit > 1:
        dim_sem = (pltpu.CORE_PARALLEL, pltpu.ARBITRARY)
    else:
        dim_sem = (pltpu.ARBITRARY, pltpu.ARBITRARY)

    itemsize = jnp.dtype(x.dtype).itemsize
    if gan_mode == "vanilla":
        flops, transc = 4 * n_main, 2 * n_main
    elif gan_mode == "lsgan":
        flops, transc = 3 * n_main, 0
    else:
        flops, transc = 2 * n_main, 0
    cost = pl.CostEstimate(
        flops=flops, transcendentals=transc,
        bytes_accessed=n_main * itemsize + nsplit * SUBLANE * LANE * 4)

    kernel = functools.partial(
        _gan_loss_kernel, gan_mode=gan_mode, target=target,
        rows_per_split=rows_per_split, tile_rows=tr)

    partials = pl.pallas_call(
        kernel,
        out_shape=jax.ShapeDtypeStruct((nsplit, SUBLANE, LANE), jnp.float32),
        grid=(nsplit, num_blocks),
        in_specs=[pl.BlockSpec((1, tr, LANE), lambda c, k: (c, k, 0))],
        out_specs=pl.BlockSpec((1, SUBLANE, LANE), lambda c, k: (c, 0, 0)),
        scratch_shapes=[pltpu.VMEM((SUBLANE, LANE), jnp.float32)],
        compiler_params=pltpu.CompilerParams(
            dimension_semantics=dim_sem,
            vmem_limit_bytes=VMEM_LIMIT),
        cost_estimate=cost,
    )(x3d)

    total = jnp.sum(partials)
    if tail:
        total = total + jnp.sum(_elementwise_loss(x_flat[n_main:], gan_mode, target))
    return total / jnp.float32(n)


# ---------------- pure-JAX reference for verification ----------------
def _ref_loss(prediction, target_is_real, gan_mode,
              real_label=1.0, fake_label=0.0):
    x = jnp.asarray(prediction, dtype=jnp.float32)
    if gan_mode == "lsgan":
        t = real_label if target_is_real else fake_label
        return jnp.mean((x - t) ** 2)
    if gan_mode == "vanilla":
        t = real_label if target_is_real else fake_label
        return jnp.mean(jnp.maximum(x, 0.0) - x * t + jnp.log1p(jnp.exp(-jnp.abs(x))))
    if gan_mode == "wgangp":
        return -jnp.mean(x) if target_is_real else jnp.mean(x)
    raise NotImplementedError


if __name__ == "__main__":
    cases = []

    # Large, lane-aligned f32 slab: default big-block Pallas path, single/full blocks.
    p_big = jax.random.normal(jax.random.PRNGKey(0), (4, 8, 128, 128), dtype=jnp.float32)
    cases.append(("f32_large", p_big, {}))

    # Same data in bf16: native-dtype DMA with per-tile f32 upcast.
    cases.append(("bf16_large", p_big.astype(jnp.bfloat16), {}))

    # Odd-sized output forced onto the Pallas path with a tiny tile so the
    # multi-block reduction, ragged last block and the pure-JAX tail all run.
    p_rag = jax.random.normal(jax.random.PRNGKey(2), (2, 3, 31, 31), dtype=jnp.float32)
    cases.append(("f32_ragged", p_rag, {"tile_rows": 16, "min_pallas_size": 0}))

    # Typical PatchGAN-sized output: exercises the small-input jnp fast path.
    p_small = jax.random.normal(jax.random.PRNGKey(3), (2, 1, 30, 30), dtype=jnp.float32)
    cases.append(("f32_small_fastpath", p_small, {}))

    ok = True
    for name, pred, kw in cases:
        for mode in ("lsgan", "vanilla", "wgangp"):
            for target_is_real in (True, False):
                got = jax.block_until_ready(
                    gan_loss(pred, target_is_real, gan_mode=mode, **kw))
                want = _ref_loss(pred, target_is_real, mode)
                if not jnp.allclose(got, want, rtol=1e-4, atol=1e-5):
                    ok = False
                    print(f"MISMATCH case={name} mode={mode} real={target_is_real} "
                          f"got={got} want={want}")

    if ok:
        print("KERNEL_OK")
</pallas_src>

<mosaic_0001>
module attributes {stable_mosaic.version = 11 : i64} {
  func.func @_gan_loss_kernel(%arg0: i32, %arg1: i32, %arg2: memref<1x4096x128xf32, #tpu.memory_space<vmem>>, %arg3: memref<1x8x128xf32, #tpu.memory_space<vmem>>, %arg4: memref<8x128xf32, #tpu.memory_space<vmem>>) attributes {dimension_semantics = [#tpu.dimension_semantics<arbitrary>, #tpu.dimension_semantics<arbitrary>], iteration_bounds = array<i64: 1, 1>, scalar_prefetch = 0 : i64, scratch_operands = 1 : i64, tpu.core_type = #tpu.core_type<tc>, window_params = [{transform_indices = @transform_0, window_bounds = array<i64: 1, 4096, 128>}, {transform_indices = @transform_1, window_bounds = array<i64: 1, 8, 128>}]} {
    %c0_i32 = arith.constant 0 : i32
    %0 = arith.cmpi eq, %arg1, %c0_i32 : i32
    %1 = arith.extui %0 : i1 to i32
    %c0_i32_0 = arith.constant 0 : i32
    %2 = arith.cmpi ne, %1, %c0_i32_0 : i32
    scf.if %2 {
      %cst_10 = arith.constant 0.000000e+00 : f32
      %16 = vector.broadcast %cst_10 : f32 to vector<8x128xf32>
      %c0_11 = arith.constant 0 : index
      %c0_12 = arith.constant 0 : index
      %17 = vector.load %arg4[%c0_11, %c0_12] : memref<8x128xf32, #tpu.memory_space<vmem>>, vector<8x128xf32>
      tpu.vector_store %arg4[%c0_11, %c0_12], %16 {strides = array<i32>} : memref<8x128xf32, #tpu.memory_space<vmem>>, vector<8x128xf32>,
    } else {
    }
    %c0 = arith.constant 0 : index
    %c0_1 = arith.constant 0 : index
    %c0_2 = arith.constant 0 : index
    %3 = vector.load %arg2[%c0, %c0_1, %c0_2] : memref<1x4096x128xf32, #tpu.memory_space<vmem>>, vector<1x4096x128xf32>
    %4 = vector.shape_cast %3 : vector<1x4096x128xf32> to vector<4096x128xf32>
    %cst = arith.constant 1.000000e+00 : f32
    %5 = vector.broadcast %cst : f32 to vector<4096x128xf32>
    %6 = arith.subf %4, %5 : vector<4096x128xf32>
    %7 = arith.mulf %6, %6 : vector<4096x128xf32>
    %c0_3 = arith.constant 0 : index
    %c0_4 = arith.constant 0 : index
    %8 = vector.load %arg4[%c0_3, %c0_4] : memref<8x128xf32, #tpu.memory_space<vmem>>, vector<8x128xf32>
    %9 = vector.shape_cast %7 : vector<4096x128xf32> to vector<512x8x128xf32>
    %cst_5 = arith.constant dense<0.000000e+00> : vector<8x128xf32>
    %10 = vector.multi_reduction <add>, %9, %cst_5 [0] : vector<512x8x128xf32> to vector<8x128xf32>
    %11 = arith.addf %8, %10 : vector<8x128xf32>
    %c0_6 = arith.constant 0 : index
    %c0_7 = arith.constant 0 : index
    %12 = vector.load %arg4[%c0_6, %c0_7] : memref<8x128xf32, #tpu.memory_space<vmem>>, vector<8x128xf32>
    tpu.vector_store %arg4[%c0_6, %c0_7], %11 {strides = array<i32>} : memref<8x128xf32, #tpu.memory_space<vmem>>, vector<8x128xf32>,
    %c0_i32_8 = arith.constant 0 : i32
    %13 = arith.cmpi eq, %arg1, %c0_i32_8 : i32
    %14 = arith.extui %13 : i1 to i32
    %c0_i32_9 = arith.constant 0 : i32
    %15 = arith.cmpi ne, %14, %c0_i32_9 : i32
    scf.if %15 {
      %c0_10 = arith.constant 0 : index
      %c0_11 = arith.constant 0 : index
      %16 = vector.load %arg4[%c0_10, %c0_11] : memref<8x128xf32, #tpu.memory_space<vmem>>, vector<8x128xf32>
      %17 = vector.shape_cast %16 : vector<8x128xf32> to vector<1x8x128xf32>
      %c0_12 = arith.constant 0 : index
      %c0_13 = arith.constant 0 : index
      %c0_14 = arith.constant 0 : index
      %18 = vector.load %arg3[%c0_12, %c0_13, %c0_14] : memref<1x8x128xf32, #tpu.memory_space<vmem>>, vector<1x8x128xf32>
      tpu.vector_store %arg3[%c0_12, %c0_13, %c0_14], %17 {strides = array<i32>} : memref<1x8x128xf32, #tpu.memory_space<vmem>>, vector<1x8x128xf32>,
    } else {
    }
    return
  }
  func.func @transform_0(%arg0: i32, %arg1: i32) -> (i32, i32, i32) {
    %c0_i32 = arith.constant 0 : i32
    %c0_i32_0 = arith.constant 0 : i32
    return %arg0, %arg1, %c0_i32 : i32, i32, i32
  }
  func.func @transform_1(%arg0: i32, %arg1: i32) -> (i32, i32, i32) {
    %c0_i32 = arith.constant 0 : i32
    %c0_i32_0 = arith.constant 0 : i32
    %c0_i32_1 = arith.constant 0 : i32
    return %arg0, %c0_i32, %c0_i32_0 : i32, i32, i32
  }
}

</mosaic_0001>

<bundles_post_ra>
// kernel: tpu_custom_call.1
= control target key start
LH: loop header
LB: loop body
LE: loop exit
PB: predicated region body
PF: predicated region fallthrough
CT: control target
= control target key end

     0   :  { %6 = vsyncpa [#allocation4], 0  ;;  %s2700_s0 = inlined_call_operand.hbm [shape: f32[1,4096,128], index: 0, kind: input, shape index: {}]   ;;  %s2701_s1 = inlined_call_operand.hbm [shape: f32[1,8,128], index: 1, kind: output, shape index: {}]  }
   0x1   :  { %7 = vsyncpa [#allocation5], 0  ;;  %s2662_s6 = smov [#allocation3]   ;;  %s2614_s10 = scalar_lea.hbm %s2700_s0, 65536 }
   0x2   :  { %s13_s7 = sshll.u32 %s2662_s6, 4  ;;  %p2615_p0 = scmp.ne.s32.totalorder %s2700_s0, %s2614_s10  ;;  %s14_s7 = int_to_ptr.vmem [resolvable:$true] %s13_s7 }
   0x3   :  { %p2618_p1 = scmp.lt.u32.totalorder %s2614_s10, %s2700_s0 }
   0x5   :  { %p2620_p2 = pnand %p2618_p1, %p2615_p0 }
   0x7   :  { %2623 = shalt.err (!%p2620_p2)
}
   0x8   :  { %s2624_s15 = scalar_lea.vmem %s14_s7, 65536  ;;  %p2629_p4 = scmp.lt.s32.totalorder %s14_s7, %s14_s7 }
   0x9   :  { %p2625_p3 = scmp.ne.s32.totalorder %s14_s7, %s2624_s15  ;;  %p2630_p5 = scmp.lt.s32.totalorder %s2624_s15, %s2624_s15 }
   0xb   :  { %p2631_p6 = por %p2630_p5, %p2629_p4 }
   0xd   :  { %p2632_p7 = pnand %p2631_p6, %p2625_p3 }
   0xf   :  { %2635 = shalt.err (!%p2632_p7)
}
  0x10   :  { %s2663_s16 = smov 128   ;;  %s2664_s17 = smov 8  }
  0x11   :  { %19 = dma.hbm_to_vmem [thread:$0]  %s2700_s0, 65536, %s14_s7, [#allocation4], %s2663_s16, %s2663_s16, %s2664_s17  }
  0x12   :  { %2658 = dma.done.wait [#allocation4], 65536  }
  0x13   :  { %2659 = vsyncadd [#allocation4], 4294901760  ;;  %v28_v0 = vld [vmem:[#allocation3] sm:$0xff]  ;;  %v29_v1 = vld [vmem:[#allocation3 + $0x8] sm:$0xff]  ;;  %s2665_s0 = smov [#allocation6]  }
  0x14   :  { %v30_v2 = vld [vmem:[#allocation3 + $0x10] sm:$0xff]  ;;  %v2098_v3 = vadd.f32 -1.0, %v28_v0  ;;  %v2099_v4 = vadd.f32 -1.0, %v29_v1  ;;  %v31_v5 = vld [vmem:[#allocation3 + $0x18] sm:$0xff]  ;;  %v32_v7 = vld [vmem:[#allocation3 + $0x20] sm:$0xff]  ;;  %s2089_s20 = sshll.u32 %s2665_s0, 4  ;;  %s2090_s20 = int_to_ptr.vmem [resolvable:$true] %s2089_s20 }
  0x15   :  { %v2100_v6 = vadd.f32 -1.0, %v30_v2  ;;  %v2101_v8 = vadd.f32 -1.0, %v31_v5  ;;  %v33_v11 = vld [vmem:[#allocation3 + $0x28] sm:$0xff]  ;;  %v2102_v12 = vadd.f32 -1.0, %v32_v7  ;;  %v34_v14 = vld [vmem:[#allocation3 + $0x30] sm:$0xff]  ;;  %v35_v18 = vld [vmem:[#allocation3 + $0x38] sm:$0xff]  ;;  %p2641_p9 = scmp.lt.s32.totalorder %s2090_s20, %s2090_s20 }
  0x16   :  { %v1052_v9 = vmul.f32 %v2098_v3, %v2098_v3  ;;  %v1053_v10 = vmul.f32 %v2099_v4, %v2099_v4  ;;  %v2103_v15 = vadd.f32 -1.0, %v33_v11  ;;  %v2104_v19 = vadd.f32 -1.0, %v34_v14  ;;  %v36_v22 = vld [vmem:[#allocation3 + $0x40] sm:$0xff]  ;;  %v37_v26 = vld [vmem:[#allocation3 + $0x48] sm:$0xff]  ;;  %v38_v30 = vld [vmem:[#allocation3 + $0x50] sm:$0xff]  ;;  %s2636_s21 = scalar_lea.vmem %s2090_s20, 128 }
  0x17   :  { %v1054_v13 = vmul.f32 %v2100_v6, %v2100_v6  ;;  %v1055_v16 = vmul.f32 %v2101_v8, %v2101_v8  ;;  %v1056_v20 = vmul.f32 %v2102_v12, %v2102_v12  ;;  %v2105_v23 = vadd.f32 -1.0, %v35_v18  ;;  %v39_v34 = vld [vmem:[#allocation3 + $0x58] sm:$0xff]  ;;  %v40_v38 = vld [vmem:[#allocation3 + $0x60] sm:$0xff]  ;;  %v41_v42 = vld [vmem:[#allocation3 + $0x68] sm:$0xff]  ;;  %p2637_p8 = scmp.ne.s32.totalorder %s2090_s20, %s2636_s21  ;;  %p2642_p10 = scmp.lt.s32.totalorder %s2636_s21, %s2636_s21 }
  0x18   :  { %v1565_v17 = vadd.f32 %v1053_v10, %v1052_v9  ;;  %v1057_v24 = vmul.f32 %v2103_v15, %v2103_v15  ;;  %v2106_v27 = vadd.f32 -1.0, %v36_v22  ;;  %v1058_v28 = vmul.f32 %v2104_v19, %v2104_v19  ;;  %v42_v46 = vld [vmem:[#allocation3 + $0x70] sm:$0xff]  ;;  %v43_v50 = vld [vmem:[#allocation3 + $0x78] sm:$0xff]  ;;  %v44_v54 = vld [vmem:[#allocation3 + $0x80] sm:$0xff] }
  0x19   :  { %v2107_v31 = vadd.f32 -1.0, %v37_v26  ;;  %v1059_v32 = vmul.f32 %v2105_v23, %v2105_v23  ;;  %v2108_v35 = vadd.f32 -1.0, %v38_v30  ;;  %v2109_v39 = vadd.f32 -1.0, %v39_v34  ;;  %v45_v58 = vld [vmem:[#allocation3 + $0x88] sm:$0xff]  ;;  %v46_v62 = vld [vmem:[#allocation3 + $0x90] sm:$0xff]  ;;  %v47_v2 = vld [vmem:[#allocation3 + $0x98] sm:$0xff]  ;;  %p2643_p11 = por %p2642_p10, %p2641_p9 }
  0x1a   :  { %v1566_v21 = vadd.f32 %v1565_v17, %v1054_v13  ;;  %v1060_v36 = vmul.f32 %v2106_v27, %v2106_v27  ;;  %v2110_v43 = vadd.f32 -1.0, %v40_v38  ;;  %v2111_v47 = vadd.f32 -1.0, %v41_v42  ;;  %v48_v6 = vld [vmem:[#allocation3 + $0xa0] sm:$0xff]  ;;  %v49_v10 = vld [vmem:[#allocation3 + $0xa8] sm:$0xff]  ;;  %v50_v14 = vld [vmem:[#allocation3 + $0xb0] sm:$0xff] }
  0x1b   :  { %v1061_v40 = vmul.f32 %v2107_v31, %v2107_v31  ;;  %v1062_v44 = vmul.f32 %v2108_v35, %v2108_v35  ;;  %v1063_v48 = vmul.f32 %v2109_v39, %v2109_v39  ;;  %v2112_v51 = vadd.f32 -1.0, %v42_v46  ;;  %v51_v18 = vld [vmem:[#allocation3 + $0xb8] sm:$0xff]  ;;  %v52_v22 = vld [vmem:[#allocation3 + $0xc0] sm:$0xff]  ;;  %v53_v26 = vld [vmem:[#allocation3 + $0xc8] sm:$0xff]  ;;  %p2644_p12 = pnand %p2643_p11, %p2637_p8 }
  0x1c   :  { %v1567_v25 = vadd.f32 %v1566_v21, %v1055_v16  ;;  %v1064_v52 = vmul.f32 %v2110_v43, %v2110_v43  ;;  %v2113_v55 = vadd.f32 -1.0, %v43_v50  ;;  %v1065_v56 = vmul.f32 %v2111_v47, %v2111_v47  ;;  %v54_v30 = vld [vmem:[#allocation3 + $0xd0] sm:$0xff]  ;;  %v55_v34 = vld [vmem:[#allocation3 + $0xd8] sm:$0xff]  ;;  %v56_v38 = vld [vmem:[#allocation3 + $0xe0] sm:$0xff] }
  0x1d   :  { %v2114_v59 = vadd.f32 -1.0, %v44_v54  ;;  %v1066_v60 = vmul.f32 %v2112_v51, %v2112_v51  ;;  %v2115_v63 = vadd.f32 -1.0, %v45_v58  ;;  %v2116_v3 = vadd.f32 -1.0, %v46_v62  ;;  %v57_v42 = vld [vmem:[#allocation3 + $0xe8] sm:$0xff]  ;;  %v58_v46 = vld [vmem:[#allocation3 + $0xf0] sm:$0xff]  ;;  %v59_v50 = vld [vmem:[#allocation3 + $0xf8] sm:$0xff] }
  0x1e   :  { %v1568_v29 = vadd.f32 %v1567_v25, %v1056_v20  ;;  %v1067_v0 = vmul.f32 %v2113_v55, %v2113_v55  ;;  %v2117_v7 = vadd.f32 -1.0, %v47_v2  ;;  %v2118_v11 = vadd.f32 -1.0, %v48_v6  ;;  %v60_v54 = vld [vmem:[#allocation3 + $0x100] sm:$0xff]  ;;  %v61_v58 = vld [vmem:[#allocation3 + $0x108] sm:$0xff]  ;;  %v62_v62 = vld [vmem:[#allocation3 + $0x110] sm:$0xff] }
  0x1f   :  { %v1068_v4 = vmul.f32 %v2114_v59, %v2114_v59  ;;  %v1069_v8 = vmul.f32 %v2115_v63, %v2115_v63  ;;  %v1070_v12 = vmul.f32 %v2116_v3, %v2116_v3  ;;  %v2119_v15 = vadd.f32 -1.0, %v49_v10  ;;  %v63_v2 = vld [vmem:[#allocation3 + $0x118] sm:$0xff]  ;;  %v64_v6 = vld [vmem:[#allocation3 + $0x120] sm:$0xff]  ;;  %v65_v10 = vld [vmem:[#allocation3 + $0x128] sm:$0xff] }
  0x20   :  { %v1569_v33 = vadd.f32 %v1568_v29, %v1057_v24  ;;  %v1071_v16 = vmul.f32 %v2117_v7, %v2117_v7  ;;  %v2120_v19 = vadd.f32 -1.0, %v50_v14  ;;  %v1072_v20 = vmul.f32 %v2118_v11, %v2118_v11  ;;  %v66_v14 = vld [vmem:[#allocation3 + $0x130] sm:$0xff] }
  0x21   :  { %v2121_v23 = vadd.f32 -1.0, %v51_v18  ;;  %v1073_v24 = vmul.f32 %v2119_v15, %v2119_v15  ;;  %v2122_v27 = vadd.f32 -1.0, %v52_v22  ;;  %v2123_v31 = vadd.f32 -1.0, %v53_v26  ;;  %v67_v18 = vld [vmem:[#allocation3 + $0x138] sm:$0xff]  ;;  %v68_v22 = vld [vmem:[#allocation3 + $0x140] sm:$0xff]  ;;  %v69_v26 = vld [vmem:[#allocation3 + $0x148] sm:$0xff] }
  0x22   :  { %v1570_v37 = vadd.f32 %v1569_v33, %v1058_v28  ;;  %v1074_v28 = vmul.f32 %v2120_v19, %v2120_v19  ;;  %v2124_v35 = vadd.f32 -1.0, %v54_v30  ;;  %v2125_v39 = vadd.f32 -1.0, %v55_v34  ;;  %v70_v30 = vld [vmem:[#allocation3 + $0x150] sm:$0xff]  ;;  %v71_v34 = vld [vmem:[#allocation3 + $0x158] sm:$0xff] }
  0x23   :  { %v2126_v43 = vadd.f32 -1.0, %v56_v38  ;;  %v2127_v47 = vadd.f32 -1.0, %v57_v42  ;;  %v2128_v51 = vadd.f32 -1.0, %v58_v46  ;;  %v2129_v55 = vadd.f32 -1.0, %v59_v50  ;;  %v72_v38 = vld [vmem:[#allocation3 + $0x160] sm:$0xff]  ;;  %v73_v42 = vld [vmem:[#allocation3 + $0x168] sm:$0xff] }
  0x24   :  { %v1571_v41 = vadd.f32 %v1570_v37, %v1059_v32  ;;  %v1075_v32 = vmul.f32 %v2121_v23, %v2121_v23  ;;  %v2130_v59 = vadd.f32 -1.0, %v60_v54  ;;  %v2131_v63 = vadd.f32 -1.0, %v61_v58  ;;  %v74_v46 = vld [vmem:[#allocation3 + $0x170] sm:$0xff]  ;;  %v75_v50 = vld [vmem:[#allocation3 + $0x178] sm:$0xff]  ;;  %v76_v54 = vld [vmem:[#allocation3 + $0x180] sm:$0xff] }
  0x25   :  { %v2132_v3 = vadd.f32 -1.0, %v62_v62  ;;  %v2133_v7 = vadd.f32 -1.0, %v63_v2  ;;  %v2134_v11 = vadd.f32 -1.0, %v64_v6  ;;  %v2135_v15 = vadd.f32 -1.0, %v65_v10  ;;  %v77_v58 = vld [vmem:[#allocation3 + $0x188] sm:$0xff]  ;;  %v78_v62 = vld [vmem:[#allocation3 + $0x190] sm:$0xff] }
  0x26   :  { %v1572_v45 = vadd.f32 %v1571_v41, %v1060_v36  ;;  %v1076_v36 = vmul.f32 %v2122_v27, %v2122_v27  ;;  %v2136_v19 = vadd.f32 -1.0, %v66_v14  ;;  %v2137_v23 = vadd.f32 -1.0, %v67_v18  ;;  %v79_v2 = vld [vmem:[#allocation3 + $0x198] sm:$0xff]  ;;  %v80_v6 = vld [vmem:[#allocation3 + $0x1a0] sm:$0xff]  ;;  %v81_v10 = vld [vmem:[#allocation3 + $0x1a8] sm:$0xff] }
  0x27   :  { %v2138_v27 = vadd.f32 -1.0, %v68_v22  ;;  %v82_v14 = vld [vmem:[#allocation3 + $0x1b0] sm:$0xff]  ;;  %v83_v18 = vld [vmem:[#allocation3 + $0x1b8] sm:$0xff]  ;;  %v84_v22 = vld [vmem:[#allocation3 + $0x1c0] sm:$0xff] }
  0x28   :  { %v1573_v49 = vadd.f32 %v1572_v45, %v1061_v40  ;;  %v1077_v40 = vmul.f32 %v2123_v31, %v2123_v31  ;;  %v2139_v31 = vadd.f32 -1.0, %v69_v26  ;;  %v85_v26 = vld [vmem:[#allocation3 + $0x1c8] sm:$0xff] }
  0x2a   :  { %v1574_v53 = vadd.f32 %v1573_v49, %v1062_v44  ;;  %v1078_v44 = vmul.f32 %v2124_v35, %v2124_v35  ;;  %v2140_v35 = vadd.f32 -1.0, %v70_v30  ;;  %v86_v30 = vld [vmem:[#allocation3 + $0x1d0] sm:$0xff] }
  0x2c   :  { %v1575_v57 = vadd.f32 %v1574_v53, %v1063_v48  ;;  %v1079_v48 = vmul.f32 %v2125_v39, %v2125_v39  ;;  %v2141_v39 = vadd.f32 -1.0, %v71_v34  ;;  %v87_v34 = vld [vmem:[#allocation3 + $0x1d8] sm:$0xff] }
  0x2e   :  { %v1576_v61 = vadd.f32 %v1575_v57, %v1064_v52  ;;  %v1080_v52 = vmul.f32 %v2126_v43, %v2126_v43  ;;  %v2142_v43 = vadd.f32 -1.0, %v72_v38  ;;  %v88_v38 = vld [vmem:[#allocation3 + $0x1e0] sm:$0xff] }
  0x30   :  { %v1577_v1 = vadd.f32 %v1576_v61, %v1065_v56  ;;  %v1081_v56 = vmul.f32 %v2127_v47, %v2127_v47  ;;  %v2143_v47 = vadd.f32 -1.0, %v73_v42  ;;  %v89_v42 = vld [vmem:[#allocation3 + $0x1e8] sm:$0xff] }
  0x32   :  { %v1578_v5 = vadd.f32 %v1577_v1, %v1066_v60  ;;  %v1082_v60 = vmul.f32 %v2128_v51, %v2128_v51  ;;  %v2144_v51 = vadd.f32 -1.0, %v74_v46  ;;  %v90_v46 = vld [vmem:[#allocation3 + $0x1f0] sm:$0xff] }
  0x34   :  { %v1579_v9 = vadd.f32 %v1578_v5, %v1067_v0  ;;  %v1083_v0 = vmul.f32 %v2129_v55, %v2129_v55  ;;  %v2145_v55 = vadd.f32 -1.0, %v75_v50  ;;  %v91_v50 = vld [vmem:[#allocation3 + $0x1f8] sm:$0xff] }
  0x36   :  { %v1580_v13 = vadd.f32 %v1579_v9, %v1068_v4  ;;  %v1084_v4 = vmul.f32 %v2130_v59, %v2130_v59  ;;  %v2146_v59 = vadd.f32 -1.0, %v76_v54  ;;  %v92_v54 = vld [vmem:[#allocation3 + $0x200] sm:$0xff] }
  0x38   :  { %v1581_v17 = vadd.f32 %v1580_v13, %v1069_v8  ;;  %v1085_v8 = vmul.f32 %v2131_v63, %v2131_v63  ;;  %v2147_v63 = vadd.f32 -1.0, %v77_v58  ;;  %v93_v58 = vld [vmem:[#allocation3 + $0x208] sm:$0xff] }
  0x3a   :  { %v1582_v21 = vadd.f32 %v1581_v17, %v1070_v12  ;;  %v1086_v12 = vmul.f32 %v2132_v3, %v2132_v3  ;;  %v2148_v3 = vadd.f32 -1.0, %v78_v62  ;;  %v94_v62 = vld [vmem:[#allocation3 + $0x210] sm:$0xff] }
  0x3c   :  { %v1583_v25 = vadd.f32 %v1582_v21, %v1071_v16  ;;  %v1087_v16 = vmul.f32 %v2133_v7, %v2133_v7  ;;  %v2149_v7 = vadd.f32 -1.0, %v79_v2  ;;  %v95_v2 = vld [vmem:[#allocation3 + $0x218] sm:$0xff] }
  0x3e   :  { %v1584_v29 = vadd.f32 %v1583_v25, %v1072_v20  ;;  %v1088_v20 = vmul.f32 %v2134_v11, %v2134_v11  ;;  %v2150_v11 = vadd.f32 -1.0, %v80_v6  ;;  %v96_v6 = vld [vmem:[#allocation3 + $0x220] sm:$0xff] }
  0x40   :  { %v1585_v33 = vadd.f32 %v1584_v29, %v1073_v24  ;;  %v1089_v24 = vmul.f32 %v2135_v15, %v2135_v15  ;;  %v2151_v15 = vadd.f32 -1.0, %v81_v10  ;;  %v97_v10 = vld [vmem:[#allocation3 + $0x228] sm:$0xff] }
  0x42   :  { %v1586_v37 = vadd.f32 %v1585_v33, %v1074_v28  ;;  %v1090_v28 = vmul.f32 %v2136_v19, %v2136_v19  ;;  %v2152_v19 = vadd.f32 -1.0, %v82_v14  ;;  %v98_v14 = vld [vmem:[#allocation3 + $0x230] sm:$0xff] }
  0x44   :  { %v1587_v41 = vadd.f32 %v1586_v37, %v1075_v32  ;;  %v1091_v32 = vmul.f32 %v2137_v23, %v2137_v23  ;;  %v2153_v23 = vadd.f32 -1.0, %v83_v18  ;;  %v99_v18 = vld [vmem:[#allocation3 + $0x238] sm:$0xff] }
  0x46   :  { %v1588_v45 = vadd.f32 %v1587_v41, %v1076_v36  ;;  %v1092_v36 = vmul.f32 %v2138_v27, %v2138_v27  ;;  %v2154_v27 = vadd.f32 -1.0, %v84_v22  ;;  %v100_v22 = vld [vmem:[#allocation3 + $0x240] sm:$0xff] }
  0x48   :  { %v1589_v49 = vadd.f32 %v1588_v45, %v1077_v40  ;;  %v1093_v40 = vmul.f32 %v2139_v31, %v2139_v31  ;;  %v2155_v31 = vadd.f32 -1.0, %v85_v26  ;;  %v101_v26 = vld [vmem:[#allocation3 + $0x248] sm:$0xff] }
  0x4a   :  { %v1590_v53 = vadd.f32 %v1589_v49, %v1078_v44  ;;  %v1094_v44 = vmul.f32 %v2140_v35, %v2140_v35  ;;  %v2156_v35 = vadd.f32 -1.0, %v86_v30  ;;  %v102_v30 = vld [vmem:[#allocation3 + $0x250] sm:$0xff] }
  0x4c   :  { %v1591_v57 = vadd.f32 %v1590_v53, %v1079_v48  ;;  %v1095_v48 = vmul.f32 %v2141_v39, %v2141_v39  ;;  %v2157_v39 = vadd.f32 -1.0, %v87_v34  ;;  %v103_v34 = vld [vmem:[#allocation3 + $0x258] sm:$0xff] }
  0x4e   :  { %v1592_v61 = vadd.f32 %v1591_v57, %v1080_v52  ;;  %v1096_v52 = vmul.f32 %v2142_v43, %v2142_v43  ;;  %v2158_v43 = vadd.f32 -1.0, %v88_v38  ;;  %v104_v38 = vld [vmem:[#allocation3 + $0x260] sm:$0xff] }
  0x50   :  { %v1593_v1 = vadd.f32 %v1592_v61, %v1081_v56  ;;  %v1097_v56 = vmul.f32 %v2143_v47, %v2143_v47  ;;  %v2159_v47 = vadd.f32 -1.0, %v89_v42  ;;  %v105_v42 = vld [vmem:[#allocation3 + $0x268] sm:$0xff] }
  0x52   :  { %v1594_v5 = vadd.f32 %v1593_v1, %v1082_v60  ;;  %v1098_v60 = vmul.f32 %v2144_v51, %v2144_v51  ;;  %v2160_v51 = vadd.f32 -1.0, %v90_v46  ;;  %v106_v46 = vld [vmem:[#allocation3 + $0x270] sm:$0xff] }
  0x54   :  { %v1595_v9 = vadd.f32 %v1594_v5, %v1083_v0  ;;  %v1099_v0 = vmul.f32 %v2145_v55, %v2145_v55  ;;  %v2161_v55 = vadd.f32 -1.0, %v91_v50  ;;  %v107_v50 = vld [vmem:[#allocation3 + $0x278] sm:$0xff] }
  0x56   :  { %v1596_v13 = vadd.f32 %v1595_v9, %v1084_v4  ;;  %v1100_v4 = vmul.f32 %v2146_v59, %v2146_v59  ;;  %v2162_v59 = vadd.f32 -1.0, %v92_v54  ;;  %v108_v54 = vld [vmem:[#allocation3 + $0x280] sm:$0xff] }
  0x58   :  { %v1597_v17 = vadd.f32 %v1596_v13, %v1085_v8  ;;  %v1101_v8 = vmul.f32 %v2147_v63, %v2147_v63  ;;  %v2163_v63 = vadd.f32 -1.0, %v93_v58  ;;  %v109_v58 = vld [vmem:[#allocation3 + $0x288] sm:$0xff] }
  0x5a   :  { %v1598_v21 = vadd.f32 %v1597_v17, %v1086_v12  ;;  %v1102_v12 = vmul.f32 %v2148_v3, %v2148_v3  ;;  %v2164_v3 = vadd.f32 -1.0, %v94_v62  ;;  %v110_v62 = vld [vmem:[#allocation3 + $0x290] sm:$0xff] }
  0x5c   :  { %v1599_v25 = vadd.f32 %v1598_v21, %v1087_v16  ;;  %v1103_v16 = vmul.f32 %v2149_v7, %v2149_v7  ;;  %v2165_v7 = vadd.f32 -1.0, %v95_v2  ;;  %v111_v2 = vld [vmem:[#allocation3 + $0x298] sm:$0xff] }
  0x5e   :  { %v1600_v29 = vadd.f32 %v1599_v25, %v1088_v20  ;;  %v1104_v20 = vmul.f32 %v2150_v11, %v2150_v11  ;;  %v2166_v11 = vadd.f32 -1.0, %v96_v6  ;;  %v112_v6 = vld [vmem:[#allocation3 + $0x2a0] sm:$0xff] }
  0x60   :  { %v1601_v33 = vadd.f32 %v1600_v29, %v1089_v24  ;;  %v1105_v24 = vmul.f32 %v2151_v15, %v2151_v15  ;;  %v2167_v15 = vadd.f32 -1.0, %v97_v10  ;;  %v113_v10 = vld [vmem:[#allocation3 + $0x2a8] sm:$0xff] }
  0x62   :  { %v1602_v37 = vadd.f32 %v1601_v33, %v1090_v28  ;;  %v1106_v28 = vmul.f32 %v2152_v19, %v2152_v19  ;;  %v2168_v19 = vadd.f32 -1.0, %v98_v14  ;;  %v114_v14 = vld [vmem:[#allocation3 + $0x2b0] sm:$0xff] }
  0x64   :  { %v1603_v41 = vadd.f32 %v1602_v37, %v1091_v32  ;;  %v1107_v32 = vmul.f32 %v2153_v23, %v2153_v23  ;;  %v2169_v23 = vadd.f32 -1.0, %v99_v18  ;;  %v115_v18 = vld [vmem:[#allocation3 + $0x2b8] sm:$0xff] }
  0x66   :  { %v1604_v45 = vadd.f32 %v1603_v41, %v1092_v36  ;;  %v1108_v36 = vmul.f32 %v2154_v27, %v2154_v27  ;;  %v2170_v27 = vadd.f32 -1.0, %v100_v22  ;;  %v116_v22 = vld [vmem:[#allocation3 + $0x2c0] sm:$0xff] }
  0x68   :  { %v1605_v49 = vadd.f32 %v1604_v45, %v1093_v40  ;;  %v1109_v40 = vmul.f32 %v2155_v31, %v2155_v31  ;;  %v2171_v31 = vadd.f32 -1.0, %v101_v26  ;;  %v117_v26 = vld [vmem:[#allocation3 + $0x2c8] sm:$0xff] }
  0x6a   :  { %v1606_v53 = vadd.f32 %v1605_v49, %v1094_v44  ;;  %v1110_v44 = vmul.f32 %v2156_v35, %v2156_v35  ;;  %v2172_v35 = vadd.f32 -1.0, %v102_v30  ;;  %v118_v30 = vld [vmem:[#allocation3 + $0x2d0] sm:$0xff] }
  0x6c   :  { %v1607_v57 = vadd.f32 %v1606_v53, %v1095_v48  ;;  %v1111_v48 = vmul.f32 %v2157_v39, %v2157_v39  ;;  %v2173_v39 = vadd.f32 -1.0, %v103_v34  ;;  %v119_v34 = vld [vmem:[#allocation3 + $0x2d8] sm:$0xff] }
  0x6e   :  { %v1608_v61 = vadd.f32 %v1607_v57, %v1096_v52  ;;  %v1112_v52 = vmul.f32 %v2158_v43, %v2158_v43  ;;  %v2174_v43 = vadd.f32 -1.0, %v104_v38  ;;  %v120_v38 = vld [vmem:[#allocation3 + $0x2e0] sm:$0xff] }
  0x70   :  { %v1609_v1 = vadd.f32 %v1608_v61, %v1097_v56  ;;  %v1113_v56 = vmul.f32 %v2159_v47, %v2159_v47  ;;  %v2175_v47 = vadd.f32 -1.0, %v105_v42  ;;  %v121_v42 = vld [vmem:[#allocation3 + $0x2e8] sm:$0xff] }
  0x72   :  { %v1610_v5 = vadd.f32 %v1609_v1, %v1098_v60  ;;  %v1114_v60 = vmul.f32 %v2160_v51, %v2160_v51  ;;  %v2176_v51 = vadd.f32 -1.0, %v106_v46  ;;  %v122_v46 = vld [vmem:[#allocation3 + $0x2f0] sm:$0xff] }
  0x74   :  { %v1611_v9 = vadd.f32 %v1610_v5, %v1099_v0  ;;  %v1115_v0 = vmul.f32 %v2161_v55, %v2161_v55  ;;  %v2177_v55 = vadd.f32 -1.0, %v107_v50  ;;  %v123_v50 = vld [vmem:[#allocation3 + $0x2f8] sm:$0xff] }
  0x76   :  { %v1612_v13 = vadd.f32 %v1611_v9, %v1100_v4  ;;  %v1116_v4 = vmul.f32 %v2162_v59, %v2162_v59  ;;  %v2178_v59 = vadd.f32 -1.0, %v108_v54  ;;  %v124_v54 = vld [vmem:[#allocation3 + $0x300] sm:$0xff] }
  0x78   :  { %v1613_v17 = vadd.f32 %v1612_v13, %v1101_v8  ;;  %v1117_v8 = vmul.f32 %v2163_v63, %v2163_v63  ;;  %v2179_v63 = vadd.f32 -1.0, %v109_v58  ;;  %v125_v58 = vld [vmem:[#allocation3 + $0x308] sm:$0xff] }
  0x7a   :  { %v1614_v21 = vadd.f32 %v1613_v17, %v1102_v12  ;;  %v1118_v12 = vmul.f32 %v2164_v3, %v2164_v3  ;;  %v2180_v3 = vadd.f32 -1.0, %v110_v62  ;;  %v126_v62 = vld [vmem:[#allocation3 + $0x310] sm:$0xff] }
  0x7c   :  { %v1615_v25 = vadd.f32 %v1614_v21, %v1103_v16  ;;  %v1119_v16 = vmul.f32 %v2165_v7, %v2165_v7  ;;  %v2181_v7 = vadd.f32 -1.0, %v111_v2  ;;  %v127_v2 = vld [vmem:[#allocation3 + $0x318] sm:$0xff] }
  0x7e   :  { %v1616_v29 = vadd.f32 %v1615_v25, %v1104_v20  ;;  %v1120_v20 = vmul.f32 %v2166_v11, %v2166_v11  ;;  %v2182_v11 = vadd.f32 -1.0, %v112_v6  ;;  %v128_v6 = vld [vmem:[#allocation3 + $0x320] sm:$0xff] }
  0x80   :  { %v1617_v33 = vadd.f32 %v1616_v29, %v1105_v24  ;;  %v1121_v24 = vmul.f32 %v2167_v15, %v2167_v15  ;;  %v2183_v15 = vadd.f32 -1.0, %v113_v10  ;;  %v129_v10 = vld [vmem:[#allocation3 + $0x328] sm:$0xff] }
  0x82   :  { %v1618_v37 = vadd.f32 %v1617_v33, %v1106_v28  ;;  %v1122_v28 = vmul.f32 %v2168_v19, %v2168_v19  ;;  %v2184_v19 = vadd.f32 -1.0, %v114_v14  ;;  %v130_v14 = vld [vmem:[#allocation3 + $0x330] sm:$0xff] }
  0x84   :  { %v1619_v41 = vadd.f32 %v1618_v37, %v1107_v32  ;;  %v1123_v32 = vmul.f32 %v2169_v23, %v2169_v23  ;;  %v2185_v23 = vadd.f32 -1.0, %v115_v18  ;;  %v131_v18 = vld [vmem:[#allocation3 + $0x338] sm:$0xff] }
  0x86   :  { %v1620_v45 = vadd.f32 %v1619_v41, %v1108_v36  ;;  %v1124_v36 = vmul.f32 %v2170_v27, %v2170_v27  ;;  %v2186_v27 = vadd.f32 -1.0, %v116_v22  ;;  %v132_v22 = vld [vmem:[#allocation3 + $0x340] sm:$0xff] }
  0x88   :  { %v1621_v49 = vadd.f32 %v1620_v45, %v1109_v40  ;;  %v1125_v40 = vmul.f32 %v2171_v31, %v2171_v31  ;;  %v2187_v31 = vadd.f32 -1.0, %v117_v26  ;;  %v133_v26 = vld [vmem:[#allocation3 + $0x348] sm:$0xff] }
  0x8a   :  { %v1622_v53 = vadd.f32 %v1621_v49, %v1110_v44  ;;  %v1126_v44 = vmul.f32 %v2172_v35, %v2172_v35  ;;  %v2188_v35 = vadd.f32 -1.0, %v118_v30  ;;  %v134_v30 = vld [vmem:[#allocation3 + $0x350] sm:$0xff] }
  0x8c   :  { %v1623_v57 = vadd.f32 %v1622_v53, %v1111_v48  ;;  %v1127_v48 = vmul.f32 %v2173_v39, %v2173_v39  ;;  %v2189_v39 = vadd.f32 -1.0, %v119_v34  ;;  %v135_v34 = vld [vmem:[#allocation3 + $0x358] sm:$0xff] }
  0x8e   :  { %v1624_v61 = vadd.f32 %v1623_v57, %v1112_v52  ;;  %v1128_v52 = vmul.f32 %v2174_v43, %v2174_v43  ;;  %v2190_v43 = vadd.f32 -1.0, %v120_v38  ;;  %v136_v38 = vld [vmem:[#allocation3 + $0x360] sm:$0xff] }
  0x90   :  { %v1625_v1 = vadd.f32 %v1624_v61, %v1113_v56  ;;  %v1129_v56 = vmul.f32 %v2175_v47, %v2175_v47  ;;  %v2191_v47 = vadd.f32 -1.0, %v121_v42  ;;  %v137_v42 = vld [vmem:[#allocation3 + $0x368] sm:$0xff] }
  0x92   :  { %v1626_v5 = vadd.f32 %v1625_v1, %v1114_v60  ;;  %v1130_v60 = vmul.f32 %v2176_v51, %v2176_v51  ;;  %v2192_v51 = vadd.f32 -1.0, %v122_v46  ;;  %v138_v46 = vld [vmem:[#allocation3 + $0x370] sm:$0xff] }
  0x94   :  { %v1627_v9 = vadd.f32 %v1626_v5, %v1115_v0  ;;  %v1131_v0 = vmul.f32 %v2177_v55, %v2177_v55  ;;  %v2193_v55 = vadd.f32 -1.0, %v123_v50  ;;  %v139_v50 = vld [vmem:[#allocation3 + $0x378] sm:$0xff] }
  0x96   :  { %v1628_v13 = vadd.f32 %v1627_v9, %v1116_v4  ;;  %v1132_v4 = vmul.f32 %v2178_v59, %v2178_v59  ;;  %v2194_v59 = vadd.f32 -1.0, %v124_v54  ;;  %v140_v54 = vld [vmem:[#allocation3 + $0x380] sm:$0xff] }
  0x98   :  { %v1629_v17 = vadd.f32 %v1628_v13, %v1117_v8  ;;  %v1133_v8 = vmul.f32 %v2179_v63, %v2179_v63  ;;  %v2195_v63 = vadd.f32 -1.0, %v125_v58  ;;  %v141_v58 = vld [vmem:[#allocation3 + $0x388] sm:$0xff] }
  0x9a   :  { %v1630_v21 = vadd.f32 %v1629_v17, %v1118_v12  ;;  %v1134_v12 = vmul.f32 %v2180_v3, %v2180_v3  ;;  %v2196_v3 = vadd.f32 -1.0, %v126_v62  ;;  %v142_v62 = vld [vmem:[#allocation3 + $0x390] sm:$0xff] }
  0x9c   :  { %v1631_v25 = vadd.f32 %v1630_v21, %v1119_v16  ;;  %v1135_v16 = vmul.f32 %v2181_v7, %v2181_v7  ;;  %v2197_v7 = vadd.f32 -1.0, %v127_v2  ;;  %v143_v2 = vld [vmem:[#allocation3 + $0x398] sm:$0xff] }
  0x9e   :  { %v1632_v29 = vadd.f32 %v1631_v25, %v1120_v20  ;;  %v1136_v20 = vmul.f32 %v2182_v11, %v2182_v11  ;;  %v2198_v11 = vadd.f32 -1.0, %v128_v6  ;;  %v144_v6 = vld [vmem:[#allocation3 + $0x3a0] sm:$0xff] }
  0xa0   :  { %v1633_v33 = vadd.f32 %v1632_v29, %v1121_v24  ;;  %v1137_v24 = vmul.f32 %v2183_v15, %v2183_v15  ;;  %v2199_v15 = vadd.f32 -1.0, %v129_v10  ;;  %v145_v10 = vld [vmem:[#allocation3 + $0x3a8] sm:$0xff] }
  0xa2   :  { %v1634_v37 = vadd.f32 %v1633_v33, %v1122_v28  ;;  %v1138_v28 = vmul.f32 %v2184_v19, %v2184_v19  ;;  %v2200_v19 = vadd.f32 -1.0, %v130_v14  ;;  %v146_v14 = vld [vmem:[#allocation3 + $0x3b0] sm:$0xff] }
  0xa4   :  { %v1635_v41 = vadd.f32 %v1634_v37, %v1123_v32  ;;  %v1139_v32 = vmul.f32 %v2185_v23, %v2185_v23  ;;  %v2201_v23 = vadd.f32 -1.0, %v131_v18  ;;  %v147_v18 = vld [vmem:[#allocation3 + $0x3b8] sm:$0xff] }
  0xa6   :  { %v1636_v45 = vadd.f32 %v1635_v41, %v1124_v36  ;;  %v1140_v36 = vmul.f32 %v2186_v27, %v2186_v27  ;;  %v2202_v27 = vadd.f32 -1.0, %v132_v22  ;;  %v148_v22 = vld [vmem:[#allocation3 + $0x3c0] sm:$0xff] }
  0xa8   :  { %v1637_v49 = vadd.f32 %v1636_v45, %v1125_v40  ;;  %v1141_v40 = vmul.f32 %v2187_v31, %v2187_v31  ;;  %v2203_v31 = vadd.f32 -1.0, %v133_v26  ;;  %v149_v26 = vld [vmem:[#allocation3 + $0x3c8] sm:$0xff] }
  0xaa   :  { %v1638_v53 = vadd.f32 %v1637_v49, %v1126_v44  ;;  %v1142_v44 = vmul.f32 %v2188_v35, %v2188_v35  ;;  %v2204_v35 = vadd.f32 -1.0, %v134_v30  ;;  %v150_v30 = vld [vmem:[#allocation3 + $0x3d0] sm:$0xff] }
  0xac   :  { %v1639_v57 = vadd.f32 %v1638_v53, %v1127_v48  ;;  %v1143_v48 = vmul.f32 %v2189_v39, %v2189_v39  ;;  %v2205_v39 = vadd.f32 -1.0, %v135_v34  ;;  %v151_v34 = vld [vmem:[#allocation3 + $0x3d8] sm:$0xff] }
  0xae   :  { %v1640_v61 = vadd.f32 %v1639_v57, %v1128_v52  ;;  %v1144_v52 = vmul.f32 %v2190_v43, %v2190_v43  ;;  %v2206_v43 = vadd.f32 -1.0, %v136_v38  ;;  %v152_v38 = vld [vmem:[#allocation3 + $0x3e0] sm:$0xff] }
  0xb0   :  { %v1641_v1 = vadd.f32 %v1640_v61, %v1129_v56  ;;  %v1145_v56 = vmul.f32 %v2191_v47, %v2191_v47  ;;  %v2207_v47 = vadd.f32 -1.0, %v137_v42  ;;  %v153_v42 = vld [vmem:[#allocation3 + $0x3e8] sm:$0xff] }
  0xb2   :  { %v1642_v5 = vadd.f32 %v1641_v1, %v1130_v60  ;;  %v1146_v60 = vmul.f32 %v2192_v51, %v2192_v51  ;;  %v2208_v51 = vadd.f32 -1.0, %v138_v46  ;;  %v154_v46 = vld [vmem:[#allocation3 + $0x3f0] sm:$0xff] }
  0xb4   :  { %v1643_v9 = vadd.f32 %v1642_v5, %v1131_v0  ;;  %v1147_v0 = vmul.f32 %v2193_v55, %v2193_v55  ;;  %v2209_v55 = vadd.f32 -1.0, %v139_v50  ;;  %v155_v50 = vld [vmem:[#allocation3 + $0x3f8] sm:$0xff] }
  0xb6   :  { %v1644_v13 = vadd.f32 %v1643_v9, %v1132_v4  ;;  %v1148_v4 = vmul.f32 %v2194_v59, %v2194_v59  ;;  %v2210_v59 = vadd.f32 -1.0, %v140_v54  ;;  %v156_v54 = vld [vmem:[#allocation3 + $0x400] sm:$0xff] }
  0xb8   :  { %v1645_v17 = vadd.f32 %v1644_v13, %v1133_v8  ;;  %v1149_v8 = vmul.f32 %v2195_v63, %v2195_v63  ;;  %v2211_v63 = vadd.f32 -1.0, %v141_v58  ;;  %v157_v58 = vld [vmem:[#allocation3 + $0x408] sm:$0xff] }
  0xba   :  { %v1646_v21 = vadd.f32 %v1645_v17, %v1134_v12  ;;  %v1150_v12 = vmul.f32 %v2196_v3, %v2196_v3  ;;  %v2212_v3 = vadd.f32 -1.0, %v142_v62  ;;  %v158_v62 = vld [vmem:[#allocation3 + $0x410] sm:$0xff] }
  0xbc   :  { %v1647_v25 = vadd.f32 %v1646_v21, %v1135_v16  ;;  %v1151_v16 = vmul.f32 %v2197_v7, %v2197_v7  ;;  %v2213_v7 = vadd.f32 -1.0, %v143_v2  ;;  %v159_v2 = vld [vmem:[#allocation3 + $0x418] sm:$0xff] }
  0xbe   :  { %v1648_v29 = vadd.f32 %v1647_v25, %v1136_v20  ;;  %v1152_v20 = vmul.f32 %v2198_v11, %v2198_v11  ;;  %v2214_v11 = vadd.f32 -1.0, %v144_v6  ;;  %v160_v6 = vld [vmem:[#allocation3 + $0x420] sm:$0xff] }
  0xc0   :  { %v1649_v33 = vadd.f32 %v1648_v29, %v1137_v24  ;;  %v1153_v24 = vmul.f32 %v2199_v15, %v2199_v15  ;;  %v2215_v15 = vadd.f32 -1.0, %v145_v10  ;;  %v161_v10 = vld [vmem:[#allocation3 + $0x428] sm:$0xff] }
  0xc2   :  { %v1650_v37 = vadd.f32 %v1649_v33, %v1138_v28  ;;  %v1154_v28 = vmul.f32 %v2200_v19, %v2200_v19  ;;  %v2216_v19 = vadd.f32 -1.0, %v146_v14  ;;  %v162_v14 = vld [vmem:[#allocation3 + $0x430] sm:$0xff] }
  0xc4   :  { %v1651_v41 = vadd.f32 %v1650_v37, %v1139_v32  ;;  %v1155_v32 = vmul.f32 %v2201_v23, %v2201_v23  ;;  %v2217_v23 = vadd.f32 -1.0, %v147_v18  ;;  %v163_v18 = vld [vmem:[#allocation3 + $0x438] sm:$0xff] }
  0xc6   :  { %v1652_v45 = vadd.f32 %v1651_v41, %v1140_v36  ;;  %v1156_v36 = vmul.f32 %v2202_v27, %v2202_v27  ;;  %v2218_v27 = vadd.f32 -1.0, %v148_v22  ;;  %v164_v22 = vld [vmem:[#allocation3 + $0x440] sm:$0xff] }
  0xc8   :  { %v1653_v49 = vadd.f32 %v1652_v45, %v1141_v40  ;;  %v1157_v40 = vmul.f32 %v2203_v31, %v2203_v31  ;;  %v2219_v31 = vadd.f32 -1.0, %v149_v26  ;;  %v165_v26 = vld [vmem:[#allocation3 + $0x448] sm:$0xff] }
  0xca   :  { %v1654_v53 = vadd.f32 %v1653_v49, %v1142_v44  ;;  %v1158_v44 = vmul.f32 %v2204_v35, %v2204_v35  ;;  %v2220_v35 = vadd.f32 -1.0, %v150_v30  ;;  %v166_v30 = vld [vmem:[#allocation3 + $0x450] sm:$0xff] }
  0xcc   :  { %v1655_v57 = vadd.f32 %v1654_v53, %v1143_v48  ;;  %v1159_v48 = vmul.f32 %v2205_v39, %v2205_v39  ;;  %v2221_v39 = vadd.f32 -1.0, %v151_v34  ;;  %v167_v34 = vld [vmem:[#allocation3 + $0x458] sm:$0xff] }
  0xce   :  { %v1656_v61 = vadd.f32 %v1655_v57, %v1144_v52  ;;  %v1160_v52 = vmul.f32 %v2206_v43, %v2206_v43  ;;  %v2222_v43 = vadd.f32 -1.0, %v152_v38  ;;  %v168_v38 = vld [vmem:[#allocation3 + $0x460] sm:$0xff] }
  0xd0   :  { %v1657_v1 = vadd.f32 %v1656_v61, %v1145_v56  ;;  %v1161_v56 = vmul.f32 %v2207_v47, %v2207_v47  ;;  %v2223_v47 = vadd.f32 -1.0, %v153_v42  ;;  %v169_v42 = vld [vmem:[#allocation3 + $0x468] sm:$0xff] }
  0xd2   :  { %v1658_v5 = vadd.f32 %v1657_v1, %v1146_v60  ;;  %v1162_v60 = vmul.f32 %v2208_v51, %v2208_v51  ;;  %v2224_v51 = vadd.f32 -1.0, %v154_v46  ;;  %v170_v46 = vld [vmem:[#allocation3 + $0x470] sm:$0xff] }
  0xd4   :  { %v1659_v9 = vadd.f32 %v1658_v5, %v1147_v0  ;;  %v1163_v0 = vmul.f32 %v2209_v55, %v2209_v55  ;;  %v2225_v55 = vadd.f32 -1.0, %v155_v50  ;;  %v171_v50 = vld [vmem:[#allocation3 + $0x478] sm:$0xff] }
  0xd6   :  { %v1660_v13 = vadd.f32 %v1659_v9, %v1148_v4  ;;  %v1164_v4 = vmul.f32 %v2210_v59, %v2210_v59  ;;  %v2226_v59 = vadd.f32 -1.0, %v156_v54  ;;  %v172_v54 = vld [vmem:[#allocation3 + $0x480] sm:$0xff] }
  0xd8   :  { %v1661_v17 = vadd.f32 %v1660_v13, %v1149_v8  ;;  %v1165_v8 = vmul.f32 %v2211_v63, %v2211_v63  ;;  %v2227_v63 = vadd.f32 -1.0, %v157_v58  ;;  %v173_v58 = vld [vmem:[#allocation3 + $0x488] sm:$0xff] }
  0xda   :  { %v1662_v21 = vadd.f32 %v1661_v17, %v1150_v12  ;;  %v1166_v12 = vmul.f32 %v2212_v3, %v2212_v3  ;;  %v2228_v3 = vadd.f32 -1.0, %v158_v62  ;;  %v174_v62 = vld [vmem:[#allocation3 + $0x490] sm:$0xff] }
  0xdc   :  { %v1663_v25 = vadd.f32 %v1662_v21, %v1151_v16  ;;  %v1167_v16 = vmul.f32 %v2213_v7, %v2213_v7  ;;  %v2229_v7 = vadd.f32 -1.0, %v159_v2  ;;  %v175_v2 = vld [vmem:[#allocation3 + $0x498] sm:$0xff] }
  0xde   :  { %v1664_v29 = vadd.f32 %v1663_v25, %v1152_v20  ;;  %v1168_v20 = vmul.f32 %v2214_v11, %v2214_v11  ;;  %v2230_v11 = vadd.f32 -1.0, %v160_v6  ;;  %v176_v6 = vld [vmem:[#allocation3 + $0x4a0] sm:$0xff] }
  0xe0   :  { %v1665_v33 = vadd.f32 %v1664_v29, %v1153_v24  ;;  %v1169_v24 = vmul.f32 %v2215_v15, %v2215_v15  ;;  %v2231_v15 = vadd.f32 -1.0, %v161_v10  ;;  %v177_v10 = vld [vmem:[#allocation3 + $0x4a8] sm:$0xff] }
  0xe2   :  { %v1666_v37 = vadd.f32 %v1665_v33, %v1154_v28  ;;  %v1170_v28 = vmul.f32 %v2216_v19, %v2216_v19  ;;  %v2232_v19 = vadd.f32 -1.0, %v162_v14  ;;  %v178_v14 = vld [vmem:[#allocation3 + $0x4b0] sm:$0xff] }
  0xe4   :  { %v1667_v41 = vadd.f32 %v1666_v37, %v1155_v32  ;;  %v1171_v32 = vmul.f32 %v2217_v23, %v2217_v23  ;;  %v2233_v23 = vadd.f32 -1.0, %v163_v18  ;;  %v179_v18 = vld [vmem:[#allocation3 + $0x4b8] sm:$0xff] }
  0xe6   :  { %v1668_v45 = vadd.f32 %v1667_v41, %v1156_v36  ;;  %v1172_v36 = vmul.f32 %v2218_v27, %v2218_v27  ;;  %v2234_v27 = vadd.f32 -1.0, %v164_v22  ;;  %v180_v22 = vld [vmem:[#allocation3 + $0x4c0] sm:$0xff] }
  0xe8   :  { %v1669_v49 = vadd.f32 %v1668_v45, %v1157_v40  ;;  %v1173_v40 = vmul.f32 %v2219_v31, %v2219_v31  ;;  %v2235_v31 = vadd.f32 -1.0, %v165_v26  ;;  %v181_v26 = vld [vmem:[#allocation3 + $0x4c8] sm:$0xff] }
  0xea   :  { %v1670_v53 = vadd.f32 %v1669_v49, %v1158_v44  ;;  %v1174_v44 = vmul.f32 %v2220_v35, %v2220_v35  ;;  %v2236_v35 = vadd.f32 -1.0, %v166_v30  ;;  %v182_v30 = vld [vmem:[#allocation3 + $0x4d0] sm:$0xff] }
  0xec   :  { %v1671_v57 = vadd.f32 %v1670_v53, %v1159_v48  ;;  %v1175_v48 = vmul.f32 %v2221_v39, %v2221_v39  ;;  %v2237_v39 = vadd.f32 -1.0, %v167_v34  ;;  %v183_v34 = vld [vmem:[#allocation3 + $0x4d8] sm:$0xff] }
  0xee   :  { %v1672_v61 = vadd.f32 %v1671_v57, %v1160_v52  ;;  %v1176_v52 = vmul.f32 %v2222_v43, %v2222_v43  ;;  %v2238_v43 = vadd.f32 -1.0, %v168_v38  ;;  %v184_v38 = vld [vmem:[#allocation3 + $0x4e0] sm:$0xff] }
  0xf0   :  { %v1673_v1 = vadd.f32 %v1672_v61, %v1161_v56  ;;  %v1177_v56 = vmul.f32 %v2223_v47, %v2223_v47  ;;  %v2239_v47 = vadd.f32 -1.0, %v169_v42  ;;  %v185_v42 = vld [vmem:[#allocation3 + $0x4e8] sm:$0xff] }
  0xf2   :  { %v1674_v5 = vadd.f32 %v1673_v1, %v1162_v60  ;;  %v1178_v60 = vmul.f32 %v2224_v51, %v2224_v51  ;;  %v2240_v51 = vadd.f32 -1.0, %v170_v46  ;;  %v186_v46 = vld [vmem:[#allocation3 + $0x4f0] sm:$0xff] }
  0xf4   :  { %v1675_v9 = vadd.f32 %v1674_v5, %v1163_v0  ;;  %v1179_v0 = vmul.f32 %v2225_v55, %v2225_v55  ;;  %v2241_v55 = vadd.f32 -1.0, %v171_v50  ;;  %v187_v50 = vld [vmem:[#allocation3 + $0x4f8] sm:$0xff] }
  0xf6   :  { %v1676_v13 = vadd.f32 %v1675_v9, %v1164_v4  ;;  %v1180_v4 = vmul.f32 %v2226_v59, %v2226_v59  ;;  %v2242_v59 = vadd.f32 -1.0, %v172_v54  ;;  %v188_v54 = vld [vmem:[#allocation3 + $0x500] sm:$0xff] }
  0xf8   :  { %v1677_v17 = vadd.f32 %v1676_v13, %v1165_v8  ;;  %v1181_v8 = vmul.f32 %v2227_v63, %v2227_v63  ;;  %v2243_v63 = vadd.f32 -1.0, %v173_v58  ;;  %v189_v58 = vld [vmem:[#allocation3 + $0x508] sm:$0xff] }
  0xfa   :  { %v1678_v21 = vadd.f32 %v1677_v17, %v1166_v12  ;;  %v1182_v12 = vmul.f32 %v2228_v3, %v2228_v3  ;;  %v2244_v3 = vadd.f32 -1.0, %v174_v62  ;;  %v190_v62 = vld [vmem:[#allocation3 + $0x510] sm:$0xff] }
  0xfc   :  { %v1679_v25 = vadd.f32 %v1678_v21, %v1167_v16  ;;  %v1183_v16 = vmul.f32 %v2229_v7, %v2229_v7  ;;  %v2245_v7 = vadd.f32 -1.0, %v175_v2  ;;  %v191_v2 = vld [vmem:[#allocation3 + $0x518] sm:$0xff] }
  0xfe   :  { %v1680_v29 = vadd.f32 %v1679_v25, %v1168_v20  ;;  %v1184_v20 = vmul.f32 %v2230_v11, %v2230_v11  ;;  %v2246_v11 = vadd.f32 -1.0, %v176_v6  ;;  %v192_v6 = vld [vmem:[#allocation3 + $0x520] sm:$0xff] }
 0x100   :  { %v1681_v33 = vadd.f32 %v1680_v29, %v1169_v24  ;;  %v1185_v24 = vmul.f32 %v2231_v15, %v2231_v15  ;;  %v2247_v15 = vadd.f32 -1.0, %v177_v10  ;;  %v193_v10 = vld [vmem:[#allocation3 + $0x528] sm:$0xff] }
 0x102   :  { %v1682_v37 = vadd.f32 %v1681_v33, %v1170_v28  ;;  %v1186_v28 = vmul.f32 %v2232_v19, %v2232_v19  ;;  %v2248_v19 = vadd.f32 -1.0, %v178_v14  ;;  %v194_v14 = vld [vmem:[#allocation3 + $0x530] sm:$0xff] }
 0x104   :  { %v1683_v41 = vadd.f32 %v1682_v37, %v1171_v32  ;;  %v1187_v32 = vmul.f32 %v2233_v23, %v2233_v23  ;;  %v2249_v23 = vadd.f32 -1.0, %v179_v18  ;;  %v195_v18 = vld [vmem:[#allocation3 + $0x538] sm:$0xff] }
 0x106   :  { %v1684_v45 = vadd.f32 %v1683_v41, %v1172_v36  ;;  %v1188_v36 = vmul.f32 %v2234_v27, %v2234_v27  ;;  %v2250_v27 = vadd.f32 -1.0, %v180_v22  ;;  %v196_v22 = vld [vmem:[#allocation3 + $0x540] sm:$0xff] }
 0x108   :  { %v1685_v49 = vadd.f32 %v1684_v45, %v1173_v40  ;;  %v1189_v40 = vmul.f32 %v2235_v31, %v2235_v31  ;;  %v2251_v31 = vadd.f32 -1.0, %v181_v26  ;;  %v197_v26 = vld [vmem:[#allocation3 + $0x548] sm:$0xff] }
 0x10a   :  { %v1686_v53 = vadd.f32 %v1685_v49, %v1174_v44  ;;  %v1190_v44 = vmul.f32 %v2236_v35, %v2236_v35  ;;  %v2252_v35 = vadd.f32 -1.0, %v182_v30  ;;  %v198_v30 = vld [vmem:[#allocation3 + $0x550] sm:$0xff] }
 0x10c   :  { %v1687_v57 = vadd.f32 %v1686_v53, %v1175_v48  ;;  %v1191_v48 = vmul.f32 %v2237_v39, %v2237_v39  ;;  %v2253_v39 = vadd.f32 -1.0, %v183_v34  ;;  %v199_v34 = vld [vmem:[#allocation3 + $0x558] sm:$0xff] }
 0x10e   :  { %v1688_v61 = vadd.f32 %v1687_v57, %v1176_v52  ;;  %v1192_v52 = vmul.f32 %v2238_v43, %v2238_v43  ;;  %v2254_v43 = vadd.f32 -1.0, %v184_v38  ;;  %v200_v38 = vld [vmem:[#allocation3 + $0x560] sm:$0xff] }
 0x110   :  { %v1689_v1 = vadd.f32 %v1688_v61, %v1177_v56  ;;  %v1193_v56 = vmul.f32 %v2239_v47, %v2239_v47  ;;  %v2255_v47 = vadd.f32 -1.0, %v185_v42  ;;  %v201_v42 = vld [vmem:[#allocation3 + $0x568] sm:$0xff] }
 0x112   :  { %v1690_v5 = vadd.f32 %v1689_v1, %v1178_v60  ;;  %v1194_v60 = vmul.f32 %v2240_v51, %v2240_v51  ;;  %v2256_v51 = vadd.f32 -1.0, %v186_v46  ;;  %v202_v46 = vld [vmem:[#allocation3 + $0x570] sm:$0xff] }
 0x114   :  { %v1691_v9 = vadd.f32 %v1690_v5, %v1179_v0  ;;  %v1195_v0 = vmul.f32 %v2241_v55, %v2241_v55  ;;  %v2257_v55 = vadd.f32 -1.0, %v187_v50  ;;  %v203_v50 = vld [vmem:[#allocation3 + $0x578] sm:$0xff] }
 0x116   :  { %v1692_v13 = vadd.f32 %v1691_v9, %v1180_v4  ;;  %v1196_v4 = vmul.f32 %v2242_v59, %v2242_v59  ;;  %v2258_v59 = vadd.f32 -1.0, %v188_v54  ;;  %v204_v54 = vld [vmem:[#allocation3 + $0x580] sm:$0xff] }
 0x118   :  { %v1693_v17 = vadd.f32 %v1692_v13, %v1181_v8  ;;  %v1197_v8 = vmul.f32 %v2243_v63, %v2243_v63  ;;  %v2259_v63 = vadd.f32 -1.0, %v189_v58  ;;  %v205_v58 = vld [vmem:[#allocation3 + $0x588] sm:$0xff] }
 0x11a   :  { %v1694_v21 = vadd.f32 %v1693_v17, %v1182_v12  ;;  %v1198_v12 = vmul.f32 %v2244_v3, %v2244_v3  ;;  %v2260_v3 = vadd.f32 -1.0, %v190_v62  ;;  %v206_v62 = vld [vmem:[#allocation3 + $0x590] sm:$0xff] }
 0x11c   :  { %v1695_v25 = vadd.f32 %v1694_v21, %v1183_v16  ;;  %v1199_v16 = vmul.f32 %v2245_v7, %v2245_v7  ;;  %v2261_v7 = vadd.f32 -1.0, %v191_v2  ;;  %v207_v2 = vld [vmem:[#allocation3 + $0x598] sm:$0xff] }
 0x11e   :  { %v1696_v29 = vadd.f32 %v1695_v25, %v1184_v20  ;;  %v1200_v20 = vmul.f32 %v2246_v11, %v2246_v11  ;;  %v2262_v11 = vadd.f32 -1.0, %v192_v6  ;;  %v208_v6 = vld [vmem:[#allocation3 + $0x5a0] sm:$0xff] }
 0x120   :  { %v1697_v33 = vadd.f32 %v1696_v29, %v1185_v24  ;;  %v1201_v24 = vmul.f32 %v2247_v15, %v2247_v15  ;;  %v2263_v15 = vadd.f32 -1.0, %v193_v10  ;;  %v209_v10 = vld [vmem:[#allocation3 + $0x5a8] sm:$0xff] }
 0x122   :  { %v1698_v37 = vadd.f32 %v1697_v33, %v1186_v28  ;;  %v1202_v28 = vmul.f32 %v2248_v19, %v2248_v19  ;;  %v2264_v19 = vadd.f32 -1.0, %v194_v14  ;;  %v210_v14 = vld [vmem:[#allocation3 + $0x5b0] sm:$0xff] }
 0x124   :  { %v1699_v41 = vadd.f32 %v1698_v37, %v1187_v32  ;;  %v1203_v32 = vmul.f32 %v2249_v23, %v2249_v23  ;;  %v2265_v23 = vadd.f32 -1.0, %v195_v18  ;;  %v211_v18 = vld [vmem:[#allocation3 + $0x5b8] sm:$0xff] }
 0x126   :  { %v1700_v45 = vadd.f32 %v1699_v41, %v1188_v36  ;;  %v1204_v36 = vmul.f32 %v2250_v27, %v2250_v27  ;;  %v2266_v27 = vadd.f32 -1.0, %v196_v22  ;;  %v212_v22 = vld [vmem:[#allocation3 + $0x5c0] sm:$0xff] }
 0x128   :  { %v1701_v49 = vadd.f32 %v1700_v45, %v1189_v40  ;;  %v1205_v40 = vmul.f32 %v2251_v31, %v2251_v31  ;;  %v2267_v31 = vadd.f32 -1.0, %v197_v26  ;;  %v213_v26 = vld [vmem:[#allocation3 + $0x5c8] sm:$0xff] }
 0x12a   :  { %v1702_v53 = vadd.f32 %v1701_v49, %v1190_v44  ;;  %v1206_v44 = vmul.f32 %v2252_v35, %v2252_v35  ;;  %v2268_v35 = vadd.f32 -1.0, %v198_v30  ;;  %v214_v30 = vld [vmem:[#allocation3 + $0x5d0] sm:$0xff] }
 0x12c   :  { %v1703_v57 = vadd.f32 %v1702_v53, %v1191_v48  ;;  %v1207_v48 = vmul.f32 %v2253_v39, %v2253_v39  ;;  %v2269_v39 = vadd.f32 -1.0, %v199_v34  ;;  %v215_v34 = vld [vmem:[#allocation3 + $0x5d8] sm:$0xff] }
 0x12e   :  { %v1704_v61 = vadd.f32 %v1703_v57, %v1192_v52  ;;  %v1208_v52 = vmul.f32 %v2254_v43, %v2254_v43  ;;  %v2270_v43 = vadd.f32 -1.0, %v200_v38  ;;  %v216_v38 = vld [vmem:[#allocation3 + $0x5e0] sm:$0xff] }
 0x130   :  { %v1705_v1 = vadd.f32 %v1704_v61, %v1193_v56  ;;  %v1209_v56 = vmul.f32 %v2255_v47, %v2255_v47  ;;  %v2271_v47 = vadd.f32 -1.0, %v201_v42  ;;  %v217_v42 = vld [vmem:[#allocation3 + $0x5e8] sm:$0xff] }
 0x132   :  { %v1706_v5 = vadd.f32 %v1705_v1, %v1194_v60  ;;  %v1210_v60 = vmul.f32 %v2256_v51, %v2256_v51  ;;  %v2272_v51 = vadd.f32 -1.0, %v202_v46  ;;  %v218_v46 = vld [vmem:[#allocation3 + $0x5f0] sm:$0xff] }
 0x134   :  { %v1707_v9 = vadd.f32 %v1706_v5, %v1195_v0  ;;  %v1211_v0 = vmul.f32 %v2257_v55, %v2257_v55  ;;  %v2273_v55 = vadd.f32 -1.0, %v203_v50  ;;  %v219_v50 = vld [vmem:[#allocation3 + $0x5f8] sm:$0xff] }
 0x136   :  { %v1708_v13 = vadd.f32 %v1707_v9, %v1196_v4  ;;  %v1212_v4 = vmul.f32 %v2258_v59, %v2258_v59  ;;  %v2274_v59 = vadd.f32 -1.0, %v204_v54  ;;  %v220_v54 = vld [vmem:[#allocation3 + $0x600] sm:$0xff] }
 0x138   :  { %v1709_v17 = vadd.f32 %v1708_v13, %v1197_v8  ;;  %v1213_v8 = vmul.f32 %v2259_v63, %v2259_v63  ;;  %v2275_v63 = vadd.f32 -1.0, %v205_v58  ;;  %v221_v58 = vld [vmem:[#allocation3 + $0x608] sm:$0xff] }
 0x13a   :  { %v1710_v21 = vadd.f32 %v1709_v17, %v1198_v12  ;;  %v1214_v12 = vmul.f32 %v2260_v3, %v2260_v3  ;;  %v2276_v3 = vadd.f32 -1.0, %v206_v62  ;;  %v222_v62 = vld [vmem:[#allocation3 + $0x610] sm:$0xff] }
 0x13c   :  { %v1711_v25 = vadd.f32 %v1710_v21, %v1199_v16  ;;  %v1215_v16 = vmul.f32 %v2261_v7, %v2261_v7  ;;  %v2277_v7 = vadd.f32 -1.0, %v207_v2  ;;  %v223_v2 = vld [vmem:[#allocation3 + $0x618] sm:$0xff] }
 0x13e   :  { %v1712_v29 = vadd.f32 %v1711_v25, %v1200_v20  ;;  %v1216_v20 = vmul.f32 %v2262_v11, %v2262_v11  ;;  %v2278_v11 = vadd.f32 -1.0, %v208_v6  ;;  %v224_v6 = vld [vmem:[#allocation3 + $0x620] sm:$0xff] }
 0x140   :  { %v1713_v33 = vadd.f32 %v1712_v29, %v1201_v24  ;;  %v1217_v24 = vmul.f32 %v2263_v15, %v2263_v15  ;;  %v2279_v15 = vadd.f32 -1.0, %v209_v10  ;;  %v225_v10 = vld [vmem:[#allocation3 + $0x628] sm:$0xff] }
 0x142   :  { %v1714_v37 = vadd.f32 %v1713_v33, %v1202_v28  ;;  %v1218_v28 = vmul.f32 %v2264_v19, %v2264_v19  ;;  %v2280_v19 = vadd.f32 -1.0, %v210_v14  ;;  %v226_v14 = vld [vmem:[#allocation3 + $0x630] sm:$0xff] }
 0x144   :  { %v1715_v41 = vadd.f32 %v1714_v37, %v1203_v32  ;;  %v1219_v32 = vmul.f32 %v2265_v23, %v2265_v23  ;;  %v2281_v23 = vadd.f32 -1.0, %v211_v18  ;;  %v227_v18 = vld [vmem:[#allocation3 + $0x638] sm:$0xff] }
 0x146   :  { %v1716_v45 = vadd.f32 %v1715_v41, %v1204_v36  ;;  %v1220_v36 = vmul.f32 %v2266_v27, %v2266_v27  ;;  %v2282_v27 = vadd.f32 -1.0, %v212_v22  ;;  %v228_v22 = vld [vmem:[#allocation3 + $0x640] sm:$0xff] }
 0x148   :  { %v1717_v49 = vadd.f32 %v1716_v45, %v1205_v40  ;;  %v1221_v40 = vmul.f32 %v2267_v31, %v2267_v31  ;;  %v2283_v31 = vadd.f32 -1.0, %v213_v26  ;;  %v229_v26 = vld [vmem:[#allocation3 + $0x648] sm:$0xff] }
 0x14a   :  { %v1718_v53 = vadd.f32 %v1717_v49, %v1206_v44  ;;  %v1222_v44 = vmul.f32 %v2268_v35, %v2268_v35  ;;  %v2284_v35 = vadd.f32 -1.0, %v214_v30  ;;  %v230_v30 = vld [vmem:[#allocation3 + $0x650] sm:$0xff] }
 0x14c   :  { %v1719_v57 = vadd.f32 %v1718_v53, %v1207_v48  ;;  %v1223_v48 = vmul.f32 %v2269_v39, %v2269_v39  ;;  %v2285_v39 = vadd.f32 -1.0, %v215_v34  ;;  %v231_v34 = vld [vmem:[#allocation3 + $0x658] sm:$0xff] }
 0x14e   :  { %v1720_v61 = vadd.f32 %v1719_v57, %v1208_v52  ;;  %v1224_v52 = vmul.f32 %v2270_v43, %v2270_v43  ;;  %v2286_v43 = vadd.f32 -1.0, %v216_v38  ;;  %v232_v38 = vld [vmem:[#allocation3 + $0x660] sm:$0xff] }
 0x150   :  { %v1721_v1 = vadd.f32 %v1720_v61, %v1209_v56  ;;  %v1225_v56 = vmul.f32 %v2271_v47, %v2271_v47  ;;  %v2287_v47 = vadd.f32 -1.0, %v217_v42  ;;  %v233_v42 = vld [vmem:[#allocation3 + $0x668] sm:$0xff] }
 0x152   :  { %v1722_v5 = vadd.f32 %v1721_v1, %v1210_v60  ;;  %v1226_v60 = vmul.f32 %v2272_v51, %v2272_v51  ;;  %v2288_v51 = vadd.f32 -1.0, %v218_v46  ;;  %v234_v46 = vld [vmem:[#allocation3 + $0x670] sm:$0xff] }
 0x154   :  { %v1723_v9 = vadd.f32 %v1722_v5, %v1211_v0  ;;  %v1227_v0 = vmul.f32 %v2273_v55, %v2273_v55  ;;  %v2289_v55 = vadd.f32 -1.0, %v219_v50  ;;  %v235_v50 = vld [vmem:[#allocation3 + $0x678] sm:$0xff] }
 0x156   :  { %v1724_v13 = vadd.f32 %v1723_v9, %v1212_v4  ;;  %v1228_v4 = vmul.f32 %v2274_v59, %v2274_v59  ;;  %v2290_v59 = vadd.f32 -1.0, %v220_v54  ;;  %v236_v54 = vld [vmem:[#allocation3 + $0x680] sm:$0xff] }
 0x158   :  { %v1725_v17 = vadd.f32 %v1724_v13, %v1213_v8  ;;  %v1229_v8 = vmul.f32 %v2275_v63, %v2275_v63  ;;  %v2291_v63 = vadd.f32 -1.0, %v221_v58  ;;  %v237_v58 = vld [vmem:[#allocation3 + $0x688] sm:$0xff] }
 0x15a   :  { %v1726_v21 = vadd.f32 %v1725_v17, %v1214_v12  ;;  %v1230_v12 = vmul.f32 %v2276_v3, %v2276_v3  ;;  %v2292_v3 = vadd.f32 -1.0, %v222_v62  ;;  %v238_v62 = vld [vmem:[#allocation3 + $0x690] sm:$0xff] }
 0x15c   :  { %v1727_v25 = vadd.f32 %v1726_v21, %v1215_v16  ;;  %v1231_v16 = vmul.f32 %v2277_v7, %v2277_v7  ;;  %v2293_v7 = vadd.f32 -1.0, %v223_v2  ;;  %v239_v2 = vld [vmem:[#allocation3 + $0x698] sm:$0xff] }
 0x15e   :  { %v1728_v29 = vadd.f32 %v1727_v25, %v1216_v20  ;;  %v1232_v20 = vmul.f32 %v2278_v11, %v2278_v11  ;;  %v2294_v11 = vadd.f32 -1.0, %v224_v6  ;;  %v240_v6 = vld [vmem:[#allocation3 + $0x6a0] sm:$0xff] }
 0x160   :  { %v1729_v33 = vadd.f32 %v1728_v29, %v1217_v24  ;;  %v1233_v24 = vmul.f32 %v2279_v15, %v2279_v15  ;;  %v2295_v15 = vadd.f32 -1.0, %v225_v10  ;;  %v241_v10 = vld [vmem:[#allocation3 + $0x6a8] sm:$0xff] }
 0x162   :  { %v1730_v37 = vadd.f32 %v1729_v33, %v1218_v28  ;;  %v1234_v28 = vmul.f32 %v2280_v19, %v2280_v19  ;;  %v2296_v19 = vadd.f32 -1.0, %v226_v14  ;;  %v242_v14 = vld [vmem:[#allocation3 + $0x6b0] sm:$0xff] }
 0x164   :  { %v1731_v41 = vadd.f32 %v1730_v37, %v1219_v32  ;;  %v1235_v32 = vmul.f32 %v2281_v23, %v2281_v23  ;;  %v2297_v23 = vadd.f32 -1.0, %v227_v18  ;;  %v243_v18 = vld [vmem:[#allocation3 + $0x6b8] sm:$0xff] }
 0x166   :  { %v1732_v45 = vadd.f32 %v1731_v41, %v1220_v36  ;;  %v1236_v36 = vmul.f32 %v2282_v27, %v2282_v27  ;;  %v2298_v27 = vadd.f32 -1.0, %v228_v22  ;;  %v244_v22 = vld [vmem:[#allocation3 + $0x6c0] sm:$0xff] }
 0x168   :  { %v1733_v49 = vadd.f32 %v1732_v45, %v1221_v40  ;;  %v1237_v40 = vmul.f32 %v2283_v31, %v2283_v31  ;;  %v2299_v31 = vadd.f32 -1.0, %v229_v26  ;;  %v245_v26 = vld [vmem:[#allocation3 + $0x6c8] sm:$0xff] }
 0x16a   :  { %v1734_v53 = vadd.f32 %v1733_v49, %v1222_v44  ;;  %v1238_v44 = vmul.f32 %v2284_v35, %v2284_v35  ;;  %v2300_v35 = vadd.f32 -1.0, %v230_v30  ;;  %v246_v30 = vld [vmem:[#allocation3 + $0x6d0] sm:$0xff] }
 0x16c   :  { %v1735_v57 = vadd.f32 %v1734_v53, %v1223_v48  ;;  %v1239_v48 = vmul.f32 %v2285_v39, %v2285_v39  ;;  %v2301_v39 = vadd.f32 -1.0, %v231_v34  ;;  %v247_v34 = vld [vmem:[#allocation3 + $0x6d8] sm:$0xff] }
 0x16e   :  { %v1736_v61 = vadd.f32 %v1735_v57, %v1224_v52  ;;  %v1240_v52 = vmul.f32 %v2286_v43, %v2286_v43  ;;  %v2302_v43 = vadd.f32 -1.0, %v232_v38  ;;  %v248_v38 = vld [vmem:[#allocation3 + $0x6e0] sm:$0xff] }
 0x170   :  { %v1737_v1 = vadd.f32 %v1736_v61, %v1225_v56  ;;  %v1241_v56 = vmul.f32 %v2287_v47, %v2287_v47  ;;  %v2303_v47 = vadd.f32 -1.0, %v233_v42  ;;  %v249_v42 = vld [vmem:[#allocation3 + $0x6e8] sm:$0xff] }
 0x172   :  { %v1738_v5 = vadd.f32 %v1737_v1, %v1226_v60  ;;  %v1242_v60 = vmul.f32 %v2288_v51, %v2288_v51  ;;  %v2304_v51 = vadd.f32 -1.0, %v234_v46  ;;  %v250_v46 = vld [vmem:[#allocation3 + $0x6f0] sm:$0xff] }
 0x174   :  { %v1739_v9 = vadd.f32 %v1738_v5, %v1227_v0  ;;  %v1243_v0 = vmul.f32 %v2289_v55, %v2289_v55  ;;  %v2305_v55 = vadd.f32 -1.0, %v235_v50  ;;  %v251_v50 = vld [vmem:[#allocation3 + $0x6f8] sm:$0xff] }
 0x176   :  { %v1740_v13 = vadd.f32 %v1739_v9, %v1228_v4  ;;  %v1244_v4 = vmul.f32 %v2290_v59, %v2290_v59  ;;  %v2306_v59 = vadd.f32 -1.0, %v236_v54  ;;  %v252_v54 = vld [vmem:[#allocation3 + $0x700] sm:$0xff] }
 0x178   :  { %v1741_v17 = vadd.f32 %v1740_v13, %v1229_v8  ;;  %v1245_v8 = vmul.f32 %v2291_v63, %v2291_v63  ;;  %v2307_v63 = vadd.f32 -1.0, %v237_v58  ;;  %v253_v58 = vld [vmem:[#allocation3 + $0x708] sm:$0xff] }
 0x17a   :  { %v1742_v21 = vadd.f32 %v1741_v17, %v1230_v12  ;;  %v1246_v12 = vmul.f32 %v2292_v3, %v2292_v3  ;;  %v2308_v3 = vadd.f32 -1.0, %v238_v62  ;;  %v254_v62 = vld [vmem:[#allocation3 + $0x710] sm:$0xff] }
 0x17c   :  { %v1743_v25 = vadd.f32 %v1742_v21, %v1231_v16  ;;  %v1247_v16 = vmul.f32 %v2293_v7, %v2293_v7  ;;  %v2309_v7 = vadd.f32 -1.0, %v239_v2  ;;  %v255_v2 = vld [vmem:[#allocation3 + $0x718] sm:$0xff] }
 0x17e   :  { %v1744_v29 = vadd.f32 %v1743_v25, %v1232_v20  ;;  %v1248_v20 = vmul.f32 %v2294_v11, %v2294_v11  ;;  %v2310_v11 = vadd.f32 -1.0, %v240_v6  ;;  %v256_v6 = vld [vmem:[#allocation3 + $0x720] sm:$0xff] }
 0x180   :  { %v1745_v33 = vadd.f32 %v1744_v29, %v1233_v24  ;;  %v1249_v24 = vmul.f32 %v2295_v15, %v2295_v15  ;;  %v2311_v15 = vadd.f32 -1.0, %v241_v10  ;;  %v257_v10 = vld [vmem:[#allocation3 + $0x728] sm:$0xff] }
 0x182   :  { %v1746_v37 = vadd.f32 %v1745_v33, %v1234_v28  ;;  %v1250_v28 = vmul.f32 %v2296_v19, %v2296_v19  ;;  %v2312_v19 = vadd.f32 -1.0, %v242_v14  ;;  %v258_v14 = vld [vmem:[#allocation3 + $0x730] sm:$0xff] }
 0x184   :  { %v1747_v41 = vadd.f32 %v1746_v37, %v1235_v32  ;;  %v1251_v32 = vmul.f32 %v2297_v23, %v2297_v23  ;;  %v2313_v23 = vadd.f32 -1.0, %v243_v18  ;;  %v259_v18 = vld [vmem:[#allocation3 + $0x738] sm:$0xff] }
 0x186   :  { %v1748_v45 = vadd.f32 %v1747_v41, %v1236_v36  ;;  %v1252_v36 = vmul.f32 %v2298_v27, %v2298_v27  ;;  %v2314_v27 = vadd.f32 -1.0, %v244_v22  ;;  %v260_v22 = vld [vmem:[#allocation3 + $0x740] sm:$0xff] }
 0x188   :  { %v1749_v49 = vadd.f32 %v1748_v45, %v1237_v40  ;;  %v1253_v40 = vmul.f32 %v2299_v31, %v2299_v31  ;;  %v2315_v31 = vadd.f32 -1.0, %v245_v26  ;;  %v261_v26 = vld [vmem:[#allocation3 + $0x748] sm:$0xff] }
 0x18a   :  { %v1750_v53 = vadd.f32 %v1749_v49, %v1238_v44  ;;  %v1254_v44 = vmul.f32 %v2300_v35, %v2300_v35  ;;  %v2316_v35 = vadd.f32 -1.0, %v246_v30  ;;  %v262_v30 = vld [vmem:[#allocation3 + $0x750] sm:$0xff] }
 0x18c   :  { %v1751_v57 = vadd.f32 %v1750_v53, %v1239_v48  ;;  %v1255_v48 = vmul.f32 %v2301_v39, %v2301_v39  ;;  %v2317_v39 = vadd.f32 -1.0, %v247_v34  ;;  %v263_v34 = vld [vmem:[#allocation3 + $0x758] sm:$0xff] }
 0x18e   :  { %v1752_v61 = vadd.f32 %v1751_v57, %v1240_v52  ;;  %v1256_v52 = vmul.f32 %v2302_v43, %v2302_v43  ;;  %v2318_v43 = vadd.f32 -1.0, %v248_v38  ;;  %v264_v38 = vld [vmem:[#allocation3 + $0x760] sm:$0xff] }
 0x190   :  { %v1753_v1 = vadd.f32 %v1752_v61, %v1241_v56  ;;  %v1257_v56 = vmul.f32 %v2303_v47, %v2303_v47  ;;  %v2319_v47 = vadd.f32 -1.0, %v249_v42  ;;  %v265_v42 = vld [vmem:[#allocation3 + $0x768] sm:$0xff] }
 0x192   :  { %v1754_v5 = vadd.f32 %v1753_v1, %v1242_v60  ;;  %v1258_v60 = vmul.f32 %v2304_v51, %v2304_v51  ;;  %v2320_v51 = vadd.f32 -1.0, %v250_v46  ;;  %v266_v46 = vld [vmem:[#allocation3 + $0x770] sm:$0xff] }
 0x194   :  { %v1755_v9 = vadd.f32 %v1754_v5, %v1243_v0  ;;  %v1259_v0 = vmul.f32 %v2305_v55, %v2305_v55  ;;  %v2321_v55 = vadd.f32 -1.0, %v251_v50  ;;  %v267_v50 = vld [vmem:[#allocation3 + $0x778] sm:$0xff] }
 0x196   :  { %v1756_v13 = vadd.f32 %v1755_v9, %v1244_v4  ;;  %v1260_v4 = vmul.f32 %v2306_v59, %v2306_v59  ;;  %v2322_v59 = vadd.f32 -1.0, %v252_v54  ;;  %v268_v54 = vld [vmem:[#allocation3 + $0x780] sm:$0xff] }
 0x198   :  { %v1757_v17 = vadd.f32 %v1756_v13, %v1245_v8  ;;  %v1261_v8 = vmul.f32 %v2307_v63, %v2307_v63  ;;  %v2323_v63 = vadd.f32 -1.0, %v253_v58  ;;  %v269_v58 = vld [vmem:[#allocation3 + $0x788] sm:$0xff] }
 0x19a   :  { %v1758_v21 = vadd.f32 %v1757_v17, %v1246_v12  ;;  %v1262_v12 = vmul.f32 %v2308_v3, %v2308_v3  ;;  %v2324_v3 = vadd.f32 -1.0, %v254_v62  ;;  %v270_v62 = vld [vmem:[#allocation3 + $0x790] sm:$0xff] }
 0x19c   :  { %v1759_v25 = vadd.f32 %v1758_v21, %v1247_v16  ;;  %v1263_v16 = vmul.f32 %v2309_v7, %v2309_v7  ;;  %v2325_v7 = vadd.f32 -1.0, %v255_v2  ;;  %v271_v2 = vld [vmem:[#allocation3 + $0x798] sm:$0xff] }
 0x19e   :  { %v1760_v29 = vadd.f32 %v1759_v25, %v1248_v20  ;;  %v1264_v20 = vmul.f32 %v2310_v11, %v2310_v11  ;;  %v2326_v11 = vadd.f32 -1.0, %v256_v6  ;;  %v272_v6 = vld [vmem:[#allocation3 + $0x7a0] sm:$0xff] }
 0x1a0   :  { %v1761_v33 = vadd.f32 %v1760_v29, %v1249_v24  ;;  %v1265_v24 = vmul.f32 %v2311_v15, %v2311_v15  ;;  %v2327_v15 = vadd.f32 -1.0, %v257_v10  ;;  %v273_v10 = vld [vmem:[#allocation3 + $0x7a8] sm:$0xff] }
 0x1a2   :  { %v1762_v37 = vadd.f32 %v1761_v33, %v1250_v28  ;;  %v1266_v28 = vmul.f32 %v2312_v19, %v2312_v19  ;;  %v2328_v19 = vadd.f32 -1.0, %v258_v14  ;;  %v274_v14 = vld [vmem:[#allocation3 + $0x7b0] sm:$0xff] }
 0x1a4   :  { %v1763_v41 = vadd.f32 %v1762_v37, %v1251_v32  ;;  %v1267_v32 = vmul.f32 %v2313_v23, %v2313_v23  ;;  %v2329_v23 = vadd.f32 -1.0, %v259_v18  ;;  %v275_v18 = vld [vmem:[#allocation3 + $0x7b8] sm:$0xff] }
 0x1a6   :  { %v1764_v45 = vadd.f32 %v1763_v41, %v1252_v36  ;;  %v1268_v36 = vmul.f32 %v2314_v27, %v2314_v27  ;;  %v2330_v27 = vadd.f32 -1.0, %v260_v22  ;;  %v276_v22 = vld [vmem:[#allocation3 + $0x7c0] sm:$0xff] }
 0x1a8   :  { %v1765_v49 = vadd.f32 %v1764_v45, %v1253_v40  ;;  %v1269_v40 = vmul.f32 %v2315_v31, %v2315_v31  ;;  %v2331_v31 = vadd.f32 -1.0, %v261_v26  ;;  %v277_v26 = vld [vmem:[#allocation3 + $0x7c8] sm:$0xff] }
 0x1aa   :  { %v1766_v53 = vadd.f32 %v1765_v49, %v1254_v44  ;;  %v1270_v44 = vmul.f32 %v2316_v35, %v2316_v35  ;;  %v2332_v35 = vadd.f32 -1.0, %v262_v30  ;;  %v278_v30 = vld [vmem:[#allocation3 + $0x7d0] sm:$0xff] }
 0x1ac   :  { %v1767_v57 = vadd.f32 %v1766_v53, %v1255_v48  ;;  %v1271_v48 = vmul.f32 %v2317_v39, %v2317_v39  ;;  %v2333_v39 = vadd.f32 -1.0, %v263_v34  ;;  %v279_v34 = vld [vmem:[#allocation3 + $0x7d8] sm:$0xff] }
 0x1ae   :  { %v1768_v61 = vadd.f32 %v1767_v57, %v1256_v52  ;;  %v1272_v52 = vmul.f32 %v2318_v43, %v2318_v43  ;;  %v2334_v43 = vadd.f32 -1.0, %v264_v38  ;;  %v280_v38 = vld [vmem:[#allocation3 + $0x7e0] sm:$0xff] }
 0x1b0   :  { %v1769_v1 = vadd.f32 %v1768_v61, %v1257_v56  ;;  %v1273_v56 = vmul.f32 %v2319_v47, %v2319_v47  ;;  %v2335_v47 = vadd.f32 -1.0, %v265_v42  ;;  %v281_v42 = vld [vmem:[#allocation3 + $0x7e8] sm:$0xff] }
 0x1b2   :  { %v1770_v5 = vadd.f32 %v1769_v1, %v1258_v60  ;;  %v1274_v60 = vmul.f32 %v2320_v51, %v2320_v51  ;;  %v2336_v51 = vadd.f32 -1.0, %v266_v46  ;;  %v282_v46 = vld [vmem:[#allocation3 + $0x7f0] sm:$0xff] }
 0x1b4   :  { %v1771_v9 = vadd.f32 %v1770_v5, %v1259_v0  ;;  %v1275_v0 = vmul.f32 %v2321_v55, %v2321_v55  ;;  %v2337_v55 = vadd.f32 -1.0, %v267_v50  ;;  %v283_v50 = vld [vmem:[#allocation3 + $0x7f8] sm:$0xff] }
 0x1b6   :  { %v1772_v13 = vadd.f32 %v1771_v9, %v1260_v4  ;;  %v1276_v4 = vmul.f32 %v2322_v59, %v2322_v59  ;;  %v2338_v59 = vadd.f32 -1.0, %v268_v54  ;;  %v284_v54 = vld [vmem:[#allocation3 + $0x800] sm:$0xff] }
 0x1b8   :  { %v1773_v17 = vadd.f32 %v1772_v13, %v1261_v8  ;;  %v1277_v8 = vmul.f32 %v2323_v63, %v2323_v63  ;;  %v2339_v63 = vadd.f32 -1.0, %v269_v58  ;;  %v285_v58 = vld [vmem:[#allocation3 + $0x808] sm:$0xff] }
 0x1ba   :  { %v1774_v21 = vadd.f32 %v1773_v17, %v1262_v12  ;;  %v1278_v12 = vmul.f32 %v2324_v3, %v2324_v3  ;;  %v2340_v3 = vadd.f32 -1.0, %v270_v62  ;;  %v286_v62 = vld [vmem:[#allocation3 + $0x810] sm:$0xff] }
 0x1bc   :  { %v1775_v25 = vadd.f32 %v1774_v21, %v1263_v16  ;;  %v1279_v16 = vmul.f32 %v2325_v7, %v2325_v7  ;;  %v2341_v7 = vadd.f32 -1.0, %v271_v2  ;;  %v287_v2 = vld [vmem:[#allocation3 + $0x818] sm:$0xff] }
 0x1be   :  { %v1776_v29 = vadd.f32 %v1775_v25, %v1264_v20  ;;  %v1280_v20 = vmul.f32 %v2326_v11, %v2326_v11  ;;  %v2342_v11 = vadd.f32 -1.0, %v272_v6  ;;  %v288_v6 = vld [vmem:[#allocation3 + $0x820] sm:$0xff] }
 0x1c0   :  { %v1777_v33 = vadd.f32 %v1776_v29, %v1265_v24  ;;  %v1281_v24 = vmul.f32 %v2327_v15, %v2327_v15  ;;  %v2343_v15 = vadd.f32 -1.0, %v273_v10  ;;  %v289_v10 = vld [vmem:[#allocation3 + $0x828] sm:$0xff] }
 0x1c2   :  { %v1778_v37 = vadd.f32 %v1777_v33, %v1266_v28  ;;  %v1282_v28 = vmul.f32 %v2328_v19, %v2328_v19  ;;  %v2344_v19 = vadd.f32 -1.0, %v274_v14  ;;  %v290_v14 = vld [vmem:[#allocation3 + $0x830] sm:$0xff] }
 0x1c4   :  { %v1779_v41 = vadd.f32 %v1778_v37, %v1267_v32  ;;  %v1283_v32 = vmul.f32 %v2329_v23, %v2329_v23  ;;  %v2345_v23 = vadd.f32 -1.0, %v275_v18  ;;  %v291_v18 = vld [vmem:[#allocation3 + $0x838] sm:$0xff] }
 0x1c6   :  { %v1780_v45 = vadd.f32 %v1779_v41, %v1268_v36  ;;  %v1284_v36 = vmul.f32 %v2330_v27, %v2330_v27  ;;  %v2346_v27 = vadd.f32 -1.0, %v276_v22  ;;  %v292_v22 = vld [vmem:[#allocation3 + $0x840] sm:$0xff] }
 0x1c8   :  { %v1781_v49 = vadd.f32 %v1780_v45, %v1269_v40  ;;  %v1285_v40 = vmul.f32 %v2331_v31, %v2331_v31  ;;  %v2347_v31 = vadd.f32 -1.0, %v277_v26  ;;  %v293_v26 = vld [vmem:[#allocation3 + $0x848] sm:$0xff] }
 0x1ca   :  { %v1782_v53 = vadd.f32 %v1781_v49, %v1270_v44  ;;  %v1286_v44 = vmul.f32 %v2332_v35, %v2332_v35  ;;  %v2348_v35 = vadd.f32 -1.0, %v278_v30  ;;  %v294_v30 = vld [vmem:[#allocation3 + $0x850] sm:$0xff] }
 0x1cc   :  { %v1783_v57 = vadd.f32 %v1782_v53, %v1271_v48  ;;  %v1287_v48 = vmul.f32 %v2333_v39, %v2333_v39  ;;  %v2349_v39 = vadd.f32 -1.0, %v279_v34  ;;  %v295_v34 = vld [vmem:[#allocation3 + $0x858] sm:$0xff] }
 0x1ce   :  { %v1784_v61 = vadd.f32 %v1783_v57, %v1272_v52  ;;  %v1288_v52 = vmul.f32 %v2334_v43, %v2334_v43  ;;  %v2350_v43 = vadd.f32 -1.0, %v280_v38  ;;  %v296_v38 = vld [vmem:[#allocation3 + $0x860] sm:$0xff] }
 0x1d0   :  { %v1785_v1 = vadd.f32 %v1784_v61, %v1273_v56  ;;  %v1289_v56 = vmul.f32 %v2335_v47, %v2335_v47  ;;  %v2351_v47 = vadd.f32 -1.0, %v281_v42  ;;  %v297_v42 = vld [vmem:[#allocation3 + $0x868] sm:$0xff] }
 0x1d2   :  { %v1786_v5 = vadd.f32 %v1785_v1, %v1274_v60  ;;  %v1290_v60 = vmul.f32 %v2336_v51, %v2336_v51  ;;  %v2352_v51 = vadd.f32 -1.0, %v282_v46  ;;  %v298_v46 = vld [vmem:[#allocation3 + $0x870] sm:$0xff] }
 0x1d4   :  { %v1787_v9 = vadd.f32 %v1786_v5, %v1275_v0  ;;  %v1291_v0 = vmul.f32 %v2337_v55, %v2337_v55  ;;  %v2353_v55 = vadd.f32 -1.0, %v283_v50  ;;  %v299_v50 = vld [vmem:[#allocation3 + $0x878] sm:$0xff] }
 0x1d6   :  { %v1788_v13 = vadd.f32 %v1787_v9, %v1276_v4  ;;  %v1292_v4 = vmul.f32 %v2338_v59, %v2338_v59  ;;  %v2354_v59 = vadd.f32 -1.0, %v284_v54  ;;  %v300_v54 = vld [vmem:[#allocation3 + $0x880] sm:$0xff] }
 0x1d8   :  { %v1789_v17 = vadd.f32 %v1788_v13, %v1277_v8  ;;  %v1293_v8 = vmul.f32 %v2339_v63, %v2339_v63  ;;  %v2355_v63 = vadd.f32 -1.0, %v285_v58  ;;  %v301_v58 = vld [vmem:[#allocation3 + $0x888] sm:$0xff] }
 0x1da   :  { %v1790_v21 = vadd.f32 %v1789_v17, %v1278_v12  ;;  %v1294_v12 = vmul.f32 %v2340_v3, %v2340_v3  ;;  %v2356_v3 = vadd.f32 -1.0, %v286_v62  ;;  %v302_v62 = vld [vmem:[#allocation3 + $0x890] sm:$0xff] }
 0x1dc   :  { %v1791_v25 = vadd.f32 %v1790_v21, %v1279_v16  ;;  %v1295_v16 = vmul.f32 %v2341_v7, %v2341_v7  ;;  %v2357_v7 = vadd.f32 -1.0, %v287_v2  ;;  %v303_v2 = vld [vmem:[#allocation3 + $0x898] sm:$0xff] }
 0x1de   :  { %v1792_v29 = vadd.f32 %v1791_v25, %v1280_v20  ;;  %v1296_v20 = vmul.f32 %v2342_v11, %v2342_v11  ;;  %v2358_v11 = vadd.f32 -1.0, %v288_v6  ;;  %v304_v6 = vld [vmem:[#allocation3 + $0x8a0] sm:$0xff] }
 0x1e0   :  { %v1793_v33 = vadd.f32 %v1792_v29, %v1281_v24  ;;  %v1297_v24 = vmul.f32 %v2343_v15, %v2343_v15  ;;  %v2359_v15 = vadd.f32 -1.0, %v289_v10  ;;  %v305_v10 = vld [vmem:[#allocation3 + $0x8a8] sm:$0xff] }
 0x1e2   :  { %v1794_v37 = vadd.f32 %v1793_v33, %v1282_v28  ;;  %v1298_v28 = vmul.f32 %v2344_v19, %v2344_v19  ;;  %v2360_v19 = vadd.f32 -1.0, %v290_v14  ;;  %v306_v14 = vld [vmem:[#allocation3 + $0x8b0] sm:$0xff] }
 0x1e4   :  { %v1795_v41 = vadd.f32 %v1794_v37, %v1283_v32  ;;  %v1299_v32 = vmul.f32 %v2345_v23, %v2345_v23  ;;  %v2361_v23 = vadd.f32 -1.0, %v291_v18  ;;  %v307_v18 = vld [vmem:[#allocation3 + $0x8b8] sm:$0xff] }
 0x1e6   :  { %v1796_v45 = vadd.f32 %v1795_v41, %v1284_v36  ;;  %v1300_v36 = vmul.f32 %v2346_v27, %v2346_v27  ;;  %v2362_v27 = vadd.f32 -1.0, %v292_v22  ;;  %v308_v22 = vld [vmem:[#allocation3 + $0x8c0] sm:$0xff] }
 0x1e8   :  { %v1797_v49 = vadd.f32 %v1796_v45, %v1285_v40  ;;  %v1301_v40 = vmul.f32 %v2347_v31, %v2347_v31  ;;  %v2363_v31 = vadd.f32 -1.0, %v293_v26  ;;  %v309_v26 = vld [vmem:[#allocation3 + $0x8c8] sm:$0xff] }
 0x1ea   :  { %v1798_v53 = vadd.f32 %v1797_v49, %v1286_v44  ;;  %v1302_v44 = vmul.f32 %v2348_v35, %v2348_v35  ;;  %v2364_v35 = vadd.f32 -1.0, %v294_v30  ;;  %v310_v30 = vld [vmem:[#allocation3 + $0x8d0] sm:$0xff] }
 0x1ec   :  { %v1799_v57 = vadd.f32 %v1798_v53, %v1287_v48  ;;  %v1303_v48 = vmul.f32 %v2349_v39, %v2349_v39  ;;  %v2365_v39 = vadd.f32 -1.0, %v295_v34  ;;  %v311_v34 = vld [vmem:[#allocation3 + $0x8d8] sm:$0xff] }
 0x1ee   :  { %v1800_v61 = vadd.f32 %v1799_v57, %v1288_v52  ;;  %v1304_v52 = vmul.f32 %v2350_v43, %v2350_v43  ;;  %v2366_v43 = vadd.f32 -1.0, %v296_v38  ;;  %v312_v38 = vld [vmem:[#allocation3 + $0x8e0] sm:$0xff] }
 0x1f0   :  { %v1801_v1 = vadd.f32 %v1800_v61, %v1289_v56  ;;  %v1305_v56 = vmul.f32 %v2351_v47, %v2351_v47  ;;  %v2367_v47 = vadd.f32 -1.0, %v297_v42  ;;  %v313_v42 = vld [vmem:[#allocation3 + $0x8e8] sm:$0xff] }
 0x1f2   :  { %v1802_v5 = vadd.f32 %v1801_v1, %v1290_v60  ;;  %v1306_v60 = vmul.f32 %v2352_v51, %v2352_v51  ;;  %v2368_v51 = vadd.f32 -1.0, %v298_v46  ;;  %v314_v46 = vld [vmem:[#allocation3 + $0x8f0] sm:$0xff] }
 0x1f4   :  { %v1803_v9 = vadd.f32 %v1802_v5, %v1291_v0  ;;  %v1307_v0 = vmul.f32 %v2353_v55, %v2353_v55  ;;  %v2369_v55 = vadd.f32 -1.0, %v299_v50  ;;  %v315_v50 = vld [vmem:[#allocation3 + $0x8f8] sm:$0xff] }
 0x1f6   :  { %v1804_v13 = vadd.f32 %v1803_v9, %v1292_v4  ;;  %v1308_v4 = vmul.f32 %v2354_v59, %v2354_v59  ;;  %v2370_v59 = vadd.f32 -1.0, %v300_v54  ;;  %v316_v54 = vld [vmem:[#allocation3 + $0x900] sm:$0xff] }
 0x1f8   :  { %v1805_v17 = vadd.f32 %v1804_v13, %v1293_v8  ;;  %v1309_v8 = vmul.f32 %v2355_v63, %v2355_v63  ;;  %v2371_v63 = vadd.f32 -1.0, %v301_v58  ;;  %v317_v58 = vld [vmem:[#allocation3 + $0x908] sm:$0xff] }
 0x1fa   :  { %v1806_v21 = vadd.f32 %v1805_v17, %v1294_v12  ;;  %v1310_v12 = vmul.f32 %v2356_v3, %v2356_v3  ;;  %v2372_v3 = vadd.f32 -1.0, %v302_v62  ;;  %v318_v62 = vld [vmem:[#allocation3 + $0x910] sm:$0xff] }
 0x1fc   :  { %v1807_v25 = vadd.f32 %v1806_v21, %v1295_v16  ;;  %v1311_v16 = vmul.f32 %v2357_v7, %v2357_v7  ;;  %v2373_v7 = vadd.f32 -1.0, %v303_v2  ;;  %v319_v2 = vld [vmem:[#allocation3 + $0x918] sm:$0xff] }
 0x1fe   :  { %v1808_v29 = vadd.f32 %v1807_v25, %v1296_v20  ;;  %v1312_v20 = vmul.f32 %v2358_v11, %v2358_v11  ;;  %v2374_v11 = vadd.f32 -1.0, %v304_v6  ;;  %v320_v6 = vld [vmem:[#allocation3 + $0x920] sm:$0xff] }
 0x200   :  { %v1809_v33 = vadd.f32 %v1808_v29, %v1297_v24  ;;  %v1313_v24 = vmul.f32 %v2359_v15, %v2359_v15  ;;  %v2375_v15 = vadd.f32 -1.0, %v305_v10  ;;  %v321_v10 = vld [vmem:[#allocation3 + $0x928] sm:$0xff] }
 0x202   :  { %v1810_v37 = vadd.f32 %v1809_v33, %v1298_v28  ;;  %v1314_v28 = vmul.f32 %v2360_v19, %v2360_v19  ;;  %v2376_v19 = vadd.f32 -1.0, %v306_v14  ;;  %v322_v14 = vld [vmem:[#allocation3 + $0x930] sm:$0xff] }
 0x204   :  { %v1811_v41 = vadd.f32 %v1810_v37, %v1299_v32  ;;  %v1315_v32 = vmul.f32 %v2361_v23, %v2361_v23  ;;  %v2377_v23 = vadd.f32 -1.0, %v307_v18  ;;  %v323_v18 = vld [vmem:[#allocation3 + $0x938] sm:$0xff] }
 0x206   :  { %v1812_v45 = vadd.f32 %v1811_v41, %v1300_v36  ;;  %v1316_v36 = vmul.f32 %v2362_v27, %v2362_v27  ;;  %v2378_v27 = vadd.f32 -1.0, %v308_v22  ;;  %v324_v22 = vld [vmem:[#allocation3 + $0x940] sm:$0xff] }
 0x208   :  { %v1813_v49 = vadd.f32 %v1812_v45, %v1301_v40  ;;  %v1317_v40 = vmul.f32 %v2363_v31, %v2363_v31  ;;  %v2379_v31 = vadd.f32 -1.0, %v309_v26  ;;  %v325_v26 = vld [vmem:[#allocation3 + $0x948] sm:$0xff] }
 0x20a   :  { %v1814_v53 = vadd.f32 %v1813_v49, %v1302_v44  ;;  %v1318_v44 = vmul.f32 %v2364_v35, %v2364_v35  ;;  %v2380_v35 = vadd.f32 -1.0, %v310_v30  ;;  %v326_v30 = vld [vmem:[#allocation3 + $0x950] sm:$0xff] }
 0x20c   :  { %v1815_v57 = vadd.f32 %v1814_v53, %v1303_v48  ;;  %v1319_v48 = vmul.f32 %v2365_v39, %v2365_v39  ;;  %v2381_v39 = vadd.f32 -1.0, %v311_v34  ;;  %v327_v34 = vld [vmem:[#allocation3 + $0x958] sm:$0xff] }
 0x20e   :  { %v1816_v61 = vadd.f32 %v1815_v57, %v1304_v52  ;;  %v1320_v52 = vmul.f32 %v2366_v43, %v2366_v43  ;;  %v2382_v43 = vadd.f32 -1.0, %v312_v38  ;;  %v328_v38 = vld [vmem:[#allocation3 + $0x960] sm:$0xff] }
 0x210   :  { %v1817_v1 = vadd.f32 %v1816_v61, %v1305_v56  ;;  %v1321_v56 = vmul.f32 %v2367_v47, %v2367_v47  ;;  %v2383_v47 = vadd.f32 -1.0, %v313_v42  ;;  %v329_v42 = vld [vmem:[#allocation3 + $0x968] sm:$0xff] }
 0x212   :  { %v1818_v5 = vadd.f32 %v1817_v1, %v1306_v60  ;;  %v1322_v60 = vmul.f32 %v2368_v51, %v2368_v51  ;;  %v2384_v51 = vadd.f32 -1.0, %v314_v46  ;;  %v330_v46 = vld [vmem:[#allocation3 + $0x970] sm:$0xff] }
 0x214   :  { %v1819_v9 = vadd.f32 %v1818_v5, %v1307_v0  ;;  %v1323_v0 = vmul.f32 %v2369_v55, %v2369_v55  ;;  %v2385_v55 = vadd.f32 -1.0, %v315_v50  ;;  %v331_v50 = vld [vmem:[#allocation3 + $0x978] sm:$0xff] }
 0x216   :  { %v1820_v13 = vadd.f32 %v1819_v9, %v1308_v4  ;;  %v1324_v4 = vmul.f32 %v2370_v59, %v2370_v59  ;;  %v2386_v59 = vadd.f32 -1.0, %v316_v54  ;;  %v332_v54 = vld [vmem:[#allocation3 + $0x980] sm:$0xff] }
 0x218   :  { %v1821_v17 = vadd.f32 %v1820_v13, %v1309_v8  ;;  %v1325_v8 = vmul.f32 %v2371_v63, %v2371_v63  ;;  %v2387_v63 = vadd.f32 -1.0, %v317_v58  ;;  %v333_v58 = vld [vmem:[#allocation3 + $0x988] sm:$0xff] }
 0x21a   :  { %v1822_v21 = vadd.f32 %v1821_v17, %v1310_v12  ;;  %v1326_v12 = vmul.f32 %v2372_v3, %v2372_v3  ;;  %v2388_v3 = vadd.f32 -1.0, %v318_v62  ;;  %v334_v62 = vld [vmem:[#allocation3 + $0x990] sm:$0xff] }
 0x21c   :  { %v1823_v25 = vadd.f32 %v1822_v21, %v1311_v16  ;;  %v1327_v16 = vmul.f32 %v2373_v7, %v2373_v7  ;;  %v2389_v7 = vadd.f32 -1.0, %v319_v2  ;;  %v335_v2 = vld [vmem:[#allocation3 + $0x998] sm:$0xff] }
 0x21e   :  { %v1824_v29 = vadd.f32 %v1823_v25, %v1312_v20  ;;  %v1328_v20 = vmul.f32 %v2374_v11, %v2374_v11  ;;  %v2390_v11 = vadd.f32 -1.0, %v320_v6  ;;  %v336_v6 = vld [vmem:[#allocation3 + $0x9a0] sm:$0xff] }
 0x220   :  { %v1825_v33 = vadd.f32 %v1824_v29, %v1313_v24  ;;  %v1329_v24 = vmul.f32 %v2375_v15, %v2375_v15  ;;  %v2391_v15 = vadd.f32 -1.0, %v321_v10  ;;  %v337_v10 = vld [vmem:[#allocation3 + $0x9a8] sm:$0xff] }
 0x222   :  { %v1826_v37 = vadd.f32 %v1825_v33, %v1314_v28  ;;  %v1330_v28 = vmul.f32 %v2376_v19, %v2376_v19  ;;  %v2392_v19 = vadd.f32 -1.0, %v322_v14  ;;  %v338_v14 = vld [vmem:[#allocation3 + $0x9b0] sm:$0xff] }
 0x224   :  { %v1827_v41 = vadd.f32 %v1826_v37, %v1315_v32  ;;  %v1331_v32 = vmul.f32 %v2377_v23, %v2377_v23  ;;  %v2393_v23 = vadd.f32 -1.0, %v323_v18  ;;  %v339_v18 = vld [vmem:[#allocation3 + $0x9b8] sm:$0xff] }
 0x226   :  { %v1828_v45 = vadd.f32 %v1827_v41, %v1316_v36  ;;  %v1332_v36 = vmul.f32 %v2378_v27, %v2378_v27  ;;  %v2394_v27 = vadd.f32 -1.0, %v324_v22  ;;  %v340_v22 = vld [vmem:[#allocation3 + $0x9c0] sm:$0xff] }
 0x228   :  { %v1829_v49 = vadd.f32 %v1828_v45, %v1317_v40  ;;  %v1333_v40 = vmul.f32 %v2379_v31, %v2379_v31  ;;  %v2395_v31 = vadd.f32 -1.0, %v325_v26  ;;  %v341_v26 = vld [vmem:[#allocation3 + $0x9c8] sm:$0xff] }
 0x22a   :  { %v1830_v53 = vadd.f32 %v1829_v49, %v1318_v44  ;;  %v1334_v44 = vmul.f32 %v2380_v35, %v2380_v35  ;;  %v2396_v35 = vadd.f32 -1.0, %v326_v30  ;;  %v342_v30 = vld [vmem:[#allocation3 + $0x9d0] sm:$0xff] }
 0x22c   :  { %v1831_v57 = vadd.f32 %v1830_v53, %v1319_v48  ;;  %v1335_v48 = vmul.f32 %v2381_v39, %v2381_v39  ;;  %v2397_v39 = vadd.f32 -1.0, %v327_v34  ;;  %v343_v34 = vld [vmem:[#allocation3 + $0x9d8] sm:$0xff] }
 0x22e   :  { %v1832_v61 = vadd.f32 %v1831_v57, %v1320_v52  ;;  %v1336_v52 = vmul.f32 %v2382_v43, %v2382_v43  ;;  %v2398_v43 = vadd.f32 -1.0, %v328_v38  ;;  %v344_v38 = vld [vmem:[#allocation3 + $0x9e0] sm:$0xff] }
 0x230   :  { %v1833_v1 = vadd.f32 %v1832_v61, %v1321_v56  ;;  %v1337_v56 = vmul.f32 %v2383_v47, %v2383_v47  ;;  %v2399_v47 = vadd.f32 -1.0, %v329_v42  ;;  %v345_v42 = vld [vmem:[#allocation3 + $0x9e8] sm:$0xff] }
 0x232   :  { %v1834_v5 = vadd.f32 %v1833_v1, %v1322_v60  ;;  %v1338_v60 = vmul.f32 %v2384_v51, %v2384_v51  ;;  %v2400_v51 = vadd.f32 -1.0, %v330_v46  ;;  %v346_v46 = vld [vmem:[#allocation3 + $0x9f0] sm:$0xff] }
 0x234   :  { %v1835_v9 = vadd.f32 %v1834_v5, %v1323_v0  ;;  %v1339_v0 = vmul.f32 %v2385_v55, %v2385_v55  ;;  %v2401_v55 = vadd.f32 -1.0, %v331_v50  ;;  %v347_v50 = vld [vmem:[#allocation3 + $0x9f8] sm:$0xff] }
 0x236   :  { %v1836_v13 = vadd.f32 %v1835_v9, %v1324_v4  ;;  %v1340_v4 = vmul.f32 %v2386_v59, %v2386_v59  ;;  %v2402_v59 = vadd.f32 -1.0, %v332_v54  ;;  %v348_v54 = vld [vmem:[#allocation3 + $0xa00] sm:$0xff] }
 0x238   :  { %v1837_v17 = vadd.f32 %v1836_v13, %v1325_v8  ;;  %v1341_v8 = vmul.f32 %v2387_v63, %v2387_v63  ;;  %v2403_v63 = vadd.f32 -1.0, %v333_v58  ;;  %v349_v58 = vld [vmem:[#allocation3 + $0xa08] sm:$0xff] }
 0x23a   :  { %v1838_v21 = vadd.f32 %v1837_v17, %v1326_v12  ;;  %v1342_v12 = vmul.f32 %v2388_v3, %v2388_v3  ;;  %v2404_v3 = vadd.f32 -1.0, %v334_v62  ;;  %v350_v62 = vld [vmem:[#allocation3 + $0xa10] sm:$0xff] }
 0x23c   :  { %v1839_v25 = vadd.f32 %v1838_v21, %v1327_v16  ;;  %v1343_v16 = vmul.f32 %v2389_v7, %v2389_v7  ;;  %v2405_v7 = vadd.f32 -1.0, %v335_v2  ;;  %v351_v2 = vld [vmem:[#allocation3 + $0xa18] sm:$0xff] }
 0x23e   :  { %v1840_v29 = vadd.f32 %v1839_v25, %v1328_v20  ;;  %v1344_v20 = vmul.f32 %v2390_v11, %v2390_v11  ;;  %v2406_v11 = vadd.f32 -1.0, %v336_v6  ;;  %v352_v6 = vld [vmem:[#allocation3 + $0xa20] sm:$0xff] }
 0x240   :  { %v1841_v33 = vadd.f32 %v1840_v29, %v1329_v24  ;;  %v1345_v24 = vmul.f32 %v2391_v15, %v2391_v15  ;;  %v2407_v15 = vadd.f32 -1.0, %v337_v10  ;;  %v353_v10 = vld [vmem:[#allocation3 + $0xa28] sm:$0xff] }
 0x242   :  { %v1842_v37 = vadd.f32 %v1841_v33, %v1330_v28  ;;  %v1346_v28 = vmul.f32 %v2392_v19, %v2392_v19  ;;  %v2408_v19 = vadd.f32 -1.0, %v338_v14  ;;  %v354_v14 = vld [vmem:[#allocation3 + $0xa30] sm:$0xff] }
 0x244   :  { %v1843_v41 = vadd.f32 %v1842_v37, %v1331_v32  ;;  %v1347_v32 = vmul.f32 %v2393_v23, %v2393_v23  ;;  %v2409_v23 = vadd.f32 -1.0, %v339_v18  ;;  %v355_v18 = vld [vmem:[#allocation3 + $0xa38] sm:$0xff] }
 0x246   :  { %v1844_v45 = vadd.f32 %v1843_v41, %v1332_v36  ;;  %v1348_v36 = vmul.f32 %v2394_v27, %v2394_v27  ;;  %v2410_v27 = vadd.f32 -1.0, %v340_v22  ;;  %v356_v22 = vld [vmem:[#allocation3 + $0xa40] sm:$0xff] }
 0x248   :  { %v1845_v49 = vadd.f32 %v1844_v45, %v1333_v40  ;;  %v1349_v40 = vmul.f32 %v2395_v31, %v2395_v31  ;;  %v2411_v31 = vadd.f32 -1.0, %v341_v26  ;;  %v357_v26 = vld [vmem:[#allocation3 + $0xa48] sm:$0xff] }
 0x24a   :  { %v1846_v53 = vadd.f32 %v1845_v49, %v1334_v44  ;;  %v1350_v44 = vmul.f32 %v2396_v35, %v2396_v35  ;;  %v2412_v35 = vadd.f32 -1.0, %v342_v30  ;;  %v358_v30 = vld [vmem:[#allocation3 + $0xa50] sm:$0xff] }
 0x24c   :  { %v1847_v57 = vadd.f32 %v1846_v53, %v1335_v48  ;;  %v1351_v48 = vmul.f32 %v2397_v39, %v2397_v39  ;;  %v2413_v39 = vadd.f32 -1.0, %v343_v34  ;;  %v359_v34 = vld [vmem:[#allocation3 + $0xa58] sm:$0xff] }
 0x24e   :  { %v1848_v61 = vadd.f32 %v1847_v57, %v1336_v52  ;;  %v1352_v52 = vmul.f32 %v2398_v43, %v2398_v43  ;;  %v2414_v43 = vadd.f32 -1.0, %v344_v38  ;;  %v360_v38 = vld [vmem:[#allocation3 + $0xa60] sm:$0xff] }
 0x250   :  { %v1849_v1 = vadd.f32 %v1848_v61, %v1337_v56  ;;  %v1353_v56 = vmul.f32 %v2399_v47, %v2399_v47  ;;  %v2415_v47 = vadd.f32 -1.0, %v345_v42  ;;  %v361_v42 = vld [vmem:[#allocation3 + $0xa68] sm:$0xff] }
 0x252   :  { %v1850_v5 = vadd.f32 %v1849_v1, %v1338_v60  ;;  %v1354_v60 = vmul.f32 %v2400_v51, %v2400_v51  ;;  %v2416_v51 = vadd.f32 -1.0, %v346_v46  ;;  %v362_v46 = vld [vmem:[#allocation3 + $0xa70] sm:$0xff] }
 0x254   :  { %v1851_v9 = vadd.f32 %v1850_v5, %v1339_v0  ;;  %v1355_v0 = vmul.f32 %v2401_v55, %v2401_v55  ;;  %v2417_v55 = vadd.f32 -1.0, %v347_v50  ;;  %v363_v50 = vld [vmem:[#allocation3 + $0xa78] sm:$0xff] }
 0x256   :  { %v1852_v13 = vadd.f32 %v1851_v9, %v1340_v4  ;;  %v1356_v4 = vmul.f32 %v2402_v59, %v2402_v59  ;;  %v2418_v59 = vadd.f32 -1.0, %v348_v54  ;;  %v364_v54 = vld [vmem:[#allocation3 + $0xa80] sm:$0xff] }
 0x258   :  { %v1853_v17 = vadd.f32 %v1852_v13, %v1341_v8  ;;  %v1357_v8 = vmul.f32 %v2403_v63, %v2403_v63  ;;  %v2419_v63 = vadd.f32 -1.0, %v349_v58  ;;  %v365_v58 = vld [vmem:[#allocation3 + $0xa88] sm:$0xff] }
 0x25a   :  { %v1854_v21 = vadd.f32 %v1853_v17, %v1342_v12  ;;  %v1358_v12 = vmul.f32 %v2404_v3, %v2404_v3  ;;  %v2420_v3 = vadd.f32 -1.0, %v350_v62  ;;  %v366_v62 = vld [vmem:[#allocation3 + $0xa90] sm:$0xff] }
 0x25c   :  { %v1855_v25 = vadd.f32 %v1854_v21, %v1343_v16  ;;  %v1359_v16 = vmul.f32 %v2405_v7, %v2405_v7  ;;  %v2421_v7 = vadd.f32 -1.0, %v351_v2  ;;  %v367_v2 = vld [vmem:[#allocation3 + $0xa98] sm:$0xff] }
 0x25e   :  { %v1856_v29 = vadd.f32 %v1855_v25, %v1344_v20  ;;  %v1360_v20 = vmul.f32 %v2406_v11, %v2406_v11  ;;  %v2422_v11 = vadd.f32 -1.0, %v352_v6  ;;  %v368_v6 = vld [vmem:[#allocation3 + $0xaa0] sm:$0xff] }
 0x260   :  { %v1857_v33 = vadd.f32 %v1856_v29, %v1345_v24  ;;  %v1361_v24 = vmul.f32 %v2407_v15, %v2407_v15  ;;  %v2423_v15 = vadd.f32 -1.0, %v353_v10  ;;  %v369_v10 = vld [vmem:[#allocation3 + $0xaa8] sm:$0xff] }
 0x262   :  { %v1858_v37 = vadd.f32 %v1857_v33, %v1346_v28  ;;  %v1362_v28 = vmul.f32 %v2408_v19, %v2408_v19  ;;  %v2424_v19 = vadd.f32 -1.0, %v354_v14  ;;  %v370_v14 = vld [vmem:[#allocation3 + $0xab0] sm:$0xff] }
 0x264   :  { %v1859_v41 = vadd.f32 %v1858_v37, %v1347_v32  ;;  %v1363_v32 = vmul.f32 %v2409_v23, %v2409_v23  ;;  %v2425_v23 = vadd.f32 -1.0, %v355_v18  ;;  %v371_v18 = vld [vmem:[#allocation3 + $0xab8] sm:$0xff] }
 0x266   :  { %v1860_v45 = vadd.f32 %v1859_v41, %v1348_v36  ;;  %v1364_v36 = vmul.f32 %v2410_v27, %v2410_v27  ;;  %v2426_v27 = vadd.f32 -1.0, %v356_v22  ;;  %v372_v22 = vld [vmem:[#allocation3 + $0xac0] sm:$0xff] }
 0x268   :  { %v1861_v49 = vadd.f32 %v1860_v45, %v1349_v40  ;;  %v1365_v40 = vmul.f32 %v2411_v31, %v2411_v31  ;;  %v2427_v31 = vadd.f32 -1.0, %v357_v26  ;;  %v373_v26 = vld [vmem:[#allocation3 + $0xac8] sm:$0xff] }
 0x26a   :  { %v1862_v53 = vadd.f32 %v1861_v49, %v1350_v44  ;;  %v1366_v44 = vmul.f32 %v2412_v35, %v2412_v35  ;;  %v2428_v35 = vadd.f32 -1.0, %v358_v30  ;;  %v374_v30 = vld [vmem:[#allocation3 + $0xad0] sm:$0xff] }
 0x26c   :  { %v1863_v57 = vadd.f32 %v1862_v53, %v1351_v48  ;;  %v1367_v48 = vmul.f32 %v2413_v39, %v2413_v39  ;;  %v2429_v39 = vadd.f32 -1.0, %v359_v34  ;;  %v375_v34 = vld [vmem:[#allocation3 + $0xad8] sm:$0xff] }
 0x26e   :  { %v1864_v61 = vadd.f32 %v1863_v57, %v1352_v52  ;;  %v1368_v52 = vmul.f32 %v2414_v43, %v2414_v43  ;;  %v2430_v43 = vadd.f32 -1.0, %v360_v38  ;;  %v376_v38 = vld [vmem:[#allocation3 + $0xae0] sm:$0xff] }
 0x270   :  { %v1865_v1 = vadd.f32 %v1864_v61, %v1353_v56  ;;  %v1369_v56 = vmul.f32 %v2415_v47, %v2415_v47  ;;  %v2431_v47 = vadd.f32 -1.0, %v361_v42  ;;  %v377_v42 = vld [vmem:[#allocation3 + $0xae8] sm:$0xff] }
 0x272   :  { %v1866_v5 = vadd.f32 %v1865_v1, %v1354_v60  ;;  %v1370_v60 = vmul.f32 %v2416_v51, %v2416_v51  ;;  %v2432_v51 = vadd.f32 -1.0, %v362_v46  ;;  %v378_v46 = vld [vmem:[#allocation3 + $0xaf0] sm:$0xff] }
 0x274   :  { %v1867_v9 = vadd.f32 %v1866_v5, %v1355_v0  ;;  %v1371_v0 = vmul.f32 %v2417_v55, %v2417_v55  ;;  %v2433_v55 = vadd.f32 -1.0, %v363_v50  ;;  %v379_v50 = vld [vmem:[#allocation3 + $0xaf8] sm:$0xff] }
 0x276   :  { %v1868_v13 = vadd.f32 %v1867_v9, %v1356_v4  ;;  %v1372_v4 = vmul.f32 %v2418_v59, %v2418_v59  ;;  %v2434_v59 = vadd.f32 -1.0, %v364_v54  ;;  %v380_v54 = vld [vmem:[#allocation3 + $0xb00] sm:$0xff] }
 0x278   :  { %v1869_v17 = vadd.f32 %v1868_v13, %v1357_v8  ;;  %v1373_v8 = vmul.f32 %v2419_v63, %v2419_v63  ;;  %v2435_v63 = vadd.f32 -1.0, %v365_v58  ;;  %v381_v58 = vld [vmem:[#allocation3 + $0xb08] sm:$0xff] }
 0x27a   :  { %v1870_v21 = vadd.f32 %v1869_v17, %v1358_v12  ;;  %v1374_v12 = vmul.f32 %v2420_v3, %v2420_v3  ;;  %v2436_v3 = vadd.f32 -1.0, %v366_v62  ;;  %v382_v62 = vld [vmem:[#allocation3 + $0xb10] sm:$0xff] }
 0x27c   :  { %v1871_v25 = vadd.f32 %v1870_v21, %v1359_v16  ;;  %v1375_v16 = vmul.f32 %v2421_v7, %v2421_v7  ;;  %v2437_v7 = vadd.f32 -1.0, %v367_v2  ;;  %v383_v2 = vld [vmem:[#allocation3 + $0xb18] sm:$0xff] }
 0x27e   :  { %v1872_v29 = vadd.f32 %v1871_v25, %v1360_v20  ;;  %v1376_v20 = vmul.f32 %v2422_v11, %v2422_v11  ;;  %v2438_v11 = vadd.f32 -1.0, %v368_v6  ;;  %v384_v6 = vld [vmem:[#allocation3 + $0xb20] sm:$0xff] }
 0x280   :  { %v1873_v33 = vadd.f32 %v1872_v29, %v1361_v24  ;;  %v1377_v24 = vmul.f32 %v2423_v15, %v2423_v15  ;;  %v2439_v15 = vadd.f32 -1.0, %v369_v10  ;;  %v385_v10 = vld [vmem:[#allocation3 + $0xb28] sm:$0xff] }
 0x282   :  { %v1874_v37 = vadd.f32 %v1873_v33, %v1362_v28  ;;  %v1378_v28 = vmul.f32 %v2424_v19, %v2424_v19  ;;  %v2440_v19 = vadd.f32 -1.0, %v370_v14  ;;  %v386_v14 = vld [vmem:[#allocation3 + $0xb30] sm:$0xff] }
 0x284   :  { %v1875_v41 = vadd.f32 %v1874_v37, %v1363_v32  ;;  %v1379_v32 = vmul.f32 %v2425_v23, %v2425_v23  ;;  %v2441_v23 = vadd.f32 -1.0, %v371_v18  ;;  %v387_v18 = vld [vmem:[#allocation3 + $0xb38] sm:$0xff] }
 0x286   :  { %v1876_v45 = vadd.f32 %v1875_v41, %v1364_v36  ;;  %v1380_v36 = vmul.f32 %v2426_v27, %v2426_v27  ;;  %v2442_v27 = vadd.f32 -1.0, %v372_v22  ;;  %v388_v22 = vld [vmem:[#allocation3 + $0xb40] sm:$0xff] }
 0x288   :  { %v1877_v49 = vadd.f32 %v1876_v45, %v1365_v40  ;;  %v1381_v40 = vmul.f32 %v2427_v31, %v2427_v31  ;;  %v2443_v31 = vadd.f32 -1.0, %v373_v26  ;;  %v389_v26 = vld [vmem:[#allocation3 + $0xb48] sm:$0xff] }
 0x28a   :  { %v1878_v53 = vadd.f32 %v1877_v49, %v1366_v44  ;;  %v1382_v44 = vmul.f32 %v2428_v35, %v2428_v35  ;;  %v2444_v35 = vadd.f32 -1.0, %v374_v30  ;;  %v390_v30 = vld [vmem:[#allocation3 + $0xb50] sm:$0xff] }
 0x28c   :  { %v1879_v57 = vadd.f32 %v1878_v53, %v1367_v48  ;;  %v1383_v48 = vmul.f32 %v2429_v39, %v2429_v39  ;;  %v2445_v39 = vadd.f32 -1.0, %v375_v34  ;;  %v391_v34 = vld [vmem:[#allocation3 + $0xb58] sm:$0xff] }
 0x28e   :  { %v1880_v61 = vadd.f32 %v1879_v57, %v1368_v52  ;;  %v1384_v52 = vmul.f32 %v2430_v43, %v2430_v43  ;;  %v2446_v43 = vadd.f32 -1.0, %v376_v38  ;;  %v392_v38 = vld [vmem:[#allocation3 + $0xb60] sm:$0xff] }
 0x290   :  { %v1881_v1 = vadd.f32 %v1880_v61, %v1369_v56  ;;  %v1385_v56 = vmul.f32 %v2431_v47, %v2431_v47  ;;  %v2447_v47 = vadd.f32 -1.0, %v377_v42  ;;  %v393_v42 = vld [vmem:[#allocation3 + $0xb68] sm:$0xff] }
 0x292   :  { %v1882_v5 = vadd.f32 %v1881_v1, %v1370_v60  ;;  %v1386_v60 = vmul.f32 %v2432_v51, %v2432_v51  ;;  %v2448_v51 = vadd.f32 -1.0, %v378_v46  ;;  %v394_v46 = vld [vmem:[#allocation3 + $0xb70] sm:$0xff] }
 0x294   :  { %v1883_v9 = vadd.f32 %v1882_v5, %v1371_v0  ;;  %v1387_v0 = vmul.f32 %v2433_v55, %v2433_v55  ;;  %v2449_v55 = vadd.f32 -1.0, %v379_v50  ;;  %v395_v50 = vld [vmem:[#allocation3 + $0xb78] sm:$0xff] }
 0x296   :  { %v1884_v13 = vadd.f32 %v1883_v9, %v1372_v4  ;;  %v1388_v4 = vmul.f32 %v2434_v59, %v2434_v59  ;;  %v2450_v59 = vadd.f32 -1.0, %v380_v54  ;;  %v396_v54 = vld [vmem:[#allocation3 + $0xb80] sm:$0xff] }
 0x298   :  { %v1885_v17 = vadd.f32 %v1884_v13, %v1373_v8  ;;  %v1389_v8 = vmul.f32 %v2435_v63, %v2435_v63  ;;  %v2451_v63 = vadd.f32 -1.0, %v381_v58  ;;  %v397_v58 = vld [vmem:[#allocation3 + $0xb88] sm:$0xff] }
 0x29a   :  { %v1886_v21 = vadd.f32 %v1885_v17, %v1374_v12  ;;  %v1390_v12 = vmul.f32 %v2436_v3, %v2436_v3  ;;  %v2452_v3 = vadd.f32 -1.0, %v382_v62  ;;  %v398_v62 = vld [vmem:[#allocation3 + $0xb90] sm:$0xff] }
 0x29c   :  { %v1887_v25 = vadd.f32 %v1886_v21, %v1375_v16  ;;  %v1391_v16 = vmul.f32 %v2437_v7, %v2437_v7  ;;  %v2453_v7 = vadd.f32 -1.0, %v383_v2  ;;  %v399_v2 = vld [vmem:[#allocation3 + $0xb98] sm:$0xff] }
 0x29e   :  { %v1888_v29 = vadd.f32 %v1887_v25, %v1376_v20  ;;  %v1392_v20 = vmul.f32 %v2438_v11, %v2438_v11  ;;  %v2454_v11 = vadd.f32 -1.0, %v384_v6  ;;  %v400_v6 = vld [vmem:[#allocation3 + $0xba0] sm:$0xff] }
 0x2a0   :  { %v1889_v33 = vadd.f32 %v1888_v29, %v1377_v24  ;;  %v1393_v24 = vmul.f32 %v2439_v15, %v2439_v15  ;;  %v2455_v15 = vadd.f32 -1.0, %v385_v10  ;;  %v401_v10 = vld [vmem:[#allocation3 + $0xba8] sm:$0xff] }
 0x2a2   :  { %v1890_v37 = vadd.f32 %v1889_v33, %v1378_v28  ;;  %v1394_v28 = vmul.f32 %v2440_v19, %v2440_v19  ;;  %v2456_v19 = vadd.f32 -1.0, %v386_v14  ;;  %v402_v14 = vld [vmem:[#allocation3 + $0xbb0] sm:$0xff] }
 0x2a4   :  { %v1891_v41 = vadd.f32 %v1890_v37, %v1379_v32  ;;  %v1395_v32 = vmul.f32 %v2441_v23, %v2441_v23  ;;  %v2457_v23 = vadd.f32 -1.0, %v387_v18  ;;  %v403_v18 = vld [vmem:[#allocation3 + $0xbb8] sm:$0xff] }
 0x2a6   :  { %v1892_v45 = vadd.f32 %v1891_v41, %v1380_v36  ;;  %v1396_v36 = vmul.f32 %v2442_v27, %v2442_v27  ;;  %v2458_v27 = vadd.f32 -1.0, %v388_v22  ;;  %v404_v22 = vld [vmem:[#allocation3 + $0xbc0] sm:$0xff] }
 0x2a8   :  { %v1893_v49 = vadd.f32 %v1892_v45, %v1381_v40  ;;  %v1397_v40 = vmul.f32 %v2443_v31, %v2443_v31  ;;  %v2459_v31 = vadd.f32 -1.0, %v389_v26  ;;  %v405_v26 = vld [vmem:[#allocation3 + $0xbc8] sm:$0xff] }
 0x2aa   :  { %v1894_v53 = vadd.f32 %v1893_v49, %v1382_v44  ;;  %v1398_v44 = vmul.f32 %v2444_v35, %v2444_v35  ;;  %v2460_v35 = vadd.f32 -1.0, %v390_v30  ;;  %v406_v30 = vld [vmem:[#allocation3 + $0xbd0] sm:$0xff] }
 0x2ac   :  { %v1895_v57 = vadd.f32 %v1894_v53, %v1383_v48  ;;  %v1399_v48 = vmul.f32 %v2445_v39, %v2445_v39  ;;  %v2461_v39 = vadd.f32 -1.0, %v391_v34  ;;  %v407_v34 = vld [vmem:[#allocation3 + $0xbd8] sm:$0xff] }
 0x2ae   :  { %v1896_v61 = vadd.f32 %v1895_v57, %v1384_v52  ;;  %v1400_v52 = vmul.f32 %v2446_v43, %v2446_v43  ;;  %v2462_v43 = vadd.f32 -1.0, %v392_v38  ;;  %v408_v38 = vld [vmem:[#allocation3 + $0xbe0] sm:$0xff] }
 0x2b0   :  { %v1897_v1 = vadd.f32 %v1896_v61, %v1385_v56  ;;  %v1401_v56 = vmul.f32 %v2447_v47, %v2447_v47  ;;  %v2463_v47 = vadd.f32 -1.0, %v393_v42  ;;  %v409_v42 = vld [vmem:[#allocation3 + $0xbe8] sm:$0xff] }
 0x2b2   :  { %v1898_v5 = vadd.f32 %v1897_v1, %v1386_v60  ;;  %v1402_v60 = vmul.f32 %v2448_v51, %v2448_v51  ;;  %v2464_v51 = vadd.f32 -1.0, %v394_v46  ;;  %v410_v46 = vld [vmem:[#allocation3 + $0xbf0] sm:$0xff] }
 0x2b4   :  { %v1899_v9 = vadd.f32 %v1898_v5, %v1387_v0  ;;  %v1403_v0 = vmul.f32 %v2449_v55, %v2449_v55  ;;  %v2465_v55 = vadd.f32 -1.0, %v395_v50  ;;  %v411_v50 = vld [vmem:[#allocation3 + $0xbf8] sm:$0xff] }
 0x2b6   :  { %v1900_v13 = vadd.f32 %v1899_v9, %v1388_v4  ;;  %v1404_v4 = vmul.f32 %v2450_v59, %v2450_v59  ;;  %v2466_v59 = vadd.f32 -1.0, %v396_v54  ;;  %v412_v54 = vld [vmem:[#allocation3 + $0xc00] sm:$0xff] }
 0x2b8   :  { %v1901_v17 = vadd.f32 %v1900_v13, %v1389_v8  ;;  %v1405_v8 = vmul.f32 %v2451_v63, %v2451_v63  ;;  %v2467_v63 = vadd.f32 -1.0, %v397_v58  ;;  %v413_v58 = vld [vmem:[#allocation3 + $0xc08] sm:$0xff] }
 0x2ba   :  { %v1902_v21 = vadd.f32 %v1901_v17, %v1390_v12  ;;  %v1406_v12 = vmul.f32 %v2452_v3, %v2452_v3  ;;  %v2468_v3 = vadd.f32 -1.0, %v398_v62  ;;  %v414_v62 = vld [vmem:[#allocation3 + $0xc10] sm:$0xff] }
 0x2bc   :  { %v1903_v25 = vadd.f32 %v1902_v21, %v1391_v16  ;;  %v1407_v16 = vmul.f32 %v2453_v7, %v2453_v7  ;;  %v2469_v7 = vadd.f32 -1.0, %v399_v2  ;;  %v415_v2 = vld [vmem:[#allocation3 + $0xc18] sm:$0xff] }
 0x2be   :  { %v1904_v29 = vadd.f32 %v1903_v25, %v1392_v20  ;;  %v1408_v20 = vmul.f32 %v2454_v11, %v2454_v11  ;;  %v2470_v11 = vadd.f32 -1.0, %v400_v6  ;;  %v416_v6 = vld [vmem:[#allocation3 + $0xc20] sm:$0xff] }
 0x2c0   :  { %v1905_v33 = vadd.f32 %v1904_v29, %v1393_v24  ;;  %v1409_v24 = vmul.f32 %v2455_v15, %v2455_v15  ;;  %v2471_v15 = vadd.f32 -1.0, %v401_v10  ;;  %v417_v10 = vld [vmem:[#allocation3 + $0xc28] sm:$0xff] }
 0x2c2   :  { %v1906_v37 = vadd.f32 %v1905_v33, %v1394_v28  ;;  %v1410_v28 = vmul.f32 %v2456_v19, %v2456_v19  ;;  %v2472_v19 = vadd.f32 -1.0, %v402_v14  ;;  %v418_v14 = vld [vmem:[#allocation3 + $0xc30] sm:$0xff] }
 0x2c4   :  { %v1907_v41 = vadd.f32 %v1906_v37, %v1395_v32  ;;  %v1411_v32 = vmul.f32 %v2457_v23, %v2457_v23  ;;  %v2473_v23 = vadd.f32 -1.0, %v403_v18  ;;  %v419_v18 = vld [vmem:[#allocation3 + $0xc38] sm:$0xff] }
 0x2c6   :  { %v1908_v45 = vadd.f32 %v1907_v41, %v1396_v36  ;;  %v1412_v36 = vmul.f32 %v2458_v27, %v2458_v27  ;;  %v2474_v27 = vadd.f32 -1.0, %v404_v22  ;;  %v420_v22 = vld [vmem:[#allocation3 + $0xc40] sm:$0xff] }
 0x2c8   :  { %v1909_v49 = vadd.f32 %v1908_v45, %v1397_v40  ;;  %v1413_v40 = vmul.f32 %v2459_v31, %v2459_v31  ;;  %v2475_v31 = vadd.f32 -1.0, %v405_v26  ;;  %v421_v26 = vld [vmem:[#allocation3 + $0xc48] sm:$0xff] }
 0x2ca   :  { %v1910_v53 = vadd.f32 %v1909_v49, %v1398_v44  ;;  %v1414_v44 = vmul.f32 %v2460_v35, %v2460_v35  ;;  %v2476_v35 = vadd.f32 -1.0, %v406_v30  ;;  %v422_v30 = vld [vmem:[#allocation3 + $0xc50] sm:$0xff] }
 0x2cc   :  { %v1911_v57 = vadd.f32 %v1910_v53, %v1399_v48  ;;  %v1415_v48 = vmul.f32 %v2461_v39, %v2461_v39  ;;  %v2477_v39 = vadd.f32 -1.0, %v407_v34  ;;  %v423_v34 = vld [vmem:[#allocation3 + $0xc58] sm:$0xff] }
 0x2ce   :  { %v1912_v61 = vadd.f32 %v1911_v57, %v1400_v52  ;;  %v1416_v52 = vmul.f32 %v2462_v43, %v2462_v43  ;;  %v2478_v43 = vadd.f32 -1.0, %v408_v38  ;;  %v424_v38 = vld [vmem:[#allocation3 + $0xc60] sm:$0xff] }
 0x2d0   :  { %v1913_v1 = vadd.f32 %v1912_v61, %v1401_v56  ;;  %v1417_v56 = vmul.f32 %v2463_v47, %v2463_v47  ;;  %v2479_v47 = vadd.f32 -1.0, %v409_v42  ;;  %v425_v42 = vld [vmem:[#allocation3 + $0xc68] sm:$0xff] }
 0x2d2   :  { %v1914_v5 = vadd.f32 %v1913_v1, %v1402_v60  ;;  %v1418_v60 = vmul.f32 %v2464_v51, %v2464_v51  ;;  %v2480_v51 = vadd.f32 -1.0, %v410_v46  ;;  %v426_v46 = vld [vmem:[#allocation3 + $0xc70] sm:$0xff] }
 0x2d4   :  { %v1915_v9 = vadd.f32 %v1914_v5, %v1403_v0  ;;  %v1419_v0 = vmul.f32 %v2465_v55, %v2465_v55  ;;  %v2481_v55 = vadd.f32 -1.0, %v411_v50  ;;  %v427_v50 = vld [vmem:[#allocation3 + $0xc78] sm:$0xff] }
 0x2d6   :  { %v1916_v13 = vadd.f32 %v1915_v9, %v1404_v4  ;;  %v1420_v4 = vmul.f32 %v2466_v59, %v2466_v59  ;;  %v2482_v59 = vadd.f32 -1.0, %v412_v54  ;;  %v428_v54 = vld [vmem:[#allocation3 + $0xc80] sm:$0xff] }
 0x2d8   :  { %v1917_v17 = vadd.f32 %v1916_v13, %v1405_v8  ;;  %v1421_v8 = vmul.f32 %v2467_v63, %v2467_v63  ;;  %v2483_v63 = vadd.f32 -1.0, %v413_v58  ;;  %v429_v58 = vld [vmem:[#allocation3 + $0xc88] sm:$0xff] }
 0x2da   :  { %v1918_v21 = vadd.f32 %v1917_v17, %v1406_v12  ;;  %v1422_v12 = vmul.f32 %v2468_v3, %v2468_v3  ;;  %v2484_v3 = vadd.f32 -1.0, %v414_v62  ;;  %v430_v62 = vld [vmem:[#allocation3 + $0xc90] sm:$0xff] }
 0x2dc   :  { %v1919_v25 = vadd.f32 %v1918_v21, %v1407_v16  ;;  %v1423_v16 = vmul.f32 %v2469_v7, %v2469_v7  ;;  %v2485_v7 = vadd.f32 -1.0, %v415_v2  ;;  %v431_v2 = vld [vmem:[#allocation3 + $0xc98] sm:$0xff] }
 0x2de   :  { %v1920_v29 = vadd.f32 %v1919_v25, %v1408_v20  ;;  %v1424_v20 = vmul.f32 %v2470_v11, %v2470_v11  ;;  %v2486_v11 = vadd.f32 -1.0, %v416_v6  ;;  %v432_v6 = vld [vmem:[#allocation3 + $0xca0] sm:$0xff] }
 0x2e0   :  { %v1921_v33 = vadd.f32 %v1920_v29, %v1409_v24  ;;  %v1425_v24 = vmul.f32 %v2471_v15, %v2471_v15  ;;  %v2487_v15 = vadd.f32 -1.0, %v417_v10  ;;  %v433_v10 = vld [vmem:[#allocation3 + $0xca8] sm:$0xff] }
 0x2e2   :  { %v1922_v37 = vadd.f32 %v1921_v33, %v1410_v28  ;;  %v1426_v28 = vmul.f32 %v2472_v19, %v2472_v19  ;;  %v2488_v19 = vadd.f32 -1.0, %v418_v14  ;;  %v434_v14 = vld [vmem:[#allocation3 + $0xcb0] sm:$0xff] }
 0x2e4   :  { %v1923_v41 = vadd.f32 %v1922_v37, %v1411_v32  ;;  %v1427_v32 = vmul.f32 %v2473_v23, %v2473_v23  ;;  %v2489_v23 = vadd.f32 -1.0, %v419_v18  ;;  %v435_v18 = vld [vmem:[#allocation3 + $0xcb8] sm:$0xff] }
 0x2e6   :  { %v1924_v45 = vadd.f32 %v1923_v41, %v1412_v36  ;;  %v1428_v36 = vmul.f32 %v2474_v27, %v2474_v27  ;;  %v2490_v27 = vadd.f32 -1.0, %v420_v22  ;;  %v436_v22 = vld [vmem:[#allocation3 + $0xcc0] sm:$0xff] }
 0x2e8   :  { %v1925_v49 = vadd.f32 %v1924_v45, %v1413_v40  ;;  %v1429_v40 = vmul.f32 %v2475_v31, %v2475_v31  ;;  %v2491_v31 = vadd.f32 -1.0, %v421_v26  ;;  %v437_v26 = vld [vmem:[#allocation3 + $0xcc8] sm:$0xff] }
 0x2ea   :  { %v1926_v53 = vadd.f32 %v1925_v49, %v1414_v44  ;;  %v1430_v44 = vmul.f32 %v2476_v35, %v2476_v35  ;;  %v2492_v35 = vadd.f32 -1.0, %v422_v30  ;;  %v438_v30 = vld [vmem:[#allocation3 + $0xcd0] sm:$0xff] }
 0x2ec   :  { %v1927_v57 = vadd.f32 %v1926_v53, %v1415_v48  ;;  %v1431_v48 = vmul.f32 %v2477_v39, %v2477_v39  ;;  %v2493_v39 = vadd.f32 -1.0, %v423_v34  ;;  %v439_v34 = vld [vmem:[#allocation3 + $0xcd8] sm:$0xff] }
 0x2ee   :  { %v1928_v61 = vadd.f32 %v1927_v57, %v1416_v52  ;;  %v1432_v52 = vmul.f32 %v2478_v43, %v2478_v43  ;;  %v2494_v43 = vadd.f32 -1.0, %v424_v38  ;;  %v440_v38 = vld [vmem:[#allocation3 + $0xce0] sm:$0xff] }
 0x2f0   :  { %v1929_v1 = vadd.f32 %v1928_v61, %v1417_v56  ;;  %v1433_v56 = vmul.f32 %v2479_v47, %v2479_v47  ;;  %v2495_v47 = vadd.f32 -1.0, %v425_v42  ;;  %v441_v42 = vld [vmem:[#allocation3 + $0xce8] sm:$0xff] }
 0x2f2   :  { %v1930_v5 = vadd.f32 %v1929_v1, %v1418_v60  ;;  %v1434_v60 = vmul.f32 %v2480_v51, %v2480_v51  ;;  %v2496_v51 = vadd.f32 -1.0, %v426_v46  ;;  %v442_v46 = vld [vmem:[#allocation3 + $0xcf0] sm:$0xff] }
 0x2f4   :  { %v1931_v9 = vadd.f32 %v1930_v5, %v1419_v0  ;;  %v1435_v0 = vmul.f32 %v2481_v55, %v2481_v55  ;;  %v2497_v55 = vadd.f32 -1.0, %v427_v50  ;;  %v443_v50 = vld [vmem:[#allocation3 + $0xcf8] sm:$0xff] }
 0x2f6   :  { %v1932_v13 = vadd.f32 %v1931_v9, %v1420_v4  ;;  %v1436_v4 = vmul.f32 %v2482_v59, %v2482_v59  ;;  %v2498_v59 = vadd.f32 -1.0, %v428_v54  ;;  %v444_v54 = vld [vmem:[#allocation3 + $0xd00] sm:$0xff] }
 0x2f8   :  { %v1933_v17 = vadd.f32 %v1932_v13, %v1421_v8  ;;  %v1437_v8 = vmul.f32 %v2483_v63, %v2483_v63  ;;  %v2499_v63 = vadd.f32 -1.0, %v429_v58  ;;  %v445_v58 = vld [vmem:[#allocation3 + $0xd08] sm:$0xff] }
 0x2fa   :  { %v1934_v21 = vadd.f32 %v1933_v17, %v1422_v12  ;;  %v1438_v12 = vmul.f32 %v2484_v3, %v2484_v3  ;;  %v2500_v3 = vadd.f32 -1.0, %v430_v62  ;;  %v446_v62 = vld [vmem:[#allocation3 + $0xd10] sm:$0xff] }
 0x2fc   :  { %v1935_v25 = vadd.f32 %v1934_v21, %v1423_v16  ;;  %v1439_v16 = vmul.f32 %v2485_v7, %v2485_v7  ;;  %v2501_v7 = vadd.f32 -1.0, %v431_v2  ;;  %v447_v2 = vld [vmem:[#allocation3 + $0xd18] sm:$0xff] }
 0x2fe   :  { %v1936_v29 = vadd.f32 %v1935_v25, %v1424_v20  ;;  %v1440_v20 = vmul.f32 %v2486_v11, %v2486_v11  ;;  %v2502_v11 = vadd.f32 -1.0, %v432_v6  ;;  %v448_v6 = vld [vmem:[#allocation3 + $0xd20] sm:$0xff] }
 0x300   :  { %v1937_v33 = vadd.f32 %v1936_v29, %v1425_v24  ;;  %v1441_v24 = vmul.f32 %v2487_v15, %v2487_v15  ;;  %v2503_v15 = vadd.f32 -1.0, %v433_v10  ;;  %v449_v10 = vld [vmem:[#allocation3 + $0xd28] sm:$0xff] }
 0x302   :  { %v1938_v37 = vadd.f32 %v1937_v33, %v1426_v28  ;;  %v1442_v28 = vmul.f32 %v2488_v19, %v2488_v19  ;;  %v2504_v19 = vadd.f32 -1.0, %v434_v14  ;;  %v450_v14 = vld [vmem:[#allocation3 + $0xd30] sm:$0xff] }
 0x304   :  { %v1939_v41 = vadd.f32 %v1938_v37, %v1427_v32  ;;  %v1443_v32 = vmul.f32 %v2489_v23, %v2489_v23  ;;  %v2505_v23 = vadd.f32 -1.0, %v435_v18  ;;  %v451_v18 = vld [vmem:[#allocation3 + $0xd38] sm:$0xff] }
 0x306   :  { %v1940_v45 = vadd.f32 %v1939_v41, %v1428_v36  ;;  %v1444_v36 = vmul.f32 %v2490_v27, %v2490_v27  ;;  %v2506_v27 = vadd.f32 -1.0, %v436_v22  ;;  %v452_v22 = vld [vmem:[#allocation3 + $0xd40] sm:$0xff] }
 0x308   :  { %v1941_v49 = vadd.f32 %v1940_v45, %v1429_v40  ;;  %v1445_v40 = vmul.f32 %v2491_v31, %v2491_v31  ;;  %v2507_v31 = vadd.f32 -1.0, %v437_v26  ;;  %v453_v26 = vld [vmem:[#allocation3 + $0xd48] sm:$0xff] }
 0x30a   :  { %v1942_v53 = vadd.f32 %v1941_v49, %v1430_v44  ;;  %v1446_v44 = vmul.f32 %v2492_v35, %v2492_v35  ;;  %v2508_v35 = vadd.f32 -1.0, %v438_v30  ;;  %v454_v30 = vld [vmem:[#allocation3 + $0xd50] sm:$0xff] }
 0x30c   :  { %v1943_v57 = vadd.f32 %v1942_v53, %v1431_v48  ;;  %v1447_v48 = vmul.f32 %v2493_v39, %v2493_v39  ;;  %v2509_v39 = vadd.f32 -1.0, %v439_v34  ;;  %v455_v34 = vld [vmem:[#allocation3 + $0xd58] sm:$0xff] }
 0x30e   :  { %v1944_v61 = vadd.f32 %v1943_v57, %v1432_v52  ;;  %v1448_v52 = vmul.f32 %v2494_v43, %v2494_v43  ;;  %v2510_v43 = vadd.f32 -1.0, %v440_v38  ;;  %v456_v38 = vld [vmem:[#allocation3 + $0xd60] sm:$0xff] }
 0x310   :  { %v1945_v1 = vadd.f32 %v1944_v61, %v1433_v56  ;;  %v1449_v56 = vmul.f32 %v2495_v47, %v2495_v47  ;;  %v2511_v47 = vadd.f32 -1.0, %v441_v42  ;;  %v457_v42 = vld [vmem:[#allocation3 + $0xd68] sm:$0xff] }
 0x312   :  { %v1946_v5 = vadd.f32 %v1945_v1, %v1434_v60  ;;  %v1450_v60 = vmul.f32 %v2496_v51, %v2496_v51  ;;  %v2512_v51 = vadd.f32 -1.0, %v442_v46  ;;  %v458_v46 = vld [vmem:[#allocation3 + $0xd70] sm:$0xff] }
 0x314   :  { %v1947_v9 = vadd.f32 %v1946_v5, %v1435_v0  ;;  %v1451_v0 = vmul.f32 %v2497_v55, %v2497_v55  ;;  %v2513_v55 = vadd.f32 -1.0, %v443_v50  ;;  %v459_v50 = vld [vmem:[#allocation3 + $0xd78] sm:$0xff] }
 0x316   :  { %v1948_v13 = vadd.f32 %v1947_v9, %v1436_v4  ;;  %v1452_v4 = vmul.f32 %v2498_v59, %v2498_v59  ;;  %v2514_v59 = vadd.f32 -1.0, %v444_v54  ;;  %v460_v54 = vld [vmem:[#allocation3 + $0xd80] sm:$0xff] }
 0x318   :  { %v1949_v17 = vadd.f32 %v1948_v13, %v1437_v8  ;;  %v1453_v8 = vmul.f32 %v2499_v63, %v2499_v63  ;;  %v2515_v63 = vadd.f32 -1.0, %v445_v58  ;;  %v461_v58 = vld [vmem:[#allocation3 + $0xd88] sm:$0xff] }
 0x31a   :  { %v1950_v21 = vadd.f32 %v1949_v17, %v1438_v12  ;;  %v1454_v12 = vmul.f32 %v2500_v3, %v2500_v3  ;;  %v2516_v3 = vadd.f32 -1.0, %v446_v62  ;;  %v462_v62 = vld [vmem:[#allocation3 + $0xd90] sm:$0xff] }
 0x31c   :  { %v1951_v25 = vadd.f32 %v1950_v21, %v1439_v16  ;;  %v1455_v16 = vmul.f32 %v2501_v7, %v2501_v7  ;;  %v2517_v7 = vadd.f32 -1.0, %v447_v2  ;;  %v463_v2 = vld [vmem:[#allocation3 + $0xd98] sm:$0xff] }
 0x31e   :  { %v1952_v29 = vadd.f32 %v1951_v25, %v1440_v20  ;;  %v1456_v20 = vmul.f32 %v2502_v11, %v2502_v11  ;;  %v2518_v11 = vadd.f32 -1.0, %v448_v6  ;;  %v464_v6 = vld [vmem:[#allocation3 + $0xda0] sm:$0xff] }
 0x320   :  { %v1953_v33 = vadd.f32 %v1952_v29, %v1441_v24  ;;  %v1457_v24 = vmul.f32 %v2503_v15, %v2503_v15  ;;  %v2519_v15 = vadd.f32 -1.0, %v449_v10  ;;  %v465_v10 = vld [vmem:[#allocation3 + $0xda8] sm:$0xff] }
 0x322   :  { %v1954_v37 = vadd.f32 %v1953_v33, %v1442_v28  ;;  %v1458_v28 = vmul.f32 %v2504_v19, %v2504_v19  ;;  %v2520_v19 = vadd.f32 -1.0, %v450_v14  ;;  %v466_v14 = vld [vmem:[#allocation3 + $0xdb0] sm:$0xff] }
 0x324   :  { %v1955_v41 = vadd.f32 %v1954_v37, %v1443_v32  ;;  %v1459_v32 = vmul.f32 %v2505_v23, %v2505_v23  ;;  %v2521_v23 = vadd.f32 -1.0, %v451_v18  ;;  %v467_v18 = vld [vmem:[#allocation3 + $0xdb8] sm:$0xff] }
 0x326   :  { %v1956_v45 = vadd.f32 %v1955_v41, %v1444_v36  ;;  %v1460_v36 = vmul.f32 %v2506_v27, %v2506_v27  ;;  %v2522_v27 = vadd.f32 -1.0, %v452_v22  ;;  %v468_v22 = vld [vmem:[#allocation3 + $0xdc0] sm:$0xff] }
 0x328   :  { %v1957_v49 = vadd.f32 %v1956_v45, %v1445_v40  ;;  %v1461_v40 = vmul.f32 %v2507_v31, %v2507_v31  ;;  %v2523_v31 = vadd.f32 -1.0, %v453_v26  ;;  %v469_v26 = vld [vmem:[#allocation3 + $0xdc8] sm:$0xff] }
 0x32a   :  { %v1958_v53 = vadd.f32 %v1957_v49, %v1446_v44  ;;  %v1462_v44 = vmul.f32 %v2508_v35, %v2508_v35  ;;  %v2524_v35 = vadd.f32 -1.0, %v454_v30  ;;  %v470_v30 = vld [vmem:[#allocation3 + $0xdd0] sm:$0xff] }
 0x32c   :  { %v1959_v57 = vadd.f32 %v1958_v53, %v1447_v48  ;;  %v1463_v48 = vmul.f32 %v2509_v39, %v2509_v39  ;;  %v2525_v39 = vadd.f32 -1.0, %v455_v34  ;;  %v471_v34 = vld [vmem:[#allocation3 + $0xdd8] sm:$0xff] }
 0x32e   :  { %v1960_v61 = vadd.f32 %v1959_v57, %v1448_v52  ;;  %v1464_v52 = vmul.f32 %v2510_v43, %v2510_v43  ;;  %v2526_v43 = vadd.f32 -1.0, %v456_v38  ;;  %v472_v38 = vld [vmem:[#allocation3 + $0xde0] sm:$0xff] }
 0x330   :  { %v1961_v1 = vadd.f32 %v1960_v61, %v1449_v56  ;;  %v1465_v56 = vmul.f32 %v2511_v47, %v2511_v47  ;;  %v2527_v47 = vadd.f32 -1.0, %v457_v42  ;;  %v473_v42 = vld [vmem:[#allocation3 + $0xde8] sm:$0xff] }
 0x332   :  { %v1962_v5 = vadd.f32 %v1961_v1, %v1450_v60  ;;  %v1466_v60 = vmul.f32 %v2512_v51, %v2512_v51  ;;  %v2528_v51 = vadd.f32 -1.0, %v458_v46  ;;  %v474_v46 = vld [vmem:[#allocation3 + $0xdf0] sm:$0xff] }
 0x334   :  { %v1963_v9 = vadd.f32 %v1962_v5, %v1451_v0  ;;  %v1467_v0 = vmul.f32 %v2513_v55, %v2513_v55  ;;  %v2529_v55 = vadd.f32 -1.0, %v459_v50  ;;  %v475_v50 = vld [vmem:[#allocation3 + $0xdf8] sm:$0xff] }
 0x336   :  { %v1964_v13 = vadd.f32 %v1963_v9, %v1452_v4  ;;  %v1468_v4 = vmul.f32 %v2514_v59, %v2514_v59  ;;  %v2530_v59 = vadd.f32 -1.0, %v460_v54  ;;  %v476_v54 = vld [vmem:[#allocation3 + $0xe00] sm:$0xff] }
 0x338   :  { %v1965_v17 = vadd.f32 %v1964_v13, %v1453_v8  ;;  %v1469_v8 = vmul.f32 %v2515_v63, %v2515_v63  ;;  %v2531_v63 = vadd.f32 -1.0, %v461_v58  ;;  %v477_v58 = vld [vmem:[#allocation3 + $0xe08] sm:$0xff] }
 0x33a   :  { %v1966_v21 = vadd.f32 %v1965_v17, %v1454_v12  ;;  %v1470_v12 = vmul.f32 %v2516_v3, %v2516_v3  ;;  %v2532_v3 = vadd.f32 -1.0, %v462_v62  ;;  %v478_v62 = vld [vmem:[#allocation3 + $0xe10] sm:$0xff] }
 0x33c   :  { %v1967_v25 = vadd.f32 %v1966_v21, %v1455_v16  ;;  %v1471_v16 = vmul.f32 %v2517_v7, %v2517_v7  ;;  %v2533_v7 = vadd.f32 -1.0, %v463_v2  ;;  %v479_v2 = vld [vmem:[#allocation3 + $0xe18] sm:$0xff] }
 0x33e   :  { %v1968_v29 = vadd.f32 %v1967_v25, %v1456_v20  ;;  %v1472_v20 = vmul.f32 %v2518_v11, %v2518_v11  ;;  %v2534_v11 = vadd.f32 -1.0, %v464_v6  ;;  %v480_v6 = vld [vmem:[#allocation3 + $0xe20] sm:$0xff] }
 0x340   :  { %v1969_v33 = vadd.f32 %v1968_v29, %v1457_v24  ;;  %v1473_v24 = vmul.f32 %v2519_v15, %v2519_v15  ;;  %v2535_v15 = vadd.f32 -1.0, %v465_v10  ;;  %v481_v10 = vld [vmem:[#allocation3 + $0xe28] sm:$0xff] }
 0x342   :  { %v1970_v37 = vadd.f32 %v1969_v33, %v1458_v28  ;;  %v1474_v28 = vmul.f32 %v2520_v19, %v2520_v19  ;;  %v2536_v19 = vadd.f32 -1.0, %v466_v14  ;;  %v482_v14 = vld [vmem:[#allocation3 + $0xe30] sm:$0xff] }
 0x344   :  { %v1971_v41 = vadd.f32 %v1970_v37, %v1459_v32  ;;  %v1475_v32 = vmul.f32 %v2521_v23, %v2521_v23  ;;  %v2537_v23 = vadd.f32 -1.0, %v467_v18  ;;  %v483_v18 = vld [vmem:[#allocation3 + $0xe38] sm:$0xff] }
 0x346   :  { %v1972_v45 = vadd.f32 %v1971_v41, %v1460_v36  ;;  %v1476_v36 = vmul.f32 %v2522_v27, %v2522_v27  ;;  %v2538_v27 = vadd.f32 -1.0, %v468_v22  ;;  %v484_v22 = vld [vmem:[#allocation3 + $0xe40] sm:$0xff] }
 0x348   :  { %v1973_v49 = vadd.f32 %v1972_v45, %v1461_v40  ;;  %v1477_v40 = vmul.f32 %v2523_v31, %v2523_v31  ;;  %v2539_v31 = vadd.f32 -1.0, %v469_v26  ;;  %v485_v26 = vld [vmem:[#allocation3 + $0xe48] sm:$0xff] }
 0x34a   :  { %v1974_v53 = vadd.f32 %v1973_v49, %v1462_v44  ;;  %v1478_v44 = vmul.f32 %v2524_v35, %v2524_v35  ;;  %v2540_v35 = vadd.f32 -1.0, %v470_v30  ;;  %v486_v30 = vld [vmem:[#allocation3 + $0xe50] sm:$0xff] }
 0x34c   :  { %v1975_v57 = vadd.f32 %v1974_v53, %v1463_v48  ;;  %v1479_v48 = vmul.f32 %v2525_v39, %v2525_v39  ;;  %v2541_v39 = vadd.f32 -1.0, %v471_v34  ;;  %v487_v34 = vld [vmem:[#allocation3 + $0xe58] sm:$0xff] }
 0x34e   :  { %v1976_v61 = vadd.f32 %v1975_v57, %v1464_v52  ;;  %v1480_v52 = vmul.f32 %v2526_v43, %v2526_v43  ;;  %v2542_v43 = vadd.f32 -1.0, %v472_v38  ;;  %v488_v38 = vld [vmem:[#allocation3 + $0xe60] sm:$0xff] }
 0x350   :  { %v1977_v1 = vadd.f32 %v1976_v61, %v1465_v56  ;;  %v1481_v56 = vmul.f32 %v2527_v47, %v2527_v47  ;;  %v2543_v47 = vadd.f32 -1.0, %v473_v42  ;;  %v489_v42 = vld [vmem:[#allocation3 + $0xe68] sm:$0xff] }
 0x352   :  { %v1978_v5 = vadd.f32 %v1977_v1, %v1466_v60  ;;  %v1482_v60 = vmul.f32 %v2528_v51, %v2528_v51  ;;  %v2544_v51 = vadd.f32 -1.0, %v474_v46  ;;  %v490_v46 = vld [vmem:[#allocation3 + $0xe70] sm:$0xff] }
 0x354   :  { %v1979_v9 = vadd.f32 %v1978_v5, %v1467_v0  ;;  %v1483_v0 = vmul.f32 %v2529_v55, %v2529_v55  ;;  %v2545_v55 = vadd.f32 -1.0, %v475_v50  ;;  %v491_v50 = vld [vmem:[#allocation3 + $0xe78] sm:$0xff] }
 0x356   :  { %v1980_v13 = vadd.f32 %v1979_v9, %v1468_v4  ;;  %v1484_v4 = vmul.f32 %v2530_v59, %v2530_v59  ;;  %v2546_v59 = vadd.f32 -1.0, %v476_v54  ;;  %v492_v54 = vld [vmem:[#allocation3 + $0xe80] sm:$0xff] }
 0x358   :  { %v1981_v17 = vadd.f32 %v1980_v13, %v1469_v8  ;;  %v1485_v8 = vmul.f32 %v2531_v63, %v2531_v63  ;;  %v2547_v63 = vadd.f32 -1.0, %v477_v58  ;;  %v493_v58 = vld [vmem:[#allocation3 + $0xe88] sm:$0xff] }
 0x35a   :  { %v1982_v21 = vadd.f32 %v1981_v17, %v1470_v12  ;;  %v1486_v12 = vmul.f32 %v2532_v3, %v2532_v3  ;;  %v2548_v3 = vadd.f32 -1.0, %v478_v62  ;;  %v494_v62 = vld [vmem:[#allocation3 + $0xe90] sm:$0xff] }
 0x35c   :  { %v1983_v25 = vadd.f32 %v1982_v21, %v1471_v16  ;;  %v1487_v16 = vmul.f32 %v2533_v7, %v2533_v7  ;;  %v2549_v7 = vadd.f32 -1.0, %v479_v2  ;;  %v495_v2 = vld [vmem:[#allocation3 + $0xe98] sm:$0xff] }
 0x35e   :  { %v1984_v29 = vadd.f32 %v1983_v25, %v1472_v20  ;;  %v1488_v20 = vmul.f32 %v2534_v11, %v2534_v11  ;;  %v2550_v11 = vadd.f32 -1.0, %v480_v6  ;;  %v496_v6 = vld [vmem:[#allocation3 + $0xea0] sm:$0xff] }
 0x360   :  { %v1985_v33 = vadd.f32 %v1984_v29, %v1473_v24  ;;  %v1489_v24 = vmul.f32 %v2535_v15, %v2535_v15  ;;  %v2551_v15 = vadd.f32 -1.0, %v481_v10  ;;  %v497_v10 = vld [vmem:[#allocation3 + $0xea8] sm:$0xff] }
 0x362   :  { %v1986_v37 = vadd.f32 %v1985_v33, %v1474_v28  ;;  %v1490_v28 = vmul.f32 %v2536_v19, %v2536_v19  ;;  %v2552_v19 = vadd.f32 -1.0, %v482_v14  ;;  %v498_v14 = vld [vmem:[#allocation3 + $0xeb0] sm:$0xff] }
 0x364   :  { %v1987_v41 = vadd.f32 %v1986_v37, %v1475_v32  ;;  %v1491_v32 = vmul.f32 %v2537_v23, %v2537_v23  ;;  %v2553_v23 = vadd.f32 -1.0, %v483_v18  ;;  %v499_v18 = vld [vmem:[#allocation3 + $0xeb8] sm:$0xff] }
 0x366   :  { %v1988_v45 = vadd.f32 %v1987_v41, %v1476_v36  ;;  %v1492_v36 = vmul.f32 %v2538_v27, %v2538_v27  ;;  %v2554_v27 = vadd.f32 -1.0, %v484_v22  ;;  %v500_v22 = vld [vmem:[#allocation3 + $0xec0] sm:$0xff] }
 0x368   :  { %v1989_v49 = vadd.f32 %v1988_v45, %v1477_v40  ;;  %v1493_v40 = vmul.f32 %v2539_v31, %v2539_v31  ;;  %v2555_v31 = vadd.f32 -1.0, %v485_v26  ;;  %v501_v26 = vld [vmem:[#allocation3 + $0xec8] sm:$0xff] }
 0x36a   :  { %v1990_v53 = vadd.f32 %v1989_v49, %v1478_v44  ;;  %v1494_v44 = vmul.f32 %v2540_v35, %v2540_v35  ;;  %v2556_v35 = vadd.f32 -1.0, %v486_v30  ;;  %v502_v30 = vld [vmem:[#allocation3 + $0xed0] sm:$0xff] }
 0x36c   :  { %v1991_v57 = vadd.f32 %v1990_v53, %v1479_v48  ;;  %v1495_v48 = vmul.f32 %v2541_v39, %v2541_v39  ;;  %v2557_v39 = vadd.f32 -1.0, %v487_v34  ;;  %v503_v34 = vld [vmem:[#allocation3 + $0xed8] sm:$0xff] }
 0x36e   :  { %v1992_v61 = vadd.f32 %v1991_v57, %v1480_v52  ;;  %v1496_v52 = vmul.f32 %v2542_v43, %v2542_v43  ;;  %v2558_v43 = vadd.f32 -1.0, %v488_v38  ;;  %v504_v38 = vld [vmem:[#allocation3 + $0xee0] sm:$0xff] }
 0x370   :  { %v1993_v1 = vadd.f32 %v1992_v61, %v1481_v56  ;;  %v1497_v56 = vmul.f32 %v2543_v47, %v2543_v47  ;;  %v2559_v47 = vadd.f32 -1.0, %v489_v42  ;;  %v505_v42 = vld [vmem:[#allocation3 + $0xee8] sm:$0xff] }
 0x372   :  { %v1994_v5 = vadd.f32 %v1993_v1, %v1482_v60  ;;  %v1498_v60 = vmul.f32 %v2544_v51, %v2544_v51  ;;  %v2560_v51 = vadd.f32 -1.0, %v490_v46  ;;  %v506_v46 = vld [vmem:[#allocation3 + $0xef0] sm:$0xff] }
 0x374   :  { %v1995_v9 = vadd.f32 %v1994_v5, %v1483_v0  ;;  %v1499_v0 = vmul.f32 %v2545_v55, %v2545_v55  ;;  %v2561_v55 = vadd.f32 -1.0, %v491_v50  ;;  %v507_v50 = vld [vmem:[#allocation3 + $0xef8] sm:$0xff] }
 0x376   :  { %v1996_v13 = vadd.f32 %v1995_v9, %v1484_v4  ;;  %v1500_v4 = vmul.f32 %v2546_v59, %v2546_v59  ;;  %v2562_v59 = vadd.f32 -1.0, %v492_v54  ;;  %v508_v54 = vld [vmem:[#allocation3 + $0xf00] sm:$0xff] }
 0x378   :  { %v1997_v17 = vadd.f32 %v1996_v13, %v1485_v8  ;;  %v1501_v8 = vmul.f32 %v2547_v63, %v2547_v63  ;;  %v2563_v63 = vadd.f32 -1.0, %v493_v58  ;;  %v509_v58 = vld [vmem:[#allocation3 + $0xf08] sm:$0xff] }
 0x37a   :  { %v1998_v21 = vadd.f32 %v1997_v17, %v1486_v12  ;;  %v1502_v12 = vmul.f32 %v2548_v3, %v2548_v3  ;;  %v2564_v3 = vadd.f32 -1.0, %v494_v62  ;;  %v510_v62 = vld [vmem:[#allocation3 + $0xf10] sm:$0xff] }
 0x37c   :  { %v1999_v25 = vadd.f32 %v1998_v21, %v1487_v16  ;;  %v1503_v16 = vmul.f32 %v2549_v7, %v2549_v7  ;;  %v2565_v7 = vadd.f32 -1.0, %v495_v2  ;;  %v511_v2 = vld [vmem:[#allocation3 + $0xf18] sm:$0xff] }
 0x37e   :  { %v2000_v29 = vadd.f32 %v1999_v25, %v1488_v20  ;;  %v1504_v20 = vmul.f32 %v2550_v11, %v2550_v11  ;;  %v2566_v11 = vadd.f32 -1.0, %v496_v6  ;;  %v512_v6 = vld [vmem:[#allocation3 + $0xf20] sm:$0xff] }
 0x380   :  { %v2001_v33 = vadd.f32 %v2000_v29, %v1489_v24  ;;  %v1505_v24 = vmul.f32 %v2551_v15, %v2551_v15  ;;  %v2567_v15 = vadd.f32 -1.0, %v497_v10  ;;  %v513_v10 = vld [vmem:[#allocation3 + $0xf28] sm:$0xff] }
 0x382   :  { %v2002_v37 = vadd.f32 %v2001_v33, %v1490_v28  ;;  %v1506_v28 = vmul.f32 %v2552_v19, %v2552_v19  ;;  %v2568_v19 = vadd.f32 -1.0, %v498_v14  ;;  %v514_v14 = vld [vmem:[#allocation3 + $0xf30] sm:$0xff] }
 0x384   :  { %v2003_v41 = vadd.f32 %v2002_v37, %v1491_v32  ;;  %v1507_v32 = vmul.f32 %v2553_v23, %v2553_v23  ;;  %v2569_v23 = vadd.f32 -1.0, %v499_v18  ;;  %v515_v18 = vld [vmem:[#allocation3 + $0xf38] sm:$0xff] }
 0x386   :  { %v2004_v45 = vadd.f32 %v2003_v41, %v1492_v36  ;;  %v1508_v36 = vmul.f32 %v2554_v27, %v2554_v27  ;;  %v2570_v27 = vadd.f32 -1.0, %v500_v22  ;;  %v516_v22 = vld [vmem:[#allocation3 + $0xf40] sm:$0xff] }
 0x388   :  { %v2005_v49 = vadd.f32 %v2004_v45, %v1493_v40  ;;  %v1509_v40 = vmul.f32 %v2555_v31, %v2555_v31  ;;  %v2571_v31 = vadd.f32 -1.0, %v501_v26  ;;  %v517_v26 = vld [vmem:[#allocation3 + $0xf48] sm:$0xff] }
 0x38a   :  { %v2006_v53 = vadd.f32 %v2005_v49, %v1494_v44  ;;  %v1510_v44 = vmul.f32 %v2556_v35, %v2556_v35  ;;  %v2572_v35 = vadd.f32 -1.0, %v502_v30  ;;  %v518_v30 = vld [vmem:[#allocation3 + $0xf50] sm:$0xff] }
 0x38c   :  { %v2007_v57 = vadd.f32 %v2006_v53, %v1495_v48  ;;  %v1511_v48 = vmul.f32 %v2557_v39, %v2557_v39  ;;  %v2573_v39 = vadd.f32 -1.0, %v503_v34  ;;  %v519_v34 = vld [vmem:[#allocation3 + $0xf58] sm:$0xff] }
 0x38e   :  { %v2008_v61 = vadd.f32 %v2007_v57, %v1496_v52  ;;  %v1512_v52 = vmul.f32 %v2558_v43, %v2558_v43  ;;  %v2574_v43 = vadd.f32 -1.0, %v504_v38  ;;  %v520_v38 = vld [vmem:[#allocation3 + $0xf60] sm:$0xff] }
 0x390   :  { %v2009_v1 = vadd.f32 %v2008_v61, %v1497_v56  ;;  %v1513_v56 = vmul.f32 %v2559_v47, %v2559_v47  ;;  %v2575_v47 = vadd.f32 -1.0, %v505_v42  ;;  %v521_v42 = vld [vmem:[#allocation3 + $0xf68] sm:$0xff] }
 0x392   :  { %v2010_v5 = vadd.f32 %v2009_v1, %v1498_v60  ;;  %v1514_v60 = vmul.f32 %v2560_v51, %v2560_v51  ;;  %v2576_v51 = vadd.f32 -1.0, %v506_v46  ;;  %v522_v46 = vld [vmem:[#allocation3 + $0xf70] sm:$0xff] }
 0x394   :  { %v2011_v9 = vadd.f32 %v2010_v5, %v1499_v0  ;;  %v1515_v0 = vmul.f32 %v2561_v55, %v2561_v55  ;;  %v2577_v55 = vadd.f32 -1.0, %v507_v50  ;;  %v523_v50 = vld [vmem:[#allocation3 + $0xf78] sm:$0xff] }
 0x396   :  { %v2012_v13 = vadd.f32 %v2011_v9, %v1500_v4  ;;  %v1516_v4 = vmul.f32 %v2562_v59, %v2562_v59  ;;  %v2578_v59 = vadd.f32 -1.0, %v508_v54  ;;  %v524_v54 = vld [vmem:[#allocation3 + $0xf80] sm:$0xff] }
 0x398   :  { %v2013_v17 = vadd.f32 %v2012_v13, %v1501_v8  ;;  %v1517_v8 = vmul.f32 %v2563_v63, %v2563_v63  ;;  %v2579_v63 = vadd.f32 -1.0, %v509_v58  ;;  %v525_v58 = vld [vmem:[#allocation3 + $0xf88] sm:$0xff] }
 0x39a   :  { %v2014_v21 = vadd.f32 %v2013_v17, %v1502_v12  ;;  %v1518_v12 = vmul.f32 %v2564_v3, %v2564_v3  ;;  %v2580_v3 = vadd.f32 -1.0, %v510_v62  ;;  %v526_v62 = vld [vmem:[#allocation3 + $0xf90] sm:$0xff] }
 0x39c   :  { %v2015_v25 = vadd.f32 %v2014_v21, %v1503_v16  ;;  %v1519_v16 = vmul.f32 %v2565_v7, %v2565_v7  ;;  %v2581_v7 = vadd.f32 -1.0, %v511_v2  ;;  %v527_v2 = vld [vmem:[#allocation3 + $0xf98] sm:$0xff] }
 0x39e   :  { %v2016_v29 = vadd.f32 %v2015_v25, %v1504_v20  ;;  %v1520_v20 = vmul.f32 %v2566_v11, %v2566_v11  ;;  %v2582_v11 = vadd.f32 -1.0, %v512_v6  ;;  %v528_v6 = vld [vmem:[#allocation3 + $0xfa0] sm:$0xff] }
 0x3a0   :  { %v2017_v33 = vadd.f32 %v2016_v29, %v1505_v24  ;;  %v1521_v24 = vmul.f32 %v2567_v15, %v2567_v15  ;;  %v2583_v15 = vadd.f32 -1.0, %v513_v10  ;;  %v529_v10 = vld [vmem:[#allocation3 + $0xfa8] sm:$0xff] }
 0x3a2   :  { %v2018_v37 = vadd.f32 %v2017_v33, %v1506_v28  ;;  %v1522_v28 = vmul.f32 %v2568_v19, %v2568_v19  ;;  %v2584_v19 = vadd.f32 -1.0, %v514_v14  ;;  %v530_v14 = vld [vmem:[#allocation3 + $0xfb0] sm:$0xff] }
 0x3a4   :  { %v2019_v41 = vadd.f32 %v2018_v37, %v1507_v32  ;;  %v1523_v32 = vmul.f32 %v2569_v23, %v2569_v23  ;;  %v2585_v23 = vadd.f32 -1.0, %v515_v18  ;;  %v531_v18 = vld [vmem:[#allocation3 + $0xfb8] sm:$0xff] }
 0x3a6   :  { %v2020_v45 = vadd.f32 %v2019_v41, %v1508_v36  ;;  %v1524_v36 = vmul.f32 %v2570_v27, %v2570_v27  ;;  %v2586_v27 = vadd.f32 -1.0, %v516_v22  ;;  %v532_v22 = vld [vmem:[#allocation3 + $0xfc0] sm:$0xff] }
 0x3a8   :  { %v2021_v49 = vadd.f32 %v2020_v45, %v1509_v40  ;;  %v1525_v40 = vmul.f32 %v2571_v31, %v2571_v31  ;;  %v2587_v31 = vadd.f32 -1.0, %v517_v26  ;;  %v533_v26 = vld [vmem:[#allocation3 + $0xfc8] sm:$0xff] }
 0x3aa   :  { %v2022_v53 = vadd.f32 %v2021_v49, %v1510_v44  ;;  %v1526_v44 = vmul.f32 %v2572_v35, %v2572_v35  ;;  %v2588_v35 = vadd.f32 -1.0, %v518_v30  ;;  %v534_v30 = vld [vmem:[#allocation3 + $0xfd0] sm:$0xff] }
 0x3ac   :  { %v2023_v57 = vadd.f32 %v2022_v53, %v1511_v48  ;;  %v1527_v48 = vmul.f32 %v2573_v39, %v2573_v39  ;;  %v2589_v39 = vadd.f32 -1.0, %v519_v34  ;;  %v535_v34 = vld [vmem:[#allocation3 + $0xfd8] sm:$0xff] }
 0x3ae   :  { %v2024_v61 = vadd.f32 %v2023_v57, %v1512_v52  ;;  %v1528_v52 = vmul.f32 %v2574_v43, %v2574_v43  ;;  %v2590_v43 = vadd.f32 -1.0, %v520_v38  ;;  %v536_v38 = vld [vmem:[#allocation3 + $0xfe0] sm:$0xff] }
 0x3b0   :  { %v2025_v1 = vadd.f32 %v2024_v61, %v1513_v56  ;;  %v1529_v56 = vmul.f32 %v2575_v47, %v2575_v47  ;;  %v2591_v47 = vadd.f32 -1.0, %v521_v42  ;;  %v537_v42 = vld [vmem:[#allocation3 + $0xfe8] sm:$0xff] }
 0x3b2   :  { %v2026_v5 = vadd.f32 %v2025_v1, %v1514_v60  ;;  %v1530_v60 = vmul.f32 %v2576_v51, %v2576_v51  ;;  %v2592_v51 = vadd.f32 -1.0, %v522_v46  ;;  %v538_v46 = vld [vmem:[#allocation3 + $0xff0] sm:$0xff] }
 0x3b4   :  { %v2027_v9 = vadd.f32 %v2026_v5, %v1515_v0  ;;  %v1531_v0 = vmul.f32 %v2577_v55, %v2577_v55  ;;  %v2593_v55 = vadd.f32 -1.0, %v523_v50  ;;  %v539_v50 = vld [vmem:[#allocation3 + $0xff8] sm:$0xff] }
 0x3b6   :  { %v2028_v13 = vadd.f32 %v2027_v9, %v1516_v4  ;;  %v1532_v4 = vmul.f32 %v2578_v59, %v2578_v59  ;;  %v2594_v59 = vadd.f32 -1.0, %v524_v54  ;;  %v2609_v54 = vadd.f32 -1.0, %v539_v50 }
 0x3b8   :  { %v2029_v17 = vadd.f32 %v2028_v13, %v1517_v8  ;;  %v1533_v8 = vmul.f32 %v2579_v63, %v2579_v63  ;;  %v2595_v63 = vadd.f32 -1.0, %v525_v58 }
 0x3ba   :  { %v2030_v21 = vadd.f32 %v2029_v17, %v1518_v12  ;;  %v1534_v12 = vmul.f32 %v2580_v3, %v2580_v3  ;;  %v2596_v3 = vadd.f32 -1.0, %v526_v62 }
 0x3bc   :  { %v2031_v25 = vadd.f32 %v2030_v21, %v1519_v16  ;;  %v1535_v16 = vmul.f32 %v2581_v7, %v2581_v7  ;;  %v2597_v7 = vadd.f32 -1.0, %v527_v2 }
 0x3be   :  { %v2032_v29 = vadd.f32 %v2031_v25, %v1520_v20  ;;  %v1536_v20 = vmul.f32 %v2582_v11, %v2582_v11  ;;  %v2598_v11 = vadd.f32 -1.0, %v528_v6 }
 0x3c0   :  { %v2033_v33 = vadd.f32 %v2032_v29, %v1521_v24  ;;  %v1537_v24 = vmul.f32 %v2583_v15, %v2583_v15  ;;  %v2599_v15 = vadd.f32 -1.0, %v529_v10 }
 0x3c2   :  { %v2034_v37 = vadd.f32 %v2033_v33, %v1522_v28  ;;  %v1538_v28 = vmul.f32 %v2584_v19, %v2584_v19  ;;  %v2600_v19 = vadd.f32 -1.0, %v530_v14 }
 0x3c4   :  { %v2035_v41 = vadd.f32 %v2034_v37, %v1523_v32  ;;  %v1539_v32 = vmul.f32 %v2585_v23, %v2585_v23  ;;  %v2601_v23 = vadd.f32 -1.0, %v531_v18 }
 0x3c6   :  { %v2036_v45 = vadd.f32 %v2035_v41, %v1524_v36  ;;  %v1540_v36 = vmul.f32 %v2586_v27, %v2586_v27  ;;  %v2602_v27 = vadd.f32 -1.0, %v532_v22 }
 0x3c8   :  { %v2037_v49 = vadd.f32 %v2036_v45, %v1525_v40  ;;  %v1541_v40 = vmul.f32 %v2587_v31, %v2587_v31  ;;  %v2603_v31 = vadd.f32 -1.0, %v533_v26 }
 0x3ca   :  { %v2038_v53 = vadd.f32 %v2037_v49, %v1526_v44  ;;  %v1542_v44 = vmul.f32 %v2588_v35, %v2588_v35  ;;  %v2604_v35 = vadd.f32 -1.0, %v534_v30 }
 0x3cc   :  { %v2039_v57 = vadd.f32 %v2038_v53, %v1527_v48  ;;  %v1543_v48 = vmul.f32 %v2589_v39, %v2589_v39  ;;  %v2605_v39 = vadd.f32 -1.0, %v535_v34 }
 0x3ce   :  { %v2040_v61 = vadd.f32 %v2039_v57, %v1528_v52  ;;  %v1544_v52 = vmul.f32 %v2590_v43, %v2590_v43  ;;  %v2606_v43 = vadd.f32 -1.0, %v536_v38 }
 0x3d0   :  { %v2041_v1 = vadd.f32 %v2040_v61, %v1529_v56  ;;  %v1545_v56 = vmul.f32 %v2591_v47, %v2591_v47  ;;  %v2607_v47 = vadd.f32 -1.0, %v537_v42 }
 0x3d2   :  { %v2042_v5 = vadd.f32 %v2041_v1, %v1530_v60  ;;  %v1546_v60 = vmul.f32 %v2592_v51, %v2592_v51  ;;  %v2608_v51 = vadd.f32 -1.0, %v538_v46 }
 0x3d4   :  { %v2043_v9 = vadd.f32 %v2042_v5, %v1531_v0  ;;  %v1547_v0 = vmul.f32 %v2593_v55, %v2593_v55  ;;  %v1561_v55 = vmul.f32 %v2607_v47, %v2607_v47 }
 0x3d6   :  { %v2044_v13 = vadd.f32 %v2043_v9, %v1532_v4  ;;  %v1548_v4 = vmul.f32 %v2594_v59, %v2594_v59  ;;  %v1563_v59 = vmul.f32 %v2609_v54, %v2609_v54 }
 0x3d8   :  { %v2045_v17 = vadd.f32 %v2044_v13, %v1533_v8  ;;  %v1549_v8 = vmul.f32 %v2595_v63, %v2595_v63 }
 0x3da   :  { %v2046_v21 = vadd.f32 %v2045_v17, %v1534_v12  ;;  %v1550_v12 = vmul.f32 %v2596_v3, %v2596_v3 }
 0x3dc   :  { %v2047_v25 = vadd.f32 %v2046_v21, %v1535_v16  ;;  %v1551_v16 = vmul.f32 %v2597_v7, %v2597_v7 }
 0x3de   :  { %v2048_v29 = vadd.f32 %v2047_v25, %v1536_v20  ;;  %v1552_v20 = vmul.f32 %v2598_v11, %v2598_v11 }
 0x3e0   :  { %v2049_v33 = vadd.f32 %v2048_v29, %v1537_v24  ;;  %v1553_v24 = vmul.f32 %v2599_v15, %v2599_v15 }
 0x3e2   :  { %v2050_v37 = vadd.f32 %v2049_v33, %v1538_v28  ;;  %v1554_v28 = vmul.f32 %v2600_v19, %v2600_v19 }
 0x3e4   :  { %v2051_v41 = vadd.f32 %v2050_v37, %v1539_v32  ;;  %v1555_v32 = vmul.f32 %v2601_v23, %v2601_v23 }
 0x3e6   :  { %v2052_v45 = vadd.f32 %v2051_v41, %v1540_v36  ;;  %v1556_v36 = vmul.f32 %v2602_v27, %v2602_v27 }
 0x3e8   :  { %v2053_v49 = vadd.f32 %v2052_v45, %v1541_v40  ;;  %v1557_v40 = vmul.f32 %v2603_v31, %v2603_v31 }
 0x3ea   :  { %v2054_v53 = vadd.f32 %v2053_v49, %v1542_v44  ;;  %v1558_v44 = vmul.f32 %v2604_v35, %v2604_v35 }
 0x3ec   :  { %v2055_v57 = vadd.f32 %v2054_v53, %v1543_v48  ;;  %v1559_v48 = vmul.f32 %v2605_v39, %v2605_v39 }
 0x3ee   :  { %v2056_v61 = vadd.f32 %v2055_v57, %v1544_v52  ;;  %v1560_v52 = vmul.f32 %v2606_v43, %v2606_v43  ;;  %v1562_v57 = vmul.f32 %v2608_v51, %v2608_v51 }
 0x3f0   :  { %v2057_v1 = vadd.f32 %v2056_v61, %v1545_v56 }
 0x3f2   :  { %v2058_v5 = vadd.f32 %v2057_v1, %v1546_v60 }
 0x3f4   :  { %v2059_v9 = vadd.f32 %v2058_v5, %v1547_v0 }
 0x3f6   :  { %v2060_v13 = vadd.f32 %v2059_v9, %v1548_v4 }
 0x3f8   :  { %v2061_v17 = vadd.f32 %v2060_v13, %v1549_v8 }
 0x3fa   :  { %v2062_v21 = vadd.f32 %v2061_v17, %v1550_v12 }
 0x3fc   :  { %v2063_v25 = vadd.f32 %v2062_v21, %v1551_v16 }
 0x3fe   :  { %v2064_v29 = vadd.f32 %v2063_v25, %v1552_v20 }
 0x400   :  { %v2065_v33 = vadd.f32 %v2064_v29, %v1553_v24 }
 0x402   :  { %v2066_v37 = vadd.f32 %v2065_v33, %v1554_v28 }
 0x404   :  { %v2067_v41 = vadd.f32 %v2066_v37, %v1555_v32 }
 0x406   :  { %v2068_v45 = vadd.f32 %v2067_v41, %v1556_v36 }
 0x408   :  { %v2069_v49 = vadd.f32 %v2068_v45, %v1557_v40 }
 0x40a   :  { %v2070_v53 = vadd.f32 %v2069_v49, %v1558_v44 }
 0x40c   :  { %v2071_v56 = vadd.f32 %v2070_v53, %v1559_v48 }
 0x40e   :  { %v2072_v58 = vadd.f32 %v2071_v56, %v1560_v52 }
 0x410   :  { %v2073_v60 = vadd.f32 %v2072_v58, %v1561_v55 }
 0x412   :  { %v2074_v61 = vadd.f32 %v2073_v60, %v1562_v57 }
 0x414   :  { %v2075_v62 = vadd.f32 %v2074_v61, %v1563_v59 }
 0x416   :  { %2082 = vst [vmem:[#allocation6] sm:$0xff] %v2075_v62 }
 0x417   :  { %2647 = shalt.err (!%p2644_p12)
}
 0x418   :  { %s2648_s24 = scalar_lea.hbm %s2701_s1, 128 }
 0x419   :  { %p2649_p13 = scmp.ne.s32.totalorder %s2701_s1, %s2648_s24  ;;  %p2652_p0 = scmp.lt.u32.totalorder %s2648_s24, %s2701_s1 }
 0x41b   :  { %p2654_p1 = pnand %p2652_p0, %p2649_p13 }
 0x41d   :  { %2657 = shalt.err (!%p2654_p1)
}
 0x41e   :  { %2092 = dma.vmem_to_hbm [thread:$0]  %s2090_s20, 128, %s2701_s1, [#allocation5]  }
 0x41f   :  { %2660 = dma.done.wait [#allocation5], 128  }
 0x420   :  { %2661 = vsyncadd [#allocation5], 4294967168 }
 0x421   :  { %2096 = vsyncpa [#allocation4], 1 }
 0x422   :  { %2097 = vsyncpa [#allocation5], 1 }

</bundles_post_ra>
